<compile_context>
chip_gen: v7x
topology: tpu7x:2x2x1
jax: 0.10.0
libtpu: 0.0.40
codegen_flags: <defaults>
</compile_context>

<pallas_src>
import math
import functools

import numpy as np
import jax
import jax.numpy as jnp
from jax import lax
from jax.experimental import pallas as pl
from jax.experimental.pallas import tpu as pltpu


# ----------------------------------------------------------------------------
# In-kernel helpers (traced inline into the Pallas kernel).
# ----------------------------------------------------------------------------
def _erf(x):
    # Abramowitz & Stegun 7.1.26 rational approximation, |error| < 1.5e-7.
    # (Only VPU arithmetic + EUP exp -> guaranteed Mosaic lowering.)
    a1, a2, a3, a4, a5 = (0.254829592, -0.284496736, 1.421413741,
                          -1.453152027, 1.061405429)
    p = 0.3275911
    sgn = jnp.where(x >= 0.0, 1.0, -1.0)
    z = jnp.abs(x)
    t = 1.0 / (1.0 + p * z)
    poly = ((((a5 * t + a4) * t + a3) * t + a2) * t + a1) * t
    return sgn * (1.0 - poly * jnp.exp(-z * z))


def _gelu(x):
    # gelu(x) = x * 0.5 * (1 + erf(x / sqrt(2)))   (erf flavour, as in the module)
    return x * 0.5 * (1.0 + _erf(x * (1.0 / math.sqrt(2.0))))


def _layer_norm(x, gamma, beta, eps):
    # torch.nn.LayerNorm over the last dim (biased variance); gamma/beta (1, D).
    mu = jnp.mean(x, axis=-1, keepdims=True)
    xc = x - mu
    var = jnp.mean(xc * xc, axis=-1, keepdims=True)
    return xc * lax.rsqrt(var + eps) * gamma + beta


def _mha(q, k, v, add_mask_bh, *, num_heads, head_size):
    """Multi-head attention on (B, Lq, D) / (B, Lk, D) activations.

    Heads are folded into a (B*H) batch dim with a single reshape+transpose per
    operand, then each attention matmul is ONE batched lax.dot_general (no
    per-head 8-lane slices, no concatenate).  Returns (context (B, Lq, D),
    scaled scores (B*H, Lq, Lk)).
    """
    B, Lq, D = q.shape
    Lk = k.shape[1]
    H, dh = num_heads, head_size
    scale = 1.0 / math.sqrt(dh)

    def split_heads(x, L):
        # (B, L, D) -> (B*H, L, dh): one relayout per operand.
        return jnp.transpose(x.reshape(B, L, H, dh), (0, 2, 1, 3)).reshape(B * H, L, dh)

    qh = split_heads(q, Lq)
    kh = split_heads(k, Lk)
    vh = split_heads(v, Lk)

    dn_qk = (((2,), (2,)), ((0,), (0,)))   # (BH,Lq,dh).(BH,Lk,dh) -> (BH,Lq,Lk)
    dn_pv = (((2,), (1,)), ((0,), (0,)))   # (BH,Lq,Lk).(BH,Lk,dh) -> (BH,Lq,dh)

    s = lax.dot_general(qh, kh, dn_qk, preferred_element_type=jnp.float32) * scale
    if add_mask_bh is not None:
        s = s + add_mask_bh
    m = jnp.max(s, axis=-1, keepdims=True)
    e = jnp.exp(s - m)
    # Exact normalization (approx-EUP reciprocal previously compounded to ~5e-3
    # output error across the layer stack).
    p = e / jnp.sum(e, axis=-1, keepdims=True)
    # TODO(synk): nn.Dropout(0.1) on the probs is identity in eval mode;
    # training-mode dropout is not implemented.
    ctx = lax.dot_general(p, vh, dn_pv, preferred_element_type=jnp.float32)
    # (B*H, Lq, dh) -> (B, Lq, D): single merge relayout.
    ctx = jnp.transpose(ctx.reshape(B, H, Lq, dh), (0, 2, 1, 3)).reshape(B, Lq, D)
    return ctx, s


# ----------------------------------------------------------------------------
# Fused DecoderLayer kernel: one grid step = one (batch block, layer).
# ----------------------------------------------------------------------------
def _decoder_layer_kernel(
        dec_h_ref, dec_mask_ref, enc_ref,
        wA_ref, w2_ref, small_ref,
        out_ref, vis_ref,
        h_scr,
        *, num_heads, head_size, eps, diagonal_mask):
    l = pl.program_id(1)
    n_layers = pl.num_programs(1)

    B, Lt, D = h_scr.shape
    Lv = enc_ref.shape[1]
    H, dh = num_heads, head_size

    # Layer 0 of this batch block: load the embedded/pos-encoded input into the
    # VMEM carry.  Later layers read/write the carry only, so hidden states
    # never round-trip through HBM between layers.
    @pl.when(l == 0)
    def _():
        h_scr[...] = dec_h_ref[...].astype(jnp.float32)

    # ---- unpack this layer's packed parameters (static ref slices) ----------
    wqkv = wA_ref[:, 0:3 * D]            # self-attn fused Wqkv   (D, 3D)
    wqx = wA_ref[:, 3 * D:4 * D]         # cross Wq               (D, D)
    wkvx = wA_ref[:, 4 * D:6 * D]        # cross fused Wkv        (D, 2D)
    w1 = wA_ref[:, 6 * D:8 * D]          # mlp fc1                (D, 2D)
    w2 = w2_ref[...]                     # mlp fc2                (2D, D)

    parts = []
    off = 0
    for w in (3 * D, D, D, D, 2 * D, D, D, 2 * D, D, D, D):
        parts.append(small_ref[:, off:off + w])
        off += w
    (bqkv, g1, be1, bqx, bkvx, g2, be2, b1m, b2m, g3, be3) = parts

    # ---- self-attention additive mask, built in-kernel from dec_mask --------
    if diagonal_mask:
        q_idx = lax.broadcasted_iota(jnp.int32, (Lt, Lt), 0)
        k_idx = lax.broadcasted_iota(jnp.int32, (Lt, Lt), 1)
        tril = (k_idx <= q_idx).astype(jnp.float32)                       # (Lt, Lt)
        dm_bh = jnp.broadcast_to(dec_mask_ref[...].astype(jnp.float32),
                                 (B, H, Lt)).reshape(B * H, Lt)
        keep = dm_bh[:, None, :] * tril[None, :, :]                       # (B*H, Lt, Lt)
        add_mask_bh = (keep - 1.0) * 10000.0                              # (1-keep)*-1e4
    else:
        add_mask_bh = None

    h = h_scr[...]                              # (B, Lt, D) f32
    hf = h.reshape(B * Lt, D)                   # fold batch for projections

    # ---- self-attention: fused QKV projection, one (B*Lt, D) @ (D, 3D) ------
    qkv = jnp.dot(hf, wqkv, preferred_element_type=jnp.float32) + bqkv
    q = qkv[:, :D].reshape(B, Lt, D)
    k = qkv[:, D:2 * D].reshape(B, Lt, D)
    v = qkv[:, 2 * D:].reshape(B, Lt, D)
    sa, _ = _mha(q, k, v, add_mask_bh, num_heads=H, head_size=dh)
    h1 = _layer_norm(sa + h, g1, be1, eps)                                # norm1

    # ---- cross-attention: fused KV projection of the encoder states ---------
    h1f = h1.reshape(B * Lt, D)
    qx = (jnp.dot(h1f, wqx, preferred_element_type=jnp.float32) + bqx).reshape(B, Lt, D)
    encf = enc_ref[...].reshape(B * Lv, D)      # native dtype straight into the MXU
    kv = jnp.dot(encf, wkvx, preferred_element_type=jnp.float32) + bkvx
    kx = kv[:, :D].reshape(B, Lv, D)
    vx = kv[:, D:].reshape(B, Lv, D)
    ca, scores = _mha(qx, kx, vx, None, num_heads=H, head_size=dh)
    h2 = _layer_norm(h1 + ca, g2, be2, eps)                               # norm2

    # ---- MLP: fc1 -> gelu -> fc2 -> +res -> norm -----------------------------
    h2f = h2.reshape(B * Lt, D)
    m1 = _gelu(jnp.dot(h2f, w1, preferred_element_type=jnp.float32) + b1m)
    m2 = jnp.dot(m1, w2, preferred_element_type=jnp.float32) + b2m
    h3 = _layer_norm(h2 + m2.reshape(B, Lt, D), g3, be3, eps)             # norm3

    h_scr[...] = h3                             # carry to the next layer

    # Only the last layer's results reach HBM; both stores are lane-dense
    # ((B, Lt*D) and (B*H, Lt*Lv) slabs), avoiding masked partial vst.
    @pl.when(l == n_layers - 1)
    def _():
        out_ref[...] = h3.reshape(B, Lt * D).astype(out_ref.dtype)
        vis_ref[...] = scores.reshape(B * H, Lt * Lv).astype(vis_ref.dtype)


def _decoder_stack(dec_h, dec_mask3, enc_outputs, packed, *, num_heads,
                   diagonal_mask=True, batch_blocks=1, eps=1e-6,
                   vmem_limit_bytes=None):
    N, Lt, D = dec_h.shape
    _, Lv, _ = enc_outputs.shape
    wA_all, w2_all, small_all = packed
    n_layers = wA_all.shape[0]
    H = num_heads
    assert N % batch_blocks == 0
    B = N // batch_blocks

    kernel = functools.partial(_decoder_layer_kernel, num_heads=H,
                               head_size=D // H, eps=eps,
                               diagonal_mask=diagonal_mask)

    def wspec(r, c):
        # Per-layer packed weight: squeeze the layer dim (kernel sees a 2-D ref);
        # indexing by `l` lets Pallas pipeline layer l+1's weight DMA under
        # layer l's compute.
        # NOTE: at production D (>= ~1024) add K-tiling / bf16 + an explicit
        # vmem_limit_bytes (v7x VMEM is 64 MiB); at D=32 full weights are trivial.
        return pl.BlockSpec((pl.Squeezed(), r, c), lambda b, l: (l, 0, 0))

    in_specs = [
        pl.BlockSpec((B, Lt, D), lambda b, l: (b, 0, 0)),    # embedded decoder input
        pl.BlockSpec((B, 1, Lt), lambda b, l: (b, 0, 0)),    # dec_mask (mask built in-kernel)
        pl.BlockSpec((B, Lv, D), lambda b, l: (b, 0, 0)),    # encoder outputs
        wspec(D, 8 * D),                                     # packed [Wqkv|Wq_x|Wkv_x|W1]
        wspec(2 * D, D),                                     # mlp fc2 W
        wspec(1, 15 * D),                                    # packed biases + LN params
    ]
    # Lane-dense output slabs; reshaped back to (N,Lt,D)/(N,H,Lt,Lv) outside.
    out_specs = (
        pl.BlockSpec((B, Lt * D), lambda b, l: (b, 0)),
        pl.BlockSpec((B * H, Lt * Lv), lambda b, l: (b, 0)),
    )
    out_shape = (
        jax.ShapeDtypeStruct((N, Lt * D), dec_h.dtype),
        jax.ShapeDtypeStruct((N * H, Lt * Lv), jnp.float32),
    )

    h_flat, vis_flat = pl.pallas_call(
        kernel,
        out_shape=out_shape,
        grid_spec=pltpu.PrefetchScalarGridSpec(
            num_scalar_prefetch=0,
            grid=(batch_blocks, n_layers),
            in_specs=in_specs,
            out_specs=out_specs,
            scratch_shapes=[pltpu.VMEM((B, Lt, D), jnp.float32)],
        ),
        compiler_params=pltpu.CompilerParams(
            dimension_semantics=("parallel", "arbitrary"),
            vmem_limit_bytes=vmem_limit_bytes),
    )(dec_h, dec_mask3, enc_outputs, wA_all, w2_all, small_all)

    # Pure layout plumbing outside the kernel.
    h_out = h_flat.reshape(N, Lt, D)
    vis = vis_flat.reshape(N, H, Lt, Lv)
    return h_out, vis


# ----------------------------------------------------------------------------
# Parameter packing: fuse QKV / KV / fc1 into one D-row weight slab per layer,
# and all bias / LayerNorm vectors into one (1, 15D) row per layer.
# ----------------------------------------------------------------------------
def _pack_layer_params(layers):
    c = jnp.concatenate

    def stack(fn):
        return jnp.stack([fn(lp) for lp in layers], axis=0)

    wA = stack(lambda p: c([
        p['self']['wq'], p['self']['wk'], p['self']['wv'],   # Wqkv   (D, 3D)
        p['cross']['wq'],                                     # Wq_x   (D, D)
        p['cross']['wk'], p['cross']['wv'],                   # Wkv_x  (D, 2D)
        p['w1'],                                              # fc1    (D, 2D)
    ], axis=1))                                               # -> (D, 8D)
    w2 = stack(lambda p: p['w2'])                             # (2D, D)
    small = stack(lambda p: c([
        p['self']['bq'], p['self']['bk'], p['self']['bv'],    # bqkv (3D)
        p['g1'], p['b1'],                                      # norm1
        p['cross']['bq'],                                      # bq_x
        p['cross']['bk'], p['cross']['bv'],                    # bkv_x (2D)
        p['g2'], p['b2'],                                      # norm2
        p['b1m'],                                              # fc1 bias (2D)
        p['b2m'],                                              # fc2 bias
        p['g3'], p['b3'],                                      # norm3
    ])[None, :])                                               # (1, 15D)
    return wA, w2, small


# ----------------------------------------------------------------------------
# Full DynamicCore forward (eval mode).
# ----------------------------------------------------------------------------
def dynamic_core_forward(seq, dec_mask, enc_outputs, embed_table, pe_table,
                         layers, *, num_heads, diagonal_mask=True,
                         batch_blocks=1, vmem_limit_bytes=None):
    """seq: (N, Lt) int32; dec_mask: (N, Lt) {0,1}; enc_outputs: (N, Lv, D)."""
    N, Lt = seq.shape

    # Embedding gather + positional-encoding add + `fc`.  word_dim == att_dim
    # here, so `fc` is Dropout(0.1) -> identity in eval mode.
    # TODO(synk): the word_dim != att_dim branch of DynamicCore.fc
    # (Linear + Dropout + LayerNorm) is not exercised by this configuration.
    h0 = embed_table[seq] + pe_table[:Lt][None, :, :]
    h0 = h0.astype(enc_outputs.dtype)

    # The additive self-attention mask is built inside the kernel from dec_mask,
    # so only the tiny (N, 1, Lt) mask is DMA'd (not an (N, Lt, Lt) f32 tensor).
    dec_mask3 = dec_mask.astype(jnp.float32).reshape(N, 1, Lt)

    packed = _pack_layer_params(layers)
    return _decoder_stack(h0, dec_mask3, enc_outputs, packed,
                          num_heads=num_heads, diagonal_mask=diagonal_mask,
                          batch_blocks=batch_blocks,
                          vmem_limit_bytes=vmem_limit_bytes)


# ----------------------------------------------------------------------------
# Plain-JAX reference mirroring the PyTorch module (eval mode).
# ----------------------------------------------------------------------------
def dynamic_core_reference(seq, dec_mask, enc_outputs, embed_table, pe_table,
                           layers, *, num_heads, diagonal_mask=True):
    N, Lt = seq.shape
    D = embed_table.shape[1]
    dh = D // num_heads
    h = embed_table[seq] + pe_table[:Lt][None, :, :]

    if diagonal_mask:
        tri = jnp.tril(jnp.ones((Lt, Lt), jnp.float32))
        m = dec_mask.astype(jnp.float32)[:, None, :] * tri[None, :, :]
        add_mask = (1.0 - m)[:, None, :, :] * (-10000.0)
    else:
        add_mask = None

    def split_heads(x):
        n, L, _ = x.shape
        return x.reshape(n, L, num_heads, dh).transpose(0, 2, 1, 3)

    def attention(xq, xkv, p, amask):
        q = split_heads(xq @ p['wq'] + p['bq'])
        k = split_heads(xkv @ p['wk'] + p['bk'])
        v = split_heads(xkv @ p['wv'] + p['bv'])
        scores = jnp.einsum('nhqd,nhkd->nhqk', q, k) / math.sqrt(dh)
        if amask is not None:
            scores = scores + amask
        probs = jax.nn.softmax(scores, axis=-1)
        ctx = jnp.einsum('nhqk,nhkd->nhqd', probs, v)
        ctx = ctx.transpose(0, 2, 1, 3).reshape(xq.shape[0], xq.shape[1], D)
        return ctx, scores

    def layer_norm(x, g, b, eps=1e-6):
        mu = x.mean(-1, keepdims=True)
        var = ((x - mu) ** 2).mean(-1, keepdims=True)
        return (x - mu) / jnp.sqrt(var + eps) * g + b

    def gelu_exact(x):
        return x * 0.5 * (1.0 + jax.scipy.special.erf(x / math.sqrt(2.0)))

    vis = None
    for lp in layers:
        sa, _ = attention(h, h, lp['self'], add_mask)
        a = layer_norm(sa + h, lp['g1'], lp['b1'])
        ca, vis = attention(a, enc_outputs, lp['cross'], None)
        x = layer_norm(a + ca, lp['g2'], lp['b2'])
        m1 = gelu_exact(x @ lp['w1'] + lp['b1m'])
        m2 = m1 @ lp['w2'] + lp['b2m']
        h = layer_norm(x + m2, lp['g3'], lp['b3'])
    return h, vis


# ----------------------------------------------------------------------------
# Self-test.
# ----------------------------------------------------------------------------
if __name__ == "__main__":
    # Small config consistent with the module: att_dim=32, att_head=4,
    # att_layer=2, word_dim == att_dim, seq_length (pos-enc max_len) = 16.
    N, Lt, Lv, D, H, NUM_LAYERS = 2, 8, 16, 32, 4, 2
    VOCAB, MAX_LEN = 50, 16

    key = jax.random.PRNGKey(0)
    key, k_tok, k_emb, k_enc = jax.random.split(key, 4)

    # Token sequence with trailing padding (token id 0, padding_idx=0).
    lengths = jnp.array([8, 6], dtype=jnp.int32)
    tok = jax.random.randint(k_tok, (N, Lt), 1, VOCAB, dtype=jnp.int32)
    pos_ids = jnp.arange(Lt, dtype=jnp.int32)[None, :]
    valid = pos_ids < lengths[:, None]
    seq = jnp.where(valid, tok, 0)
    dec_mask = valid.astype(jnp.float32)

    embed_table = 0.5 * jax.random.normal(k_emb, (VOCAB, D), jnp.float32)
    embed_table = embed_table.at[0].set(0.0)     # padding_idx=0 -> zero row

    # PositionEncoding table (same formula as the module).
    pos_f = np.arange(MAX_LEN, dtype=np.float32)[:, None]
    div = np.exp(np.arange(0, D, 2, dtype=np.float32) * -(math.log(10000.0) / D))
    pe_np = np.zeros((MAX_LEN, D), dtype=np.float32)
    pe_np[:, 0::2] = np.sin(pos_f * div)
    pe_np[:, 1::2] = np.cos(pos_f * div)
    pe_table = jnp.asarray(pe_np)

    enc_outputs = jax.random.normal(k_enc, (N, Lv, D), jnp.float32)

    def make_linear(k, din, dout):
        k1, k2 = jax.random.split(k)
        lim = 1.0 / math.sqrt(din)
        w = jax.random.uniform(k1, (din, dout), jnp.float32, -lim, lim)
        b = jax.random.uniform(k2, (dout,), jnp.float32, -lim, lim)
        return w, b

    def make_norm(k, d):
        k1, k2 = jax.random.split(k)
        g = 1.0 + 0.05 * jax.random.normal(k1, (d,), jnp.float32)
        b = 0.05 * jax.random.normal(k2, (d,), jnp.float32)
        return g, b

    layers = []
    for _ in range(NUM_LAYERS):
        key, *ks = jax.random.split(key, 12)
        wq, bq = make_linear(ks[0], D, D)
        wk, bk = make_linear(ks[1], D, D)
        wv, bv = make_linear(ks[2], D, D)
        g1, b1 = make_norm(ks[3], D)
        xwq, xbq = make_linear(ks[4], D, D)
        xwk, xbk = make_linear(ks[5], D, D)
        xwv, xbv = make_linear(ks[6], D, D)
        g2, b2 = make_norm(ks[7], D)
        w1, b1m = make_linear(ks[8], D, 2 * D)
        w2, b2m = make_linear(ks[9], 2 * D, D)
        g3, b3 = make_norm(ks[10], D)
        layers.append(dict(
            self=dict(wq=wq, bq=bq, wk=wk, bk=bk, wv=wv, bv=bv),
            cross=dict(wq=xwq, bq=xbq, wk=xwk, bk=xbk, wv=xwv, bv=xbv),
            g1=g1, b1=b1, g2=g2, b2=b2,
            w1=w1, b1m=b1m, w2=w2, b2m=b2m, g3=g3, b3=b3))

    # batch_blocks=1 folds the whole batch into each grid step (best for the
    # single-TensorCore v5e/v6e).  On v7x set batch_blocks>1 ONLY when each
    # block keeps B*Lt >= ~128 rows of matmul M; at N=2 that is never the case.
    out_h, att_vis = dynamic_core_forward(
        seq, dec_mask, enc_outputs, embed_table, pe_table, layers,
        num_heads=H, diagonal_mask=True, batch_blocks=1)
    out_h, att_vis = jax.block_until_ready((out_h, att_vis))

    ref_h, ref_vis = dynamic_core_reference(
        seq, dec_mask, enc_outputs, embed_table, pe_table, layers,
        num_heads=H, diagonal_mask=True)

    assert out_h.shape == (N, Lt, D)
    assert att_vis.shape == (N, H, Lt, Lv)
    # Tolerance covers the rational-erf GELU approximation (|err| < 1.5e-7) and
    # MXU-vs-XLA accumulation-order differences; observed error is ~1e-5.
    assert jnp.allclose(out_h, ref_h, atol=2e-3, rtol=2e-3), \
        float(jnp.max(jnp.abs(out_h - ref_h)))
    assert jnp.allclose(att_vis, ref_vis, atol=2e-3, rtol=2e-3), \
        float(jnp.max(jnp.abs(att_vis - ref_vis)))

    print("KERNEL_OK")
</pallas_src>

<mosaic_0001>
module attributes {stable_mosaic.version = 11 : i64} {
  func.func @_decoder_layer_kernel(%arg0: i32, %arg1: i32, %arg2: memref<2x8x32xf32, #tpu.memory_space<vmem>>, %arg3: memref<2x1x8xf32, #tpu.memory_space<vmem>>, %arg4: memref<2x16x32xf32, #tpu.memory_space<vmem>>, %arg5: memref<1x32x256xf32, #tpu.memory_space<vmem>>, %arg6: memref<1x64x32xf32, #tpu.memory_space<vmem>>, %arg7: memref<1x1x480xf32, #tpu.memory_space<vmem>>, %arg8: memref<2x256xf32, #tpu.memory_space<vmem>>, %arg9: memref<8x128xf32, #tpu.memory_space<vmem>>, %arg10: memref<2x8x32xf32, #tpu.memory_space<vmem>>) attributes {dimension_semantics = [#tpu.dimension_semantics<parallel>, #tpu.dimension_semantics<arbitrary>], iteration_bounds = array<i64: 1, 2>, scalar_prefetch = 0 : i64, scratch_operands = 1 : i64, tpu.core_type = #tpu.core_type<tc>, window_params = [{transform_indices = @transform_0, window_bounds = array<i64: 2, 8, 32>}, {transform_indices = @transform_1, window_bounds = array<i64: 2, 1, 8>}, {transform_indices = @transform_2, window_bounds = array<i64: 2, 16, 32>}, {transform_indices = @transform_3, window_bounds = array<i64: 1, 32, 256>}, {transform_indices = @transform_4, window_bounds = array<i64: 1, 64, 32>}, {transform_indices = @transform_5, window_bounds = array<i64: 1, 1, 480>}, {transform_indices = @transform_6, window_bounds = array<i64: 2, 256>}, {transform_indices = @transform_7, window_bounds = array<i64: 8, 128>}]} {
    %c0_i32 = arith.constant 0 : i32
    %0 = arith.cmpi eq, %arg1, %c0_i32 : i32
    %1 = arith.extui %0 : i1 to i32
    %c0_i32_0 = arith.constant 0 : i32
    %2 = arith.cmpi ne, %1, %c0_i32_0 : i32
    scf.if %2 {
      %c0_98 = arith.constant 0 : index
      %c0_99 = arith.constant 0 : index
      %c0_100 = arith.constant 0 : index
      %251 = vector.load %arg2[%c0_98, %c0_99, %c0_100] : memref<2x8x32xf32, #tpu.memory_space<vmem>>, vector<2x8x32xf32>
      %c0_101 = arith.constant 0 : index
      %c0_102 = arith.constant 0 : index
      %c0_103 = arith.constant 0 : index
      %252 = vector.load %arg10[%c0_101, %c0_102, %c0_103] : memref<2x8x32xf32, #tpu.memory_space<vmem>>, vector<2x8x32xf32>
      tpu.vector_store %arg10[%c0_101, %c0_102, %c0_103], %251 {strides = array<i32>} : memref<2x8x32xf32, #tpu.memory_space<vmem>>, vector<2x8x32xf32>,
    } else {
    }
    %c0 = arith.constant 0 : index
    %c0_1 = arith.constant 0 : index
    %c0_2 = arith.constant 0 : index
    %3 = vector.load %arg5[%c0, %c0_1, %c0_2] : memref<1x32x256xf32, #tpu.memory_space<vmem>>, vector<1x32x96xf32>
    %4 = vector.shape_cast %3 : vector<1x32x96xf32> to vector<32x96xf32>
    %c0_3 = arith.constant 0 : index
    %c0_4 = arith.constant 0 : index
    %c96 = arith.constant 96 : index
    %5 = vector.load %arg5[%c0_3, %c0_4, %c96] : memref<1x32x256xf32, #tpu.memory_space<vmem>>, vector<1x32x32xf32>
    %6 = vector.shape_cast %5 : vector<1x32x32xf32> to vector<32x32xf32>
    %c0_5 = arith.constant 0 : index
    %c0_6 = arith.constant 0 : index
    %c128 = arith.constant 128 : index
    %7 = vector.load %arg5[%c0_5, %c0_6, %c128] : memref<1x32x256xf32, #tpu.memory_space<vmem>>, vector<1x32x64xf32>
    %8 = vector.shape_cast %7 : vector<1x32x64xf32> to vector<32x64xf32>
    %c0_7 = arith.constant 0 : index
    %c0_8 = arith.constant 0 : index
    %c192 = arith.constant 192 : index
    %9 = vector.load %arg5[%c0_7, %c0_8, %c192] : memref<1x32x256xf32, #tpu.memory_space<vmem>>, vector<1x32x64xf32>
    %10 = vector.shape_cast %9 : vector<1x32x64xf32> to vector<32x64xf32>
    %c0_9 = arith.constant 0 : index
    %c0_10 = arith.constant 0 : index
    %c0_11 = arith.constant 0 : index
    %11 = vector.load %arg6[%c0_9, %c0_10, %c0_11] : memref<1x64x32xf32, #tpu.memory_space<vmem>>, vector<1x64x32xf32>
    %12 = vector.shape_cast %11 : vector<1x64x32xf32> to vector<64x32xf32>
    %c0_12 = arith.constant 0 : index
    %c0_13 = arith.constant 0 : index
    %c0_14 = arith.constant 0 : index
    %13 = vector.load %arg7[%c0_12, %c0_13, %c0_14] : memref<1x1x480xf32, #tpu.memory_space<vmem>>, vector<1x1x96xf32>
    %14 = vector.shape_cast %13 : vector<1x1x96xf32> to vector<1x96xf32>
    %c0_15 = arith.constant 0 : index
    %c0_16 = arith.constant 0 : index
    %c96_17 = arith.constant 96 : index
    %15 = vector.load %arg7[%c0_15, %c0_16, %c96_17] : memref<1x1x480xf32, #tpu.memory_space<vmem>>, vector<1x1x32xf32>
    %16 = vector.shape_cast %15 : vector<1x1x32xf32> to vector<1x32xf32>
    %c0_18 = arith.constant 0 : index
    %c0_19 = arith.constant 0 : index
    %c128_20 = arith.constant 128 : index
    %17 = vector.load %arg7[%c0_18, %c0_19, %c128_20] : memref<1x1x480xf32, #tpu.memory_space<vmem>>, vector<1x1x32xf32>
    %18 = vector.shape_cast %17 : vector<1x1x32xf32> to vector<1x32xf32>
    %c0_21 = arith.constant 0 : index
    %c0_22 = arith.constant 0 : index
    %c160 = arith.constant 160 : index
    %19 = vector.load %arg7[%c0_21, %c0_22, %c160] : memref<1x1x480xf32, #tpu.memory_space<vmem>>, vector<1x1x32xf32>
    %20 = vector.shape_cast %19 : vector<1x1x32xf32> to vector<1x32xf32>
    %c0_23 = arith.constant 0 : index
    %c0_24 = arith.constant 0 : index
    %c192_25 = arith.constant 192 : index
    %21 = vector.load %arg7[%c0_23, %c0_24, %c192_25] : memref<1x1x480xf32, #tpu.memory_space<vmem>>, vector<1x1x64xf32>
    %22 = vector.shape_cast %21 : vector<1x1x64xf32> to vector<1x64xf32>
    %c0_26 = arith.constant 0 : index
    %c0_27 = arith.constant 0 : index
    %c256 = arith.constant 256 : index
    %23 = vector.load %arg7[%c0_26, %c0_27, %c256] : memref<1x1x480xf32, #tpu.memory_space<vmem>>, vector<1x1x32xf32>
    %24 = vector.shape_cast %23 : vector<1x1x32xf32> to vector<1x32xf32>
    %c0_28 = arith.constant 0 : index
    %c0_29 = arith.constant 0 : index
    %c288 = arith.constant 288 : index
    %25 = vector.load %arg7[%c0_28, %c0_29, %c288] : memref<1x1x480xf32, #tpu.memory_space<vmem>>, vector<1x1x32xf32>
    %26 = vector.shape_cast %25 : vector<1x1x32xf32> to vector<1x32xf32>
    %c0_30 = arith.constant 0 : index
    %c0_31 = arith.constant 0 : index
    %c320 = arith.constant 320 : index
    %27 = vector.load %arg7[%c0_30, %c0_31, %c320] : memref<1x1x480xf32, #tpu.memory_space<vmem>>, vector<1x1x64xf32>
    %28 = vector.shape_cast %27 : vector<1x1x64xf32> to vector<1x64xf32>
    %c0_32 = arith.constant 0 : index
    %c0_33 = arith.constant 0 : index
    %c384 = arith.constant 384 : index
    %29 = vector.load %arg7[%c0_32, %c0_33, %c384] : memref<1x1x480xf32, #tpu.memory_space<vmem>>, vector<1x1x32xf32>
    %30 = vector.shape_cast %29 : vector<1x1x32xf32> to vector<1x32xf32>
    %c0_34 = arith.constant 0 : index
    %c0_35 = arith.constant 0 : index
    %c416 = arith.constant 416 : index
    %31 = vector.load %arg7[%c0_34, %c0_35, %c416] : memref<1x1x480xf32, #tpu.memory_space<vmem>>, vector<1x1x32xf32>
    %32 = vector.shape_cast %31 : vector<1x1x32xf32> to vector<1x32xf32>
    %c0_36 = arith.constant 0 : index
    %c0_37 = arith.constant 0 : index
    %c448 = arith.constant 448 : index
    %33 = vector.load %arg7[%c0_36, %c0_37, %c448] : memref<1x1x480xf32, #tpu.memory_space<vmem>>, vector<1x1x32xf32>
    %34 = vector.shape_cast %33 : vector<1x1x32xf32> to vector<1x32xf32>
    %35 = tpu.iota {dimensions = array<i32: 0>} : vector<8x8xi32>
    %36 = tpu.iota {dimensions = array<i32: 1>} : vector<8x8xi32>
    %37 = arith.cmpi sle, %36, %35 : vector<8x8xi32>
    %38 = arith.extui %37 : vector<8x8xi1> to vector<8x8xi32>
    %39 = arith.sitofp %38 : vector<8x8xi32> to vector<8x8xf32>
    %c0_38 = arith.constant 0 : index
    %c0_39 = arith.constant 0 : index
    %c0_40 = arith.constant 0 : index
    %40 = vector.load %arg3[%c0_38, %c0_39, %c0_40] : memref<2x1x8xf32, #tpu.memory_space<vmem>>, vector<2x1x8xf32>
    %41 = vector.shape_cast %40 : vector<2x1x8xf32> to vector<2x1x8xf32>
    %42 = vector.broadcast %41 : vector<2x1x8xf32> to vector<2x4x8xf32>
    %43 = vector.shape_cast %42 : vector<2x4x8xf32> to vector<8x8xf32>
    %44 = vector.shape_cast %43 : vector<8x8xf32> to vector<8x1x8xf32>
    %45 = vector.shape_cast %39 : vector<8x8xf32> to vector<1x8x8xf32>
    %46 = vector.broadcast %44 : vector<8x1x8xf32> to vector<8x8x8xf32>
    %47 = vector.broadcast %45 : vector<1x8x8xf32> to vector<8x8x8xf32>
    %48 = arith.mulf %46, %47 : vector<8x8x8xf32>
    %cst = arith.constant 1.000000e+00 : f32
    %49 = vector.broadcast %cst : f32 to vector<8x8x8xf32>
    %50 = arith.subf %48, %49 : vector<8x8x8xf32>
    %cst_41 = arith.constant 1.000000e+04 : f32
    %51 = vector.broadcast %cst_41 : f32 to vector<8x8x8xf32>
    %52 = arith.mulf %50, %51 : vector<8x8x8xf32>
    %c0_42 = arith.constant 0 : index
    %c0_43 = arith.constant 0 : index
    %c0_44 = arith.constant 0 : index
    %53 = vector.load %arg10[%c0_42, %c0_43, %c0_44] : memref<2x8x32xf32, #tpu.memory_space<vmem>>, vector<2x8x32xf32>
    %54 = vector.shape_cast %53 : vector<2x8x32xf32> to vector<16x32xf32>
    %cst_45 = arith.constant dense<0.000000e+00> : vector<16x96xf32>
    %55 = tpu.matmul %54, %4, %cst_45 {dimension_numbers = #tpu.dot_dimension_numbers<[1], [0], [0], [1], [0, 0, 1, 1], [], []>} : vector<16x32xf32>, vector<32x96xf32>, vector<16x96xf32> -> vector<16x96xf32>
    %56 = vector.broadcast %14 : vector<1x96xf32> to vector<16x96xf32>
    %57 = arith.addf %55, %56 : vector<16x96xf32>
    %58 = vector.extract_strided_slice %57 {offsets = [0, 0], sizes = [16, 32], strides = [1, 1]} : vector<16x96xf32> to vector<16x32xf32>
    %59 = vector.shape_cast %58 : vector<16x32xf32> to vector<2x8x32xf32>
    %60 = vector.extract_strided_slice %57 {offsets = [0, 32], sizes = [16, 32], strides = [1, 1]} : vector<16x96xf32> to vector<16x32xf32>
    %61 = vector.shape_cast %60 : vector<16x32xf32> to vector<2x8x32xf32>
    %62 = vector.extract_strided_slice %57 {offsets = [0, 64], sizes = [16, 32], strides = [1, 1]} : vector<16x96xf32> to vector<16x32xf32>
    %63 = vector.shape_cast %62 : vector<16x32xf32> to vector<2x8x32xf32>
    %64 = vector.shape_cast %59 : vector<2x8x32xf32> to vector<2x8x4x8xf32>
    %65 = tpu.transpose %64, [0, 2, 1, 3] : vector<2x8x4x8xf32> -> vector<2x4x8x8xf32>
    %66 = vector.shape_cast %65 : vector<2x4x8x8xf32> to vector<8x8x8xf32>
    %67 = vector.shape_cast %61 : vector<2x8x32xf32> to vector<2x8x4x8xf32>
    %68 = tpu.transpose %67, [0, 2, 1, 3] : vector<2x8x4x8xf32> -> vector<2x4x8x8xf32>
    %69 = vector.shape_cast %68 : vector<2x4x8x8xf32> to vector<8x8x8xf32>
    %70 = vector.shape_cast %63 : vector<2x8x32xf32> to vector<2x8x4x8xf32>
    %71 = tpu.transpose %70, [0, 2, 1, 3] : vector<2x8x4x8xf32> -> vector<2x4x8x8xf32>
    %72 = vector.shape_cast %71 : vector<2x4x8x8xf32> to vector<8x8x8xf32>
    %cst_46 = arith.constant dense<0.000000e+00> : vector<8x8x8xf32>
    %73 = tpu.matmul %66, %69, %cst_46 {dimension_numbers = #tpu.dot_dimension_numbers<[2], [2], [1], [1], [0, 0, 0, 1, 1, 1], [0], [0]>} : vector<8x8x8xf32>, vector<8x8x8xf32>, vector<8x8x8xf32> -> vector<8x8x8xf32>
    %cst_47 = arith.constant 0.353553385 : f32
    %74 = vector.broadcast %cst_47 : f32 to vector<8x8x8xf32>
    %75 = arith.mulf %73, %74 : vector<8x8x8xf32>
    %76 = arith.addf %75, %52 : vector<8x8x8xf32>
    %cst_48 = arith.constant dense<0xFF800000> : vector<8x8xf32>
    %77 = vector.multi_reduction <maximumf>, %76, %cst_48 [2] : vector<8x8x8xf32> to vector<8x8xf32>
    %78 = vector.shape_cast %77 : vector<8x8xf32> to vector<8x8x1xf32>
    %79 = vector.broadcast %78 : vector<8x8x1xf32> to vector<8x8x8xf32>
    %80 = arith.subf %76, %79 : vector<8x8x8xf32>
    %81 = math.exp %80 : vector<8x8x8xf32>
    %cst_49 = arith.constant dense<0.000000e+00> : vector<8x8xf32>
    %82 = vector.multi_reduction <add>, %81, %cst_49 [2] : vector<8x8x8xf32> to vector<8x8xf32>
    %83 = vector.shape_cast %82 : vector<8x8xf32> to vector<8x8x1xf32>
    %84 = vector.broadcast %83 : vector<8x8x1xf32> to vector<8x8x8xf32>
    %85 = arith.divf %81, %84 : vector<8x8x8xf32>
    %cst_50 = arith.constant dense<0.000000e+00> : vector<8x8x8xf32>
    %86 = tpu.matmul %85, %72, %cst_50 {dimension_numbers = #tpu.dot_dimension_numbers<[2], [1], [1], [2], [0, 0, 0, 1, 1, 2], [0], [0]>} : vector<8x8x8xf32>, vector<8x8x8xf32>, vector<8x8x8xf32> -> vector<8x8x8xf32>
    %87 = vector.shape_cast %86 : vector<8x8x8xf32> to vector<2x4x8x8xf32>
    %88 = tpu.transpose %87, [0, 2, 1, 3] : vector<2x4x8x8xf32> -> vector<2x8x4x8xf32>
    %89 = vector.shape_cast %88 : vector<2x8x4x8xf32> to vector<2x8x32xf32>
    %90 = arith.addf %89, %53 : vector<2x8x32xf32>
    %cst_51 = arith.constant dense<0.000000e+00> : vector<2x8xf32>
    %91 = vector.multi_reduction <add>, %90, %cst_51 [2] : vector<2x8x32xf32> to vector<2x8xf32>
    %92 = vector.shape_cast %91 : vector<2x8xf32> to vector<2x8x1xf32>
    %cst_52 = arith.constant 3.200000e+01 : f32
    %93 = vector.broadcast %cst_52 : f32 to vector<2x8x1xf32>
    %94 = arith.divf %92, %93 : vector<2x8x1xf32>
    %95 = vector.broadcast %94 : vector<2x8x1xf32> to vector<2x8x32xf32>
    %96 = arith.subf %90, %95 : vector<2x8x32xf32>
    %97 = arith.mulf %96, %96 : vector<2x8x32xf32>
    %cst_53 = arith.constant dense<0.000000e+00> : vector<2x8xf32>
    %98 = vector.multi_reduction <add>, %97, %cst_53 [2] : vector<2x8x32xf32> to vector<2x8xf32>
    %99 = vector.shape_cast %98 : vector<2x8xf32> to vector<2x8x1xf32>
    %cst_54 = arith.constant 3.200000e+01 : f32
    %100 = vector.broadcast %cst_54 : f32 to vector<2x8x1xf32>
    %101 = arith.divf %99, %100 : vector<2x8x1xf32>
    %cst_55 = arith.constant 9.99999997E-7 : f32
    %102 = vector.broadcast %cst_55 : f32 to vector<2x8x1xf32>
    %103 = arith.addf %101, %102 : vector<2x8x1xf32>
    %104 = math.rsqrt %103 : vector<2x8x1xf32>
    %105 = vector.broadcast %104 : vector<2x8x1xf32> to vector<2x8x32xf32>
    %106 = arith.mulf %96, %105 : vector<2x8x32xf32>
    %107 = vector.shape_cast %16 : vector<1x32xf32> to vector<1x1x32xf32>
    %108 = vector.broadcast %107 : vector<1x1x32xf32> to vector<2x8x32xf32>
    %109 = arith.mulf %106, %108 : vector<2x8x32xf32>
    %110 = vector.shape_cast %18 : vector<1x32xf32> to vector<1x1x32xf32>
    %111 = vector.broadcast %110 : vector<1x1x32xf32> to vector<2x8x32xf32>
    %112 = arith.addf %109, %111 : vector<2x8x32xf32>
    %113 = vector.shape_cast %112 : vector<2x8x32xf32> to vector<16x32xf32>
    %cst_56 = arith.constant dense<0.000000e+00> : vector<16x32xf32>
    %114 = tpu.matmul %113, %6, %cst_56 {dimension_numbers = #tpu.dot_dimension_numbers<[1], [0], [0], [1], [0, 0, 1, 1], [], []>} : vector<16x32xf32>, vector<32x32xf32>, vector<16x32xf32> -> vector<16x32xf32>
    %115 = vector.broadcast %20 : vector<1x32xf32> to vector<16x32xf32>
    %116 = arith.addf %114, %115 : vector<16x32xf32>
    %117 = vector.shape_cast %116 : vector<16x32xf32> to vector<2x8x32xf32>
    %c0_57 = arith.constant 0 : index
    %c0_58 = arith.constant 0 : index
    %c0_59 = arith.constant 0 : index
    %118 = vector.load %arg4[%c0_57, %c0_58, %c0_59] : memref<2x16x32xf32, #tpu.memory_space<vmem>>, vector<2x16x32xf32>
    %119 = vector.shape_cast %118 : vector<2x16x32xf32> to vector<32x32xf32>
    %cst_60 = arith.constant dense<0.000000e+00> : vector<32x64xf32>
    %120 = tpu.matmul %119, %8, %cst_60 {dimension_numbers = #tpu.dot_dimension_numbers<[1], [0], [0], [1], [0, 0, 1, 1], [], []>} : vector<32x32xf32>, vector<32x64xf32>, vector<32x64xf32> -> vector<32x64xf32>
    %121 = vector.broadcast %22 : vector<1x64xf32> to vector<32x64xf32>
    %122 = arith.addf %120, %121 : vector<32x64xf32>
    %123 = vector.extract_strided_slice %122 {offsets = [0, 0], sizes = [32, 32], strides = [1, 1]} : vector<32x64xf32> to vector<32x32xf32>
    %124 = vector.shape_cast %123 : vector<32x32xf32> to vector<2x16x32xf32>
    %125 = vector.extract_strided_slice %122 {offsets = [0, 32], sizes = [32, 32], strides = [1, 1]} : vector<32x64xf32> to vector<32x32xf32>
    %126 = vector.shape_cast %125 : vector<32x32xf32> to vector<2x16x32xf32>
    %127 = vector.shape_cast %117 : vector<2x8x32xf32> to vector<2x8x4x8xf32>
    %128 = tpu.transpose %127, [0, 2, 1, 3] : vector<2x8x4x8xf32> -> vector<2x4x8x8xf32>
    %129 = vector.shape_cast %128 : vector<2x4x8x8xf32> to vector<8x8x8xf32>
    %130 = vector.shape_cast %124 : vector<2x16x32xf32> to vector<2x16x4x8xf32>
    %131 = tpu.transpose %130, [0, 2, 1, 3] : vector<2x16x4x8xf32> -> vector<2x4x16x8xf32>
    %132 = vector.shape_cast %131 : vector<2x4x16x8xf32> to vector<8x16x8xf32>
    %133 = vector.shape_cast %126 : vector<2x16x32xf32> to vector<2x16x4x8xf32>
    %134 = tpu.transpose %133, [0, 2, 1, 3] : vector<2x16x4x8xf32> -> vector<2x4x16x8xf32>
    %135 = vector.shape_cast %134 : vector<2x4x16x8xf32> to vector<8x16x8xf32>
    %cst_61 = arith.constant dense<0.000000e+00> : vector<8x8x16xf32>
    %136 = tpu.matmul %129, %132, %cst_61 {dimension_numbers = #tpu.dot_dimension_numbers<[2], [2], [1], [1], [0, 0, 0, 1, 1, 1], [0], [0]>} : vector<8x8x8xf32>, vector<8x16x8xf32>, vector<8x8x16xf32> -> vector<8x8x16xf32>
    %cst_62 = arith.constant 0.353553385 : f32
    %137 = vector.broadcast %cst_62 : f32 to vector<8x8x16xf32>
    %138 = arith.mulf %136, %137 : vector<8x8x16xf32>
    %cst_63 = arith.constant dense<0xFF800000> : vector<8x8xf32>
    %139 = vector.multi_reduction <maximumf>, %138, %cst_63 [2] : vector<8x8x16xf32> to vector<8x8xf32>
    %140 = vector.shape_cast %139 : vector<8x8xf32> to vector<8x8x1xf32>
    %141 = vector.broadcast %140 : vector<8x8x1xf32> to vector<8x8x16xf32>
    %142 = arith.subf %138, %141 : vector<8x8x16xf32>
    %143 = math.exp %142 : vector<8x8x16xf32>
    %cst_64 = arith.constant dense<0.000000e+00> : vector<8x8xf32>
    %144 = vector.multi_reduction <add>, %143, %cst_64 [2] : vector<8x8x16xf32> to vector<8x8xf32>
    %145 = vector.shape_cast %144 : vector<8x8xf32> to vector<8x8x1xf32>
    %146 = vector.broadcast %145 : vector<8x8x1xf32> to vector<8x8x16xf32>
    %147 = arith.divf %143, %146 : vector<8x8x16xf32>
    %cst_65 = arith.constant dense<0.000000e+00> : vector<8x8x8xf32>
    %148 = tpu.matmul %147, %135, %cst_65 {dimension_numbers = #tpu.dot_dimension_numbers<[2], [1], [1], [2], [0, 0, 0, 1, 1, 2], [0], [0]>} : vector<8x8x16xf32>, vector<8x16x8xf32>, vector<8x8x8xf32> -> vector<8x8x8xf32>
    %149 = vector.shape_cast %148 : vector<8x8x8xf32> to vector<2x4x8x8xf32>
    %150 = tpu.transpose %149, [0, 2, 1, 3] : vector<2x4x8x8xf32> -> vector<2x8x4x8xf32>
    %151 = vector.shape_cast %150 : vector<2x8x4x8xf32> to vector<2x8x32xf32>
    %152 = arith.addf %112, %151 : vector<2x8x32xf32>
    %cst_66 = arith.constant dense<0.000000e+00> : vector<2x8xf32>
    %153 = vector.multi_reduction <add>, %152, %cst_66 [2] : vector<2x8x32xf32> to vector<2x8xf32>
    %154 = vector.shape_cast %153 : vector<2x8xf32> to vector<2x8x1xf32>
    %cst_67 = arith.constant 3.200000e+01 : f32
    %155 = vector.broadcast %cst_67 : f32 to vector<2x8x1xf32>
    %156 = arith.divf %154, %155 : vector<2x8x1xf32>
    %157 = vector.broadcast %156 : vector<2x8x1xf32> to vector<2x8x32xf32>
    %158 = arith.subf %152, %157 : vector<2x8x32xf32>
    %159 = arith.mulf %158, %158 : vector<2x8x32xf32>
    %cst_68 = arith.constant dense<0.000000e+00> : vector<2x8xf32>
    %160 = vector.multi_reduction <add>, %159, %cst_68 [2] : vector<2x8x32xf32> to vector<2x8xf32>
    %161 = vector.shape_cast %160 : vector<2x8xf32> to vector<2x8x1xf32>
    %cst_69 = arith.constant 3.200000e+01 : f32
    %162 = vector.broadcast %cst_69 : f32 to vector<2x8x1xf32>
    %163 = arith.divf %161, %162 : vector<2x8x1xf32>
    %cst_70 = arith.constant 9.99999997E-7 : f32
    %164 = vector.broadcast %cst_70 : f32 to vector<2x8x1xf32>
    %165 = arith.addf %163, %164 : vector<2x8x1xf32>
    %166 = math.rsqrt %165 : vector<2x8x1xf32>
    %167 = vector.broadcast %166 : vector<2x8x1xf32> to vector<2x8x32xf32>
    %168 = arith.mulf %158, %167 : vector<2x8x32xf32>
    %169 = vector.shape_cast %24 : vector<1x32xf32> to vector<1x1x32xf32>
    %170 = vector.broadcast %169 : vector<1x1x32xf32> to vector<2x8x32xf32>
    %171 = arith.mulf %168, %170 : vector<2x8x32xf32>
    %172 = vector.shape_cast %26 : vector<1x32xf32> to vector<1x1x32xf32>
    %173 = vector.broadcast %172 : vector<1x1x32xf32> to vector<2x8x32xf32>
    %174 = arith.addf %171, %173 : vector<2x8x32xf32>
    %175 = vector.shape_cast %174 : vector<2x8x32xf32> to vector<16x32xf32>
    %cst_71 = arith.constant dense<0.000000e+00> : vector<16x64xf32>
    %176 = tpu.matmul %175, %10, %cst_71 {dimension_numbers = #tpu.dot_dimension_numbers<[1], [0], [0], [1], [0, 0, 1, 1], [], []>} : vector<16x32xf32>, vector<32x64xf32>, vector<16x64xf32> -> vector<16x64xf32>
    %177 = vector.broadcast %28 : vector<1x64xf32> to vector<16x64xf32>
    %178 = arith.addf %176, %177 : vector<16x64xf32>
    %cst_72 = arith.constant 5.000000e-01 : f32
    %179 = vector.broadcast %cst_72 : f32 to vector<16x64xf32>
    %180 = arith.mulf %178, %179 : vector<16x64xf32>
    %cst_73 = arith.constant 0.707106769 : f32
    %181 = vector.broadcast %cst_73 : f32 to vector<16x64xf32>
    %182 = arith.mulf %178, %181 : vector<16x64xf32>
    %cst_74 = arith.constant 0.000000e+00 : f32
    %183 = vector.broadcast %cst_74 : f32 to vector<16x64xf32>
    %184 = arith.cmpf oge, %182, %183 : vector<16x64xf32>
    %cst_75 = arith.constant 1.000000e+00 : f32
    %cst_76 = arith.constant -1.000000e+00 : f32
    %185 = vector.broadcast %cst_75 : f32 to vector<16x64xf32>
    %186 = vector.broadcast %cst_76 : f32 to vector<16x64xf32>
    %187 = arith.select %184, %185, %186 : vector<16x64xi1>, vector<16x64xf32>
    %188 = math.absf %182 : vector<16x64xf32>
    %cst_77 = arith.constant 0.327591091 : f32
    %189 = vector.broadcast %cst_77 : f32 to vector<16x64xf32>
    %190 = arith.mulf %189, %188 : vector<16x64xf32>
    %cst_78 = arith.constant 1.000000e+00 : f32
    %191 = vector.broadcast %cst_78 : f32 to vector<16x64xf32>
    %192 = arith.addf %191, %190 : vector<16x64xf32>
    %cst_79 = arith.constant 1.000000e+00 : f32
    %193 = vector.broadcast %cst_79 : f32 to vector<16x64xf32>
    %194 = arith.divf %193, %192 : vector<16x64xf32>
    %cst_80 = arith.constant 1.06140542 : f32
    %195 = vector.broadcast %cst_80 : f32 to vector<16x64xf32>
    %196 = arith.mulf %195, %194 : vector<16x64xf32>
    %cst_81 = arith.constant -1.45315206 : f32
    %197 = vector.broadcast %cst_81 : f32 to vector<16x64xf32>
    %198 = arith.addf %196, %197 : vector<16x64xf32>
    %199 = arith.mulf %198, %194 : vector<16x64xf32>
    %cst_82 = arith.constant 1.42141378 : f32
    %200 = vector.broadcast %cst_82 : f32 to vector<16x64xf32>
    %201 = arith.addf %199, %200 : vector<16x64xf32>
    %202 = arith.mulf %201, %194 : vector<16x64xf32>
    %cst_83 = arith.constant -0.284496725 : f32
    %203 = vector.broadcast %cst_83 : f32 to vector<16x64xf32>
    %204 = arith.addf %202, %203 : vector<16x64xf32>
    %205 = arith.mulf %204, %194 : vector<16x64xf32>
    %cst_84 = arith.constant 0.254829586 : f32
    %206 = vector.broadcast %cst_84 : f32 to vector<16x64xf32>
    %207 = arith.addf %205, %206 : vector<16x64xf32>
    %208 = arith.mulf %207, %194 : vector<16x64xf32>
    %cst_85 = arith.constant 0.000000e+00 : f32
    %209 = vector.broadcast %cst_85 : f32 to vector<16x64xf32>
    %210 = arith.subf %209, %188 : vector<16x64xf32>
    %211 = arith.mulf %210, %188 : vector<16x64xf32>
    %212 = math.exp %211 : vector<16x64xf32>
    %213 = arith.mulf %208, %212 : vector<16x64xf32>
    %cst_86 = arith.constant 1.000000e+00 : f32
    %214 = vector.broadcast %cst_86 : f32 to vector<16x64xf32>
    %215 = arith.subf %214, %213 : vector<16x64xf32>
    %216 = arith.mulf %187, %215 : vector<16x64xf32>
    %cst_87 = arith.constant 1.000000e+00 : f32
    %217 = vector.broadcast %cst_87 : f32 to vector<16x64xf32>
    %218 = arith.addf %217, %216 : vector<16x64xf32>
    %219 = arith.mulf %180, %218 : vector<16x64xf32>
    %cst_88 = arith.constant dense<0.000000e+00> : vector<16x32xf32>
    %220 = tpu.matmul %219, %12, %cst_88 {dimension_numbers = #tpu.dot_dimension_numbers<[1], [0], [0], [1], [0, 0, 1, 1], [], []>} : vector<16x64xf32>, vector<64x32xf32>, vector<16x32xf32> -> vector<16x32xf32>
    %221 = vector.broadcast %30 : vector<1x32xf32> to vector<16x32xf32>
    %222 = arith.addf %220, %221 : vector<16x32xf32>
    %223 = vector.shape_cast %222 : vector<16x32xf32> to vector<2x8x32xf32>
    %224 = arith.addf %174, %223 : vector<2x8x32xf32>
    %cst_89 = arith.constant dense<0.000000e+00> : vector<2x8xf32>
    %225 = vector.multi_reduction <add>, %224, %cst_89 [2] : vector<2x8x32xf32> to vector<2x8xf32>
    %226 = vector.shape_cast %225 : vector<2x8xf32> to vector<2x8x1xf32>
    %cst_90 = arith.constant 3.200000e+01 : f32
    %227 = vector.broadcast %cst_90 : f32 to vector<2x8x1xf32>
    %228 = arith.divf %226, %227 : vector<2x8x1xf32>
    %229 = vector.broadcast %228 : vector<2x8x1xf32> to vector<2x8x32xf32>
    %230 = arith.subf %224, %229 : vector<2x8x32xf32>
    %231 = arith.mulf %230, %230 : vector<2x8x32xf32>
    %cst_91 = arith.constant dense<0.000000e+00> : vector<2x8xf32>
    %232 = vector.multi_reduction <add>, %231, %cst_91 [2] : vector<2x8x32xf32> to vector<2x8xf32>
    %233 = vector.shape_cast %232 : vector<2x8xf32> to vector<2x8x1xf32>
    %cst_92 = arith.constant 3.200000e+01 : f32
    %234 = vector.broadcast %cst_92 : f32 to vector<2x8x1xf32>
    %235 = arith.divf %233, %234 : vector<2x8x1xf32>
    %cst_93 = arith.constant 9.99999997E-7 : f32
    %236 = vector.broadcast %cst_93 : f32 to vector<2x8x1xf32>
    %237 = arith.addf %235, %236 : vector<2x8x1xf32>
    %238 = math.rsqrt %237 : vector<2x8x1xf32>
    %239 = vector.broadcast %238 : vector<2x8x1xf32> to vector<2x8x32xf32>
    %240 = arith.mulf %230, %239 : vector<2x8x32xf32>
    %241 = vector.shape_cast %32 : vector<1x32xf32> to vector<1x1x32xf32>
    %242 = vector.broadcast %241 : vector<1x1x32xf32> to vector<2x8x32xf32>
    %243 = arith.mulf %240, %242 : vector<2x8x32xf32>
    %244 = vector.shape_cast %34 : vector<1x32xf32> to vector<1x1x32xf32>
    %245 = vector.broadcast %244 : vector<1x1x32xf32> to vector<2x8x32xf32>
    %246 = arith.addf %243, %245 : vector<2x8x32xf32>
    %c0_94 = arith.constant 0 : index
    %c0_95 = arith.constant 0 : index
    %c0_96 = arith.constant 0 : index
    %247 = vector.load %arg10[%c0_94, %c0_95, %c0_96] : memref<2x8x32xf32, #tpu.memory_space<vmem>>, vector<2x8x32xf32>
    tpu.vector_store %arg10[%c0_94, %c0_95, %c0_96], %246 {strides = array<i32>} : memref<2x8x32xf32, #tpu.memory_space<vmem>>, vector<2x8x32xf32>,
    %c1_i32 = arith.constant 1 : i32
    %248 = arith.cmpi eq, %arg1, %c1_i32 : i32
    %249 = arith.extui %248 : i1 to i32
    %c0_i32_97 = arith.constant 0 : i32
    %250 = arith.cmpi ne, %249, %c0_i32_97 : i32
    scf.if %250 {
      %251 = vector.shape_cast %246 : vector<2x8x32xf32> to vector<2x256xf32>
      %c0_98 = arith.constant 0 : index
      %c0_99 = arith.constant 0 : index
      %252 = vector.load %arg8[%c0_98, %c0_99] : memref<2x256xf32, #tpu.memory_space<vmem>>, vector<2x256xf32>
      tpu.vector_store %arg8[%c0_98, %c0_99], %251 {strides = array<i32>} : memref<2x256xf32, #tpu.memory_space<vmem>>, vector<2x256xf32>,
      %253 = vector.shape_cast %138 : vector<8x8x16xf32> to vector<8x128xf32>
      %c0_100 = arith.constant 0 : index
      %c0_101 = arith.constant 0 : index
      %254 = vector.load %arg9[%c0_100, %c0_101] : memref<8x128xf32, #tpu.memory_space<vmem>>, vector<8x128xf32>
      tpu.vector_store %arg9[%c0_100, %c0_101], %253 {strides = array<i32>} : memref<8x128xf32, #tpu.memory_space<vmem>>, vector<8x128xf32>,
    } else {
    }
    return
  }
  func.func @transform_0(%arg0: i32, %arg1: i32) -> (i32, i32, i32) {
    %c0_i32 = arith.constant 0 : i32
    %c0_i32_0 = arith.constant 0 : i32
    %c0_i32_1 = arith.constant 0 : i32
    return %arg0, %c0_i32, %c0_i32_0 : i32, i32, i32
  }
  func.func @transform_1(%arg0: i32, %arg1: i32) -> (i32, i32, i32) {
    %c0_i32 = arith.constant 0 : i32
    %c0_i32_0 = arith.constant 0 : i32
    %c0_i32_1 = arith.constant 0 : i32
    return %arg0, %c0_i32, %c0_i32_0 : i32, i32, i32
  }
  func.func @transform_2(%arg0: i32, %arg1: i32) -> (i32, i32, i32) {
    %c0_i32 = arith.constant 0 : i32
    %c0_i32_0 = arith.constant 0 : i32
    %c0_i32_1 = arith.constant 0 : i32
    return %arg0, %c0_i32, %c0_i32_0 : i32, i32, i32
  }
  func.func @transform_3(%arg0: i32, %arg1: i32) -> (i32, i32, i32) {
    %c0_i32 = arith.constant 0 : i32
    %c0_i32_0 = arith.constant 0 : i32
    %c0_i32_1 = arith.constant 0 : i32
    return %arg1, %c0_i32, %c0_i32_0 : i32, i32, i32
  }
  func.func @transform_4(%arg0: i32, %arg1: i32) -> (i32, i32, i32) {
    %c0_i32 = arith.constant 0 : i32
    %c0_i32_0 = arith.constant 0 : i32
    %c0_i32_1 = arith.constant 0 : i32
    return %arg1, %c0_i32, %c0_i32_0 : i32, i32, i32
  }
  func.func @transform_5(%arg0: i32, %arg1: i32) -> (i32, i32, i32) {
    %c0_i32 = arith.constant 0 : i32
    %c0_i32_0 = arith.constant 0 : i32
    %c0_i32_1 = arith.constant 0 : i32
    return %arg1, %c0_i32, %c0_i32_0 : i32, i32, i32
  }
  func.func @transform_6(%arg0: i32, %arg1: i32) -> (i32, i32) {
    %c0_i32 = arith.constant 0 : i32
    %c0_i32_0 = arith.constant 0 : i32
    return %arg0, %c0_i32 : i32, i32
  }
  func.func @transform_7(%arg0: i32, %arg1: i32) -> (i32, i32) {
    %c0_i32 = arith.constant 0 : i32
    %c0_i32_0 = arith.constant 0 : i32
    return %arg0, %c0_i32 : i32, i32
  }
}

</mosaic_0001>

<bundles_post_ra>
// kernel: tpu_custom_call.1
= control target key start
LH: loop header
LB: loop body
LE: loop exit
PB: predicated region body
PF: predicated region fallthrough
CT: control target
= control target key end

     0   :  { %13 = vsyncpa [#allocation4], 0  ;;  %s9418_s0 = inlined_call_operand.vmem [shape: f32[2,8,32], index: 0, kind: input, shape index: {}]   ;;  %s9419_s1 = inlined_call_operand.vmem [shape: f32[2,1,8], index: 1, kind: input, shape index: {}]   ;;  %s9420_s2 = inlined_call_operand.vmem [shape: f32[2,16,32], index: 2, kind: input, shape index: {}]   ;;  %s9421_s3 = inlined_call_operand.vmem [shape: f32[2,32,256], index: 3, kind: input, shape index: {}]   ;;  %s9422_s4 = inlined_call_operand.vmem [shape: f32[2,64,32], index: 4, kind: input, shape index: {}]   ;;  %s9423_s5 = inlined_call_operand.vmem [shape: f32[2,1,480], index: 5, kind: input, shape index: {}]   ;;  %s9424_s6 = inlined_call_operand.hbm [shape: f32[2,256], index: 6, kind: output, shape index: {0}]   ;;  %s9425_s7 = inlined_call_operand.hbm [shape: f32[8,128], index: 7, kind: output, shape index: {1}]  }
   0x1   :  { %14 = vsyncpa [#allocation6], 0  ;;  %s8160_s24 = smov 0   ;;  %s8162_s25 = smov 0  }
   0x2   :  { %s8164_s26 = smov 0  }
   0x3 LB: > { %s7215_s27 = sadd.s32 4294967295, %s8092_s26   ;;  %s29_s28 = sadd.s32 1, %s8088_s25  ;;  %s8092_s26 = sphi %s8164_s26, %s20_s26   ;;  %s8088_s25 = sphi %s8162_s25, %s9430_s25   ;;  %s8084_s24 = sphi %s8160_s24, %s9429_s24  }
   0x4   : > { %p30_p0 = scmp.ge.s32.totalorder %s29_s28, 2  ;;  %p7221_p1 = scmp.ge.s32.totalorder %s8092_s26, 1 }
   0x5   : > { %p306_p2 = scmp.lt.s32.totalorder %s8092_s26, 3 }
   0x6   : > { %s9432_s28 = smov (%p30_p0, %s29_s28), 0 }
   0x7   : > { %p307_p3 = pnand %p7221_p1, %p306_p2 }
   0x8   : > { %p375_p4 = scmp.lt.s32.totalorder (!%p307_p3), %s8084_s24, 1  ;;  %p7227_p5 = scmp.ne.s32.totalorder (!%p307_p3), %s8084_s24, 0 }
   0x9   : > { %310 = sbr.rel (%p307_p3) target bundleno = 4311 (0x10d7), region = 44 }
  0x10   : > { %s376_s29 = scalar_select %p375_p4, %s8084_s24, 1 }
  0x11   : > { %392 = sbr.rel (%p7227_p5) target bundleno = 24 (0x18), region = 48  ;;  %v393_v0 = vld [vmem:[%s9418_s0] sm:$0xff] (!%p7227_p5)  ;;  %vm395_vm0 = vcmask (!%p7227_p5), 261120   ;;  %v394_v1 = vld [vmem:[%s9418_s0 + $0x8] sm:$0xff] (!%p7227_p5) }
  0x12   : > { %s7359_s30 = sshll.u32 %s376_s29, 6  ;;  %s7226_s8 = sshll.u32 %s376_s29, 2  ;;  %396 = vst.msk [vmem:[#allocation2] sm:$0xff] (!%p7227_p5), %vm395_vm0, %v393_v0  ;;  %397 = vst.msk [vmem:[#allocation2 + $0x8] sm:$0xff] (!%p7227_p5), %vm395_vm0, %v394_v1 }
  0x13   : > { %s8186_s11 = scalar_lea.vmem %s9421_s3, %s7359_s30  ;;  %s8191_s14 = scalar_lea.vmem %s9422_s4, %s7359_s30 }
  0x14   : > { %s8196_s17 = scalar_lea.vmem %s9423_s5, %s7226_s8 }
  0x18 PF: > { %v8206_v2 = vld [vmem:[%s8186_s11] sm:$0xff]  ;;  %v8209_v3 = vld [vmem:[%s8186_s11 + $0x10] sm:$0xff]  ;;  %vm557_vm1 = vcmask 261120   ;;  %s8094_s22 = smov 104   ;;  %s8095_s23 = smov 120   ;;  %v8098_v22 = vmov 0.0   ;;  %v418_v23 = vlaneseq }
  0x19   : > { %v400_v4 = vld [vmem:[%s8186_s11 + $0x20] sm:$0xff]  ;;  %v7901_v5 = vpack.i.bf16 %v8209_v3, %v8206_v2  ;;  %v7735_v6 = vpack.c.bf16 %v8209_v3, %v8206_v2  ;;  %v401_v7 = vld [vmem:[%s8186_s11 + $0x30] sm:$0xff]  ;;  %v550_v10 = vld [vmem:[#allocation2 + $0x8] sm:$0xff]  ;;  %s8096_s29 = smov 112   ;;  %s8097_s30 = smov 96   ;;  %7493 = vmatprep.subr.mxu1 %v8098_v22  ;;  %vm8100_vm2 = vmmov 0  }
  0x1a   : > { %v549_v8 = vld [vmem:[#allocation2] sm:$0xff]  ;;  %v7739_v9 = vpack.c.bf16 %v401_v7, %v400_v4  ;;  %s8099_s8 = smov 64   ;;  %7495 = vmatprep.mubr.msk.f32.mxu1 %vm8100_vm2, %v8098_v22  ;;  %v8101_v24 = vmov 1983009808   ;;  %v8266_v26 = vshrl.u32 %v418_v23, 7  ;;  %vm1523_vm3 = vcmask 64512  }
  0x1b   : > { %7485 = vmatprep.mubr.msk.f32.mxu0 %vm557_vm1, %v549_v8  ;;  %7736 = vmatprep.subr.bf16.mxu0 %v7735_v6  ;;  %v7239_v11 = vld [vmem:[%s8196_s17] ss:$0 sm:$0xff]  ;;  %v662_v25 = vunpack.c.l.s4 %v8101_v24  ;;  %v8102_v28 = vmov 1934713408   ;;  %s8104_s15 = smov 8   ;;  %s8105_s16 = smov 16   ;;  %vm8765_vm7 = vmpackc.low %vm1523_vm3, %vm1523_vm3 }
  0x1c   : > { %7738 = vmatpush3.bf16.msra.mxu0 %v7735_v6  ;;  %v694_v29 = vunpack.c.l.s4 %v8102_v28  ;;  %s8106_s18 = smov 24   ;;  %vm3118_vm5 = vcmask 130048   ;;  %vm3121_vm6 = vcmask 195584   ;;  %s8107_s19 = smov 32   ;;  %v8007_v2 = vld [vmem:[%s8196_s17] ss:$0 sm:$0xff] }
  0x1d   : > { %7740 = vmatprep.subr.bf16.mxu0 %v7739_v9  ;;  %v663_v27 = vunpack.c.0.s8 %v662_v25  ;;  %v3267_v3 = vld [vmem:[%s9420_s2 + $0x8] sm:$0xff]  ;;  %vm6653_vm10 = vcmask 523264   ;;  %p7351_p6 = scmp.ne.s32.totalorder %s8084_s24, 1 }
  0x1e   : > { %v695_v35 = vunpack.c.0.s8 %v694_v29  ;;  %s8111_s24 = smov (!%p7351_p6), 64   ;;  %vm7054_vm11 = vcmask (!%p7351_p6), 392192   ;;  %vm6871_vm12 = vcmask (!%p7351_p6), 785408   ;;  %vm7057_vm13 = vcmask (!%p7351_p6), 654336  }
  0x1f   : > { %v8270_v31 = vsub.s32 %v663_v27, %v8266_v26  ;;  %vm7060_vm14 = vcmask (!%p7351_p6), 916480  }
  0x20   : > { %7742 = vmatpush3.bf16.msra.mxu0 %v7739_v9  ;;  %v8286_v42 = vsub.s32 %v695_v35, %v8266_v26 }
  0x21   : > { %7488 = vmatprep.subr.mxu0 %v8098_v22 }
  0x23   : > { %7486 = vmatmul.mubr.msk.f32.vlgmr.msra.gmra.mrb[0].mxu0 %vm557_vm1, %v550_v10 }
  0x24   : > { %7490 = vmatprep.mubr.msk.f32.mxu0 %vm8100_vm2, %v8098_v22 }
  0xf6   : > { %v7487_v12 = vpop.f32.mrb[0].mxu0 }
  0xf7   : > { %v630_v13 = vpop.f32.mrb[1].mxu0  ;;  %v8222_v15 = vadd.f32 %v7487_v12, %v7239_v11 }
  0xf8   : > { %v631_v14 = vadd.f32 %v7239_v11, %v630_v13 }
  0xfa   : > { %653 = vrot.lane.b32.xlu1 %v631_v14, %s8094_s22  ;;  %641 = vrot.lane.b32.xlu0 %v631_v14, %s8095_s23 }
  0xfe   : > { %643 = vrot.lane.b32.xlu1 %v8222_v15, %s8095_s23  ;;  %647 = vrot.lane.b32.xlu0 %v631_v14, %s8096_s29 }
 0x102   : > { %655 = vrot.lane.b32.xlu1 %v8222_v15, %s8094_s22  ;;  %649 = vrot.lane.b32.xlu0 %v8222_v15, %s8096_s29 }
 0x106   : > { %931 = vrot.lane.b32.xlu0 %v631_v14, %s8097_s30 }
 0x16c   : > { %v8232_v16 = vpop.permute.xlu1 %653  ;;  %v8234_v17 = vpop.permute.xlu0 %641 }
 0x16d   : > { %935 = vrot.lane.b32.xlu1 %v8234_v17, %s8097_s30  ;;  %v675_v32 = vcombine.low %v8234_v17, %v8232_v16  ;;  %v676_v34 = vcombine.high %v8234_v17, %v8232_v16 }
 0x16f   : > { %v683_v37 = vrot.slane %v675_v32, %v8270_v31  ;;  %v690_v41 = vrot.slane %v676_v34, %v8270_v31 }
 0x170   : > { %v8238_v18 = vpop.permute.xlu0 %647  ;;  %v8244_v19 = vpop.permute.xlu1 %643 }
 0x171   : > { %943 = vrot.lane.b32.xlu1 %v8232_v16, %s8097_s30  ;;  %939 = vrot.lane.b32.xlu0 %v8238_v18, %s8097_s30  ;;  %v659_v30 = vcombine.low %v631_v14, %v8238_v18  ;;  %v660_v33 = vcombine.high %v631_v14, %v8238_v18 }
 0x173   : > { %v667_v36 = vrot.slane %v659_v30, %v8270_v31  ;;  %v674_v38 = vrot.slane %v660_v33, %v8270_v31 }
 0x174   : > { %v8250_v20 = vpop.permute.xlu1 %655  ;;  %v8252_v21 = vpop.permute.xlu0 %649 }
 0x175   : > { %937 = vrot.lane.b32.xlu1 %v8244_v19, %s8097_s30  ;;  %933 = vrot.lane.b32.xlu0 %v8222_v15, %s8097_s30  ;;  %v743_v39 = vcombine.low %v8244_v19, %v8250_v20  ;;  %v727_v40 = vcombine.low %v8222_v15, %v8252_v21  ;;  %v691_v43 = vcombine.low %v667_v36, %v683_v37 }
 0x176   : > { %v692_v44 = vcombine.high %v667_v36, %v683_v37  ;;  %v744_v45 = vcombine.high %v8244_v19, %v8250_v20  ;;  %v728_v46 = vcombine.high %v8222_v15, %v8252_v21  ;;  %v707_v47 = vcombine.low %v674_v38, %v690_v41 }
 0x177   : > { %v708_v48 = vcombine.high %v674_v38, %v690_v41  ;;  %v751_v49 = vrot.slane %v743_v39, %v8270_v31  ;;  %v735_v50 = vrot.slane %v727_v40, %v8270_v31  ;;  %v699_v51 = vrot.slane %v691_v43, %v8286_v42 }
 0x178   : > { %v706_v52 = vrot.slane %v692_v44, %v8286_v42  ;;  %v758_v53 = vrot.slane %v744_v45, %v8270_v31  ;;  %v742_v54 = vrot.slane %v728_v46, %v8270_v31  ;;  %v715_v55 = vrot.slane %v707_v47, %v8286_v42  ;;  %v932_v63 = vpop.permute.xlu0 %931 }
 0x179   : > { %945 = vrot.lane.b32.xlu1 %v8250_v20, %s8097_s30  ;;  %941 = vrot.lane.b32.xlu0 %v8252_v21, %s8097_s30  ;;  %v722_v56 = vrot.slane %v708_v48, %v8286_v42  ;;  %v759_v57 = vcombine.low %v735_v50, %v751_v49  ;;  %v760_v58 = vcombine.high %v735_v50, %v751_v49 }
 0x17a   : > { %v795_v59 = vcombine.low %v699_v51, %v706_v52  ;;  %v7242_v60 = vcombine.high %v699_v51, %v706_v52  ;;  %v775_v61 = vcombine.low %v742_v54, %v758_v53  ;;  %v776_v62 = vcombine.high %v742_v54, %v758_v53 }
 0x17b   : > { %v811_v1 = vcombine.low %v715_v55, %v722_v56  ;;  %v7243_v4 = vcombine.high %v715_v55, %v722_v56  ;;  %v767_v6 = vrot.slane %v759_v57, %v8286_v42  ;;  %v774_v7 = vrot.slane %v760_v58, %v8286_v42 }
 0x17c   : > { %v783_v8 = vrot.slane %v775_v61, %v8286_v42  ;;  %v790_v9 = vrot.slane %v776_v62, %v8286_v42  ;;  %v8305_v12 = vrot.slane %v795_v59, %v8270_v31  ;;  %v8308_v13 = vrot.slane %v7242_v60, %v8270_v31 }
 0x17d   : > { %1227 = vrot.lane.b32.xlu1 %v631_v14, %s8099_s8  ;;  %v863_v28 = vcombine.low %v767_v6, %v774_v7  ;;  %v8311_v29 = vrot.slane %v811_v1, %v8270_v31  ;;  %v8314_v30 = vrot.slane %v7243_v4, %v8270_v31  ;;  %v7244_v36 = vcombine.high %v767_v6, %v774_v7 }
 0x17e   : > { %v879_v37 = vcombine.low %v783_v8, %v790_v9  ;;  %v7245_v38 = vcombine.high %v783_v8, %v790_v9  ;;  %v827_v40 = vcombine.low %v8305_v12, %v8308_v13  ;;  %v828_v48 = vcombine.high %v8305_v12, %v8308_v13 }
 0x17f   : > { %v843_v47 = vcombine.low %v8311_v29, %v8314_v30  ;;  %v844_v49 = vcombine.high %v8311_v29, %v8314_v30  ;;  %v8329_v50 = vrot.slane %v863_v28, %v8270_v31  ;;  %v8339_v57 = vrot.slane %v7244_v36, %v8270_v31 }
 0x180   : > { %v8336_v56 = vrot.slane %v827_v40, %v8286_v42  ;;  %v8342_v58 = vrot.slane %v879_v37, %v8270_v31  ;;  %v8345_v59 = vrot.slane %v7245_v38, %v8270_v31  ;;  %v842_v38 = vrot.slane %v828_v48, %v8286_v42 }
 0x181   : > { %v851_v37 = vrot.slane %v843_v47, %v8286_v42 }
 0x183   : > { %v859_v48 = vcombine.low %v8336_v56, %v851_v37 }
 0x1df   : > { %v936_v0 = vpop.permute.xlu1 %935 }
 0x1e3   : > { %v944_v10 = vpop.permute.xlu1 %943  ;;  %v940_v11 = vpop.permute.xlu0 %939 }
 0x1e4   : > { %v971_v14 = vcombine.low %v936_v0, %v944_v10  ;;  %v972_v24 = vcombine.high %v936_v0, %v944_v10  ;;  %v955_v25 = vcombine.low %v932_v63, %v940_v11  ;;  %v956_v27 = vcombine.high %v932_v63, %v940_v11 }
 0x1e6   : > { %v979_v32 = vrot.slane %v971_v14, %v8270_v31  ;;  %v986_v33 = vrot.slane %v972_v24, %v8270_v31  ;;  %v963_v34 = vrot.slane %v955_v25, %v8270_v31  ;;  %v970_v35 = vrot.slane %v956_v27, %v8270_v31 }
 0x1e7   : > { %v938_v39 = vpop.permute.xlu1 %937  ;;  %v934_v46 = vpop.permute.xlu0 %933 }
 0x1e8   : > { %v987_v41 = vcombine.low %v963_v34, %v979_v32  ;;  %v988_v43 = vcombine.high %v963_v34, %v979_v32  ;;  %v1003_v44 = vcombine.low %v970_v35, %v986_v33  ;;  %v1004_v45 = vcombine.high %v970_v35, %v986_v33 }
 0x1ea   : > { %v995_v51 = vrot.slane %v987_v41, %v8286_v42  ;;  %v1002_v52 = vrot.slane %v988_v43, %v8286_v42  ;;  %v1011_v53 = vrot.slane %v1003_v44, %v8286_v42  ;;  %v1018_v54 = vrot.slane %v1004_v45, %v8286_v42 }
 0x1eb   : > { %v946_v55 = vpop.permute.xlu1 %945  ;;  %v942_v0 = vpop.permute.xlu0 %941 }
 0x1ec   : > { %v1091_v60 = vcombine.low %v995_v51, %v1002_v52  ;;  %v7246_v61 = vcombine.high %v995_v51, %v1002_v52  ;;  %v1107_v62 = vcombine.low %v1011_v53, %v1018_v54  ;;  %v7247_v63 = vcombine.high %v1011_v53, %v1018_v54 }
 0x1ed   : > { %v1039_v1 = vcombine.low %v938_v39, %v946_v55  ;;  %v1040_v4 = vcombine.high %v938_v39, %v946_v55  ;;  %v1023_v6 = vcombine.low %v934_v46, %v942_v0  ;;  %v1024_v7 = vcombine.high %v934_v46, %v942_v0 }
 0x1ee   : > { %v1098_v8 = vrot.slane %v1091_v60, %v8270_v31  ;;  %v1106_v9 = vrot.slane %v7246_v61, %v8270_v31  ;;  %v1114_v10 = vrot.slane %v1107_v62, %v8270_v31  ;;  %v1122_v11 = vrot.slane %v7247_v63, %v8270_v31 }
 0x1ef   : > { %v1047_v12 = vrot.slane %v1039_v1, %v8270_v31  ;;  %v1054_v13 = vrot.slane %v1040_v4, %v8270_v31  ;;  %v1031_v14 = vrot.slane %v1023_v6, %v8270_v31  ;;  %v1038_v24 = vrot.slane %v1024_v7, %v8270_v31 }
 0x1f0   : > { %v1123_v25 = vcombine.low %v1098_v8, %v1106_v9  ;;  %v1124_v27 = vcombine.high %v1098_v8, %v1106_v9  ;;  %v1139_v28 = vcombine.low %v1114_v10, %v1122_v11  ;;  %v1140_v29 = vcombine.high %v1114_v10, %v1122_v11 }
 0x1f1   : > { %v1055_v30 = vcombine.low %v1031_v14, %v1047_v12  ;;  %v1056_v32 = vcombine.high %v1031_v14, %v1047_v12  ;;  %v1071_v33 = vcombine.low %v1038_v24, %v1054_v13  ;;  %v1072_v34 = vcombine.high %v1038_v24, %v1054_v13 }
 0x1f2   : > { %v1131_v35 = vrot.slane %v1123_v25, %v8286_v42  ;;  %v1147_v36 = vrot.slane %v1139_v28, %v8286_v42  ;;  %v1138_v46 = vrot.slane %v1124_v27, %v8286_v42  ;;  %v1154_v51 = vrot.slane %v1140_v29, %v8286_v42 }
 0x1f3   : > { %v1063_v39 = vrot.slane %v1055_v30, %v8286_v42  ;;  %v1070_v40 = vrot.slane %v1056_v32, %v8286_v42  ;;  %v1079_v41 = vrot.slane %v1071_v33, %v8286_v42  ;;  %v1086_v43 = vrot.slane %v1072_v34, %v8286_v42 }
 0x1f4   : > { %v1155_v44 = vcombine.low %v1131_v35, %v1147_v36  ;;  %v1156_v45 = vcombine.high %v1131_v35, %v1147_v36  ;;  %v858_v55 = vrot.slane %v844_v49, %v8286_v42  ;;  %v895_v60 = vcombine.low %v8329_v50, %v8339_v57 }
 0x1f5   : > { %v1159_v52 = vcombine.low %v1063_v39, %v1070_v40  ;;  %v7248_v53 = vcombine.high %v1063_v39, %v1070_v40  ;;  %v1175_v54 = vcombine.low %v1079_v41, %v1086_v43  ;;  %v7249_v47 = vcombine.high %v1079_v41, %v1086_v43  ;;  %v7229_v41 = vld [vmem:[%s9419_s1] ss:$0 sm:$0xff] }
 0x1f6   : > { %7489 = vmatpush3.xpose.msk.msra.mxu0 %vm1523_vm3, %v1155_v44  ;;  %7494 = vmatpush3.xpose.msk.msra.mxu1 %vm1523_vm3, %v1156_v45  ;;  %v860_v1 = vcombine.high %v8336_v56, %v851_v37  ;;  %v1157_v4 = vcombine.low %v1138_v46, %v1154_v51  ;;  %v1158_v6 = vcombine.high %v1138_v46, %v1154_v51  ;;  %v8103_v37 = vmov 1966171168   ;;  %v7230_v46 = vld [vmem:[%s9419_s1 + $0x1] ss:$0 sm:$0xff] }
 0x1f7   : > { %v1166_v61 = vrot.slane %v1159_v52, %v8270_v31  ;;  %v1174_v62 = vrot.slane %v7248_v53, %v8270_v31  ;;  %v1182_v63 = vrot.slane %v1175_v54, %v8270_v31  ;;  %v1190_v0 = vrot.slane %v7249_v47, %v8270_v31  ;;  %7498 = vmatprep.subr.mxu0 %v8098_v22 }
 0x1f8   : > { %7503 = vmatprep.subr.mxu1 %v8098_v22  ;;  %v911_v49 = vcombine.low %v8342_v58, %v8345_v59  ;;  %v861_v11 = vcombine.low %v842_v38, %v858_v55  ;;  %v896_v56 = vcombine.high %v8329_v50, %v8339_v57  ;;  %v912_v12 = vcombine.high %v8342_v58, %v8345_v59 }
 0x1f9   : > { %v1191_v7 = vcombine.low %v1166_v61, %v1174_v62  ;;  %v1192_v8 = vcombine.high %v1166_v61, %v1174_v62  ;;  %v1207_v9 = vcombine.low %v1182_v63, %v1190_v0  ;;  %v1208_v10 = vcombine.high %v1182_v63, %v1190_v0  ;;  %7491 = vmatmul.mubr.msk.f32.vlgmr.msra.gmra.mrb[2].mxu0 %vm1523_vm3, %v859_v48 }
 0x1fa   : > { %7496 = vmatmul.mubr.msk.f32.vlgmr.msra.gmra.mrb[0].mxu1 %vm1523_vm3, %v860_v1  ;;  %7499 = vmatpush3.xpose.msk.msra.mxu0 %vm1523_vm3, %v1157_v4  ;;  %v862_v13 = vcombine.high %v842_v38, %v858_v55  ;;  %v903_v50 = vrot.slane %v895_v60, %v8286_v42  ;;  %v919_v57 = vrot.slane %v911_v49, %v8286_v42  ;;  %v438_v38 = vunpack.c.l.s4 %v8103_v37 }
 0x1fb   : > { %7504 = vmatpush3.xpose.msk.msra.mxu1 %vm1523_vm3, %v1158_v6  ;;  %7500 = vmatprep.mubr.msk.f32.mxu0 %vm8100_vm2, %v8098_v22  ;;  %v1199_v14 = vrot.slane %v1191_v7, %v8286_v42  ;;  %v1215_v24 = vrot.slane %v1207_v9, %v8286_v42  ;;  %v1206_v58 = vrot.slane %v1192_v8, %v8286_v42  ;;  %v421_v45 = vand.u32 127, %v418_v23 }
 0x1fc   : > { %7505 = vmatprep.mubr.msk.f32.mxu1 %vm8100_vm2, %v8098_v22  ;;  %7508 = vmatprep.subr.mxu0 %v8098_v22  ;;  %v1222_v27 = vrot.slane %v1208_v10, %v8286_v42  ;;  %v910_v28 = vrot.slane %v896_v56, %v8286_v42  ;;  %v927_v29 = vcombine.low %v903_v50, %v919_v57  ;;  %v439_v39 = vunpack.c.0.s8 %v438_v38 }
 0x1fd   : > { %7501 = vmatmul.mubr.msk.f32.vlgmr.msra.gmra.mrb[4].mxu0 %vm1523_vm3, %v861_v11  ;;  %7513 = vmatprep.subr.mxu1 %v8098_v22  ;;  %v1223_v59 = vcombine.low %v1199_v14, %v1215_v24  ;;  %v1224_v25 = vcombine.high %v1199_v14, %v1215_v24  ;;  %v928_v30 = vcombine.high %v903_v50, %v919_v57  ;;  %v487_v51 = vsub.s32 0, %v8266_v26 }
 0x1fe   : > { %7506 = vmatmul.mubr.msk.f32.vlgmr.msra.gmra.mrb[2].mxu1 %vm1523_vm3, %v862_v13  ;;  %7510 = vmatprep.mubr.msk.f32.mxu0 %vm8100_vm2, %v8098_v22  ;;  %v926_v32 = vrot.slane %v912_v12, %v8286_v42  ;;  %v1225_v33 = vcombine.low %v1206_v58, %v1222_v27  ;;  %v1226_v34 = vcombine.high %v1206_v58, %v1222_v27 }
 0x1ff   : > { %7509 = vmatpush3.xpose.msk.msra.mxu0 %vm1523_vm3, %v1223_v59  ;;  %7514 = vmatpush3.xpose.msk.msra.mxu1 %vm1523_vm3, %v1224_v25  ;;  %v442_v40 = vsub.s32 %v439_v39, %v8266_v26  ;;  %vm422_vm4 = vcmp.le.s32.totalorder %v421_v45, %v8266_v26 }
 0x200   : > { %7515 = vmatprep.mubr.msk.f32.mxu1 %vm8100_vm2, %v8098_v22  ;;  %7518 = vmatprep.subr.mxu0 %v8098_v22  ;;  %v929_v35 = vcombine.low %v910_v28, %v926_v32  ;;  %v930_v36 = vcombine.high %v910_v28, %v926_v32  ;;  %v7228_v55 = vsel %vm422_vm4, 1.0, %v8098_v22 }
 0x201   : > { %7523 = vmatprep.subr.mxu1 %v8098_v22  ;;  %v443_v43 = vrot.slane %v7229_v41, %v442_v40  ;;  %v467_v54 = vrot.slane %v7230_v46, %v442_v40 }
 0x202   : > { %7511 = vmatmul.mubr.msk.f32.vlgmr.msra.gmra.mrb[6].mxu0 %vm1523_vm3, %v927_v29  ;;  %7516 = vmatmul.mubr.msk.f32.vlgmr.msra.gmra.mrb[4].mxu1 %vm1523_vm3, %v928_v30 }
 0x203   : > { %7519 = vmatpush3.xpose.msk.msra.mxu0 %vm1523_vm3, %v1225_v33  ;;  %7524 = vmatpush3.xpose.msk.msra.mxu1 %vm1523_vm3, %v1226_v34  ;;  %v444_v44 = vcombine.high %v443_v43, %v443_v43  ;;  %v451_v52 = vrot.slane %v443_v43, %v442_v40  ;;  %v468_v62 = vcombine.high %v467_v54, %v467_v54 }
 0x204   : > { %7520 = vmatprep.mubr.msk.f32.mxu0 %vm8100_vm2, %v8098_v22  ;;  %7525 = vmatprep.mubr.msk.f32.mxu1 %vm8100_vm2, %v8098_v22  ;;  %v475_v4 = vrot.slane %v467_v54, %v442_v40 }
 0x205   : > { %7528 = vmatprep.subr.mxu0 %v8098_v22  ;;  %7533 = vmatprep.subr.mxu1 %v8098_v22  ;;  %v458_v53 = vrot.slane %v444_v44, %v442_v40  ;;  %v488_v47 = vrot.slane %v451_v52, %v487_v51  ;;  %v459_v48 = vcombine.high %v451_v52, %v451_v52 }
 0x206   : > { %7521 = vmatmul.mubr.msk.f32.vlgmr.msra.gmra.mrb[8].mxu0 %vm1523_vm3, %v929_v35  ;;  %7526 = vmatmul.mubr.msk.f32.vlgmr.msra.gmra.mrb[6].mxu1 %vm1523_vm3, %v930_v36  ;;  %v482_v6 = vrot.slane %v468_v62, %v442_v40  ;;  %v504_v10 = vrot.slane %v475_v4, %v487_v51  ;;  %v483_v26 = vcombine.high %v475_v4, %v475_v4 }
 0x207   : > { %7530 = vmatprep.mubr.msk.f32.mxu0 %vm8100_vm2, %v8098_v22  ;;  %7535 = vmatprep.mubr.msk.f32.mxu1 %vm8100_vm2, %v8098_v22  ;;  %v492_v60 = vrot.slane %v458_v53, %v487_v51  ;;  %v460_v61 = vcombine.high %v458_v53, %v458_v53  ;;  %v525_v63 = vmul.f32 %v7228_v55, %v488_v47 }
 0x208   : > { %v496_v23 = vrot.slane %v459_v48, %v487_v51  ;;  %v508_v11 = vrot.slane %v482_v6, %v487_v51  ;;  %v484_v56 = vcombine.high %v482_v6, %v482_v6  ;;  %v529_v57 = vmul.f32 %v7228_v55, %v504_v10 }
 0x209   : > { %v526_v0 = vmul.f32 %v7228_v55, %v492_v60  ;;  %v500_v1 = vrot.slane %v460_v61, %v487_v51  ;;  %v7231_v49 = vadd.f32 -1.0, %v525_v63  ;;  %v512_v58 = vrot.slane %v483_v26, %v487_v51 }
 0x20a   : > { %v527_v7 = vmul.f32 %v7228_v55, %v496_v23  ;;  %v530_v28 = vmul.f32 %v7228_v55, %v508_v11  ;;  %v516_v29 = vrot.slane %v484_v56, %v487_v51  ;;  %v7235_v38 = vadd.f32 -1.0, %v529_v57 }
 0x20b   : > { %v7232_v8 = vadd.f32 -1.0, %v526_v0  ;;  %v528_v9 = vmul.f32 %v7228_v55, %v500_v1  ;;  %v541_v12 = vmul.f32 10000.0, %v7231_v49  ;;  %v531_v39 = vmul.f32 %v7228_v55, %v512_v58 }
 0x20c   : > { %v7233_v13 = vadd.f32 -1.0, %v527_v7  ;;  %v7236_v45 = vadd.f32 -1.0, %v530_v28  ;;  %v532_v46 = vmul.f32 %v7228_v55, %v516_v29  ;;  %v545_v47 = vmul.f32 10000.0, %v7235_v38 }
 0x20d   : > { %v542_v24 = vmul.f32 10000.0, %v7232_v8  ;;  %v7234_v50 = vadd.f32 -1.0, %v528_v9  ;;  %v7237_v48 = vadd.f32 -1.0, %v531_v39 }
 0x20e   : > { %v543_v34 = vmul.f32 10000.0, %v7233_v13  ;;  %v546_v23 = vmul.f32 10000.0, %v7236_v45  ;;  %v7238_v0 = vadd.f32 -1.0, %v532_v46 }
 0x20f   : > { %v544_v37 = vmul.f32 10000.0, %v7234_v50  ;;  %v547_v7 = vmul.f32 10000.0, %v7237_v48 }
 0x210   : > { %v548_v11 = vmul.f32 10000.0, %v7238_v0 }
 0x2cc   : > { %v1596_v14 = vpop.f32.mrb[2].mxu0 }
 0x2cd   : > { %v2132_v59 = vmul.f32 0.35355338, %v1596_v14  ;;  %v1672_v25 = vpop.f32.mrb[0].mxu1  ;;  %v7492_v27 = vpop.f32.mrb[3].mxu0 }
 0x2ce   : > { %v2133_v30 = vmul.f32 0.35355338, %v1672_v25  ;;  %v7497_v32 = vpop.f32.mrb[1].mxu1  ;;  %v1228_v27 = vpop.permute.xlu1 %1227 }
 0x2cf   : > { %v8439_v33 = vadd.f32 %v2132_v59, %v541_v12 }
 0x2d0   : > { %v1748_v35 = vpop.f32.mrb[4].mxu0  ;;  %v2141_v36 = vadd.f32 %v2133_v30, %v542_v24 }
 0x2d1   : > { %v2134_v40 = vmul.f32 0.35355338, %v1748_v35  ;;  %v1824_v41 = vpop.f32.mrb[2].mxu1  ;;  %v7502_v43 = vpop.f32.mrb[5].mxu0  ;;  %v2148_v44 = vsel %vm1523_vm3, %v8439_v33, -inf }
 0x2d2   : > { %v2135_v52 = vmul.f32 0.35355338, %v1824_v41  ;;  %v7507_v51 = vpop.f32.mrb[3].mxu1  ;;  %v2151_v53 = vsel %vm1523_vm3, %v2141_v36, -inf  ;;  %2149 = vmax.xlane.f32.xlu0 %v2148_v44 }
 0x2d3   : > { %2152 = vmax.xlane.f32.xlu1 %v2151_v53  ;;  %v2142_v54 = vadd.f32 %v2134_v40, %v543_v34 }
 0x2d4   : > { %v2143_v63 = vadd.f32 %v2135_v52, %v544_v37 }
 0x2d5   : > { %v1900_v60 = vpop.f32.mrb[6].mxu0  ;;  %v1976_v61 = vpop.f32.mrb[4].mxu1  ;;  %v2154_v62 = vsel %vm1523_vm3, %v2142_v54, -inf }
 0x2d6   : > { %v2136_v1 = vmul.f32 0.35355338, %v1900_v60  ;;  %v2137_v4 = vmul.f32 0.35355338, %v1976_v61  ;;  %v7512_v6 = vpop.f32.mrb[7].mxu0  ;;  %v7517_v55 = vpop.f32.mrb[5].mxu1  ;;  %2155 = vmax.xlane.f32.xlu0 %v2154_v62 }
 0x2d7   : > { %v2157_v10 = vsel %vm1523_vm3, %v2143_v63, -inf }
 0x2d8   : > { %v2144_v49 = vadd.f32 %v2136_v1, %v545_v47  ;;  %v2145_v26 = vadd.f32 %v2137_v4, %v546_v23 }
 0x2d9   : > { %v2052_v8 = vpop.f32.mrb[8].mxu0  ;;  %v2128_v9 = vpop.f32.mrb[6].mxu1 }
 0x2da   : > { %v2138_v56 = vmul.f32 0.35355338, %v2052_v8  ;;  %v2139_v12 = vmul.f32 0.35355338, %v2128_v9  ;;  %v7522_v13 = vpop.f32.mrb[9].mxu0  ;;  %v7527_v14 = vpop.f32.mrb[7].mxu1  ;;  %2158 = vmax.xlane.f32.xlu0 %v2157_v10 }
 0x2db   : > { %v2160_v24 = vsel %vm1523_vm3, %v2144_v49, -inf  ;;  %v2163_v57 = vsel %vm1523_vm3, %v2145_v26, -inf }
 0x2dc   : > { %2161 = vmax.xlane.f32.xlu1 %v2160_v24  ;;  %v2146_v50 = vadd.f32 %v2138_v56, %v547_v7  ;;  %v2147_v58 = vadd.f32 %v2139_v12, %v548_v11 }
 0x2de   : > { %2164 = vmax.xlane.f32.xlu0 %v2163_v57  ;;  %v2166_v59 = vsel %vm1523_vm3, %v2146_v50, -inf  ;;  %v2169_v25 = vsel %vm1523_vm3, %v2147_v58, -inf }
 0x2e0   : > { %2167 = vmax.xlane.f32.xlu1 %v2166_v59 }
 0x2e2   : > { %2170 = vmax.xlane.f32.xlu0 %v2169_v25 }
 0x2f1   : > { %1235 = vrot.lane.b32.xlu1 %v8238_v18, %s8099_s8 }
 0x2f5   : > { %1239 = vrot.lane.b32.xlu1 %v8232_v16, %s8099_s8 }
 0x2f8   : > { %1231 = vrot.lane.b32.xlu0 %v8234_v17, %s8099_s8 }
 0x2f9   : > { %1229 = vrot.lane.b32.xlu1 %v8222_v15, %s8099_s8 }
 0x35f   : > { %v2150_v28 = vpop.xlane.xlu0 %2149 }
 0x360   : > { %v2153_v29 = vpop.xlane.xlu1 %2152  ;;  %v2172_v30 = vsub.f32 %v8439_v33, %v2150_v28 }
 0x361   : > { %v2173_v32 = vsub.f32 %v2141_v36, %v2153_v29 }
 0x362   : > { %v2180_v34 = vmul.f32 1.442695, %v2172_v30 }
 0x363   : > { %v2182_v35 = vmul.f32 1.442695, %v2173_v32  ;;  %v2156_v37 = vpop.xlane.xlu0 %2155 }
 0x364   : > { %7921 = vpow2.f32 %v2180_v34  ;;  %v2174_v18 = vsub.f32 %v2142_v54, %v2156_v37 }
 0x365   : > { %7923 = vpow2.f32 %v2182_v35 }
 0x366   : > { %v2184_v38 = vmul.f32 1.442695, %v2174_v18 }
 0x367   : > { %v2159_v16 = vpop.xlane.xlu0 %2158 }
 0x368   : > { %7925 = vpow2.f32 %v2184_v38  ;;  %v2175_v39 = vsub.f32 %v2143_v63, %v2159_v16 }
 0x369   : > { %v2162_v17 = vpop.xlane.xlu1 %2161 }
 0x36a   : > { %v2176_v40 = vsub.f32 %v2144_v49, %v2162_v17  ;;  %v2186_v41 = vmul.f32 1.442695, %v2175_v39 }
 0x36b   : > { %v2165_v15 = vpop.xlane.xlu0 %2164 }
 0x36c   : > { %v2188_v43 = vmul.f32 1.442695, %v2176_v40  ;;  %7927 = vpow2.f32 %v2186_v41  ;;  %v2177_v44 = vsub.f32 %v2145_v26, %v2165_v15 }
 0x36d   : > { %v2168_v45 = vpop.xlane.xlu1 %2167 }
 0x36e   : > { %v8459_v33 = vpop.eup %7921  ;;  %7929 = vpow2.f32 %v2188_v43  ;;  %v2178_v36 = vsub.f32 %v2146_v50, %v2168_v45  ;;  %v2190_v46 = vmul.f32 1.442695, %v2177_v44 }
 0x36f   : > { %v8461_v52 = vpop.eup %7923  ;;  %v2171_v51 = vpop.xlane.xlu0 %2170  ;;  %v2196_v53 = vsel %vm1523_vm3, %v8459_v33, 0.0 }
 0x370   : > { %v2192_v54 = vmul.f32 1.442695, %v2178_v36  ;;  %7931 = vpow2.f32 %v2190_v46  ;;  %v2179_v47 = vsub.f32 %v2147_v58, %v2171_v51  ;;  %v2199_v48 = vsel %vm1523_vm3, %v8461_v52, 0.0  ;;  %2197 = vadd.xlane.f32.xlu1 %v2196_v53 }
 0x371   : > { %v1236_v60 = vpop.permute.xlu1 %1235  ;;  %2200 = vadd.xlane.f32.xlu0 %v2199_v48 }
 0x372   : > { %v8467_v61 = vpop.eup %7925  ;;  %7933 = vpow2.f32 %v2192_v54  ;;  %v2194_v62 = vmul.f32 1.442695, %v2179_v47  ;;  %v1251_v0 = vcombine.low %v1228_v27, %v1236_v60  ;;  %v1252_v1 = vcombine.high %v1228_v27, %v1236_v60 }
 0x373   : > { %v1232_v63 = vpop.permute.xlu0 %1231  ;;  %v2202_v23 = vsel %vm1523_vm3, %v8467_v61, 0.0 }
 0x374   : > { %2203 = vadd.xlane.f32.xlu1 %v2202_v23  ;;  %7935 = vpow2.f32 %v2194_v62  ;;  %v1259_v9 = vrot.slane %v1251_v0, %v8270_v31  ;;  %v1266_v10 = vrot.slane %v1252_v1, %v8270_v31 }
 0x375   : > { %v1240_v4 = vpop.permute.xlu1 %1239 }
 0x376   : > { %v8471_v6 = vpop.eup %7927  ;;  %v1267_v55 = vcombine.low %v1232_v63, %v1240_v4  ;;  %v1268_v49 = vcombine.high %v1232_v63, %v1240_v4 }
 0x377   : > { %v2205_v7 = vsel %vm1523_vm3, %v8471_v6, 0.0 }
 0x378   : > { %v8475_v8 = vpop.eup %7929  ;;  %v1275_v26 = vrot.slane %v1267_v55, %v8270_v31  ;;  %v1282_v11 = vrot.slane %v1268_v49, %v8270_v31  ;;  %2206 = vadd.xlane.f32.xlu0 %v2205_v7 }
 0x379   : > { %v2208_v50 = vsel %vm1523_vm3, %v8475_v8, 0.0  ;;  %v1230_v48 = vpop.permute.xlu1 %1229 }
 0x37a   : > { %v8481_v56 = vpop.eup %7931  ;;  %v1283_v12 = vcombine.low %v1259_v9, %v1275_v26  ;;  %v1284_v13 = vcombine.high %v1259_v9, %v1275_v26  ;;  %v1299_v14 = vcombine.low %v1266_v10, %v1282_v11  ;;  %v1300_v24 = vcombine.high %v1266_v10, %v1282_v11 }
 0x37b   : > { %v2211_v57 = vsel %vm1523_vm3, %v8481_v56, 0.0 }
 0x37c   : > { %v8487_v58 = vpop.eup %7933  ;;  %v1291_v59 = vrot.slane %v1283_v12, %v8286_v42  ;;  %v1298_v25 = vrot.slane %v1284_v13, %v8286_v42  ;;  %v1307_v27 = vrot.slane %v1299_v14, %v8286_v42  ;;  %v1314_v28 = vrot.slane %v1300_v24, %v8286_v42  ;;  %2209 = vadd.xlane.f32.xlu0 %v2208_v50 }
 0x37d   : > { %2212 = vadd.xlane.f32.xlu1 %v2211_v57  ;;  %v2214_v35 = vsel %vm1523_vm3, %v8487_v58, 0.0 }
 0x37e   : > { %v1387_v29 = vcombine.low %v1291_v59, %v1298_v25  ;;  %v7250_v30 = vcombine.high %v1291_v59, %v1298_v25  ;;  %v1403_v32 = vcombine.low %v1307_v27, %v1314_v28  ;;  %v7251_v34 = vcombine.high %v1307_v27, %v1314_v28  ;;  %v8495_v37 = vpop.eup %7935 }
 0x37f   : > { %v2217_v43 = vsel %vm1523_vm3, %v8495_v37, 0.0 }
 0x380   : > { %2215 = vadd.xlane.f32.xlu0 %v2214_v35  ;;  %v1394_v18 = vrot.slane %v1387_v29, %v8270_v31  ;;  %v1402_v38 = vrot.slane %v7250_v30, %v8270_v31  ;;  %v1410_v16 = vrot.slane %v1403_v32, %v8270_v31  ;;  %v1418_v39 = vrot.slane %v7251_v34, %v8270_v31 }
 0x382   : > { %v1419_v17 = vcombine.low %v1394_v18, %v1402_v38  ;;  %v1435_v40 = vcombine.low %v1410_v16, %v1418_v39  ;;  %v1420_v41 = vcombine.high %v1394_v18, %v1402_v38  ;;  %v1436_v15 = vcombine.high %v1410_v16, %v1418_v39 }
 0x384   : > { %2218 = vadd.xlane.f32.xlu0 %v2217_v43  ;;  %v1427_v44 = vrot.slane %v1419_v17, %v8286_v42  ;;  %v1443_v45 = vrot.slane %v1435_v40, %v8286_v42  ;;  %v1434_v36 = vrot.slane %v1420_v41, %v8286_v42  ;;  %v1450_v46 = vrot.slane %v1436_v15, %v8286_v42 }
 0x386   : > { %v1451_v51 = vcombine.low %v1427_v44, %v1443_v45  ;;  %v1452_v53 = vcombine.high %v1427_v44, %v1443_v45  ;;  %v1453_v54 = vcombine.low %v1434_v36, %v1450_v46  ;;  %v1454_v47 = vcombine.high %v1434_v36, %v1450_v46 }
 0x388   : > { %7529 = vmatpush3.msra.mxu0 %v1451_v51  ;;  %7534 = vmatpush3.msra.mxu1 %v1452_v53 }
 0x389   : > { %7538 = vmatprep.subr.mxu0 %v8098_v22  ;;  %7543 = vmatprep.subr.mxu1 %v8098_v22 }
 0x38e   : > { %1237 = vrot.lane.b32.xlu1 %v8252_v21, %s8099_s8 }
 0x392   : > { %1241 = vrot.lane.b32.xlu1 %v8250_v20, %s8099_s8 }
 0x39a   : > { %1233 = vrot.lane.b32.xlu0 %v8244_v19, %s8099_s8 }
 0x3fd   : > { %v2198_v60 = vpop.xlane.xlu1 %2197 }
 0x3fe   : > { %7937 = vrcp.f32 %v2198_v60  ;;  %v2201_v62 = vpop.xlane.xlu0 %2200 }
 0x3ff   : > { %7939 = vrcp.f32 %v2201_v62 }
 0x401   : > { %v2204_v63 = vpop.xlane.xlu1 %2203 }
 0x402   : > { %7941 = vrcp.f32 %v2204_v63 }
 0x405   : > { %v2207_v23 = vpop.xlane.xlu0 %2206 }
 0x406   : > { %7943 = vrcp.f32 %v2207_v23 }
 0x408   : > { %v7938_v0 = vpop.eup %7937 }
 0x409   : > { %v7940_v1 = vpop.eup %7939  ;;  %v2221_v4 = vmul.f32 %v7938_v0, %v8459_v33  ;;  %v2210_v21 = vpop.xlane.xlu0 %2209 }
 0x40a   : > { %v2223_v55 = vmul.f32 %v7940_v1, %v8461_v52  ;;  %v2213_v20 = vpop.xlane.xlu1 %2212  ;;  %7945 = vrcp.f32 %v2210_v21 }
 0x40b   : > { %7531 = vmatmul.mubr.msk.f32.vlgmr.msra.gmra.mrb[10].mxu0 %vm1523_vm3, %v2221_v4  ;;  %7947 = vrcp.f32 %v2213_v20 }
 0x40c   : > { %v7942_v19 = vpop.eup %7941  ;;  %7536 = vmatmul.mubr.msk.f32.vlgmr.msra.gmra.mrb[8].mxu1 %vm1523_vm3, %v2223_v55  ;;  %7539 = vmatpush3.msra.mxu0 %v1453_v54 }
 0x40d   : > { %v2225_v49 = vmul.f32 %v7942_v19, %v8467_v61  ;;  %7544 = vmatpush3.msra.mxu1 %v1454_v47  ;;  %v2216_v7 = vpop.xlane.xlu0 %2215  ;;  %7540 = vmatprep.mubr.msk.f32.mxu0 %vm8100_vm2, %v8098_v22 }
 0x40e   : > { %7545 = vmatprep.mubr.msk.f32.mxu1 %vm8100_vm2, %v8098_v22  ;;  %7548 = vmatprep.subr.mxu0 %v8098_v22  ;;  %v1238_v33 = vpop.permute.xlu1 %1237  ;;  %7949 = vrcp.f32 %v2216_v7 }
 0x40f   : > { %7541 = vmatmul.mubr.msk.f32.vlgmr.msra.gmra.mrb[12].mxu0 %vm1523_vm3, %v2225_v49  ;;  %7553 = vmatprep.subr.mxu1 %v8098_v22  ;;  %v1319_v10 = vcombine.low %v1230_v48, %v1238_v33  ;;  %v1320_v26 = vcombine.high %v1230_v48, %v1238_v33 }
 0x410   : > { %v7944_v52 = vpop.eup %7943  ;;  %7550 = vmatprep.mubr.msk.f32.mxu0 %vm8100_vm2, %v8098_v22 }
 0x411   : > { %v2227_v61 = vmul.f32 %v7944_v52, %v8471_v6  ;;  %v2219_v9 = vpop.xlane.xlu0 %2218  ;;  %v1327_v24 = vrot.slane %v1319_v10, %v8270_v31  ;;  %v1334_v50 = vrot.slane %v1320_v26, %v8270_v31 }
 0x412   : > { %v1242_v11 = vpop.permute.xlu1 %1241  ;;  %7951 = vrcp.f32 %v2219_v9 }
 0x413   : > { %7546 = vmatmul.mubr.msk.f32.vlgmr.msra.gmra.mrb[10].mxu1 %vm1523_vm3, %v2227_v61 }
 0x414   : > { %7555 = vmatprep.mubr.msk.f32.mxu1 %vm8100_vm2, %v8098_v22  ;;  %v7946_v15 = vpop.eup %7945 }
 0x415   : > { %v1234_v12 = vpop.permute.xlu0 %1233  ;;  %v7948_v46 = vpop.eup %7947  ;;  %v2229_v0 = vmul.f32 %v7946_v15, %v8475_v8 }
 0x416   : > { %v1335_v13 = vcombine.low %v1234_v12, %v1242_v11  ;;  %v1336_v14 = vcombine.high %v1234_v12, %v1242_v11  ;;  %v2231_v23 = vmul.f32 %v7948_v46, %v8481_v56 }
 0x418   : > { %v1343_v57 = vrot.slane %v1335_v13, %v8270_v31  ;;  %v1350_v6 = vrot.slane %v1336_v14, %v8270_v31  ;;  %v7950_v54 = vpop.eup %7949 }
 0x419   : > { %v2233_v21 = vmul.f32 %v7950_v54, %v8487_v58 }
 0x41a   : > { %v1351_v59 = vcombine.low %v1327_v24, %v1343_v57  ;;  %v1352_v25 = vcombine.high %v1327_v24, %v1343_v57  ;;  %v1367_v27 = vcombine.low %v1334_v50, %v1350_v6  ;;  %v1368_v28 = vcombine.high %v1334_v50, %v1350_v6 }
 0x41c   : > { %v1359_v29 = vrot.slane %v1351_v59, %v8286_v42  ;;  %v1366_v30 = vrot.slane %v1352_v25, %v8286_v42  ;;  %v1375_v32 = vrot.slane %v1367_v27, %v8286_v42  ;;  %v1382_v34 = vrot.slane %v1368_v28, %v8286_v42  ;;  %v7952_v63 = vpop.eup %7951 }
 0x41d   : > { %v2235_v55 = vmul.f32 %v7952_v63, %v8495_v37 }
 0x41e   : > { %v1455_v35 = vcombine.low %v1359_v29, %v1366_v30  ;;  %v7252_v18 = vcombine.high %v1359_v29, %v1366_v30  ;;  %v1471_v38 = vcombine.low %v1375_v32, %v1382_v34  ;;  %v7253_v16 = vcombine.high %v1375_v32, %v1382_v34 }
 0x420   : > { %v1462_v39 = vrot.slane %v1455_v35, %v8270_v31  ;;  %v1470_v17 = vrot.slane %v7252_v18, %v8270_v31  ;;  %v1478_v40 = vrot.slane %v1471_v38, %v8270_v31  ;;  %v1486_v41 = vrot.slane %v7253_v16, %v8270_v31 }
 0x422   : > { %v1487_v43 = vcombine.low %v1462_v39, %v1470_v17  ;;  %v1503_v44 = vcombine.low %v1478_v40, %v1486_v41  ;;  %v1488_v45 = vcombine.high %v1462_v39, %v1470_v17  ;;  %v1504_v36 = vcombine.high %v1478_v40, %v1486_v41 }
 0x424   : > { %v1495_v51 = vrot.slane %v1487_v43, %v8286_v42  ;;  %v1511_v53 = vrot.slane %v1503_v44, %v8286_v42  ;;  %v1502_v47 = vrot.slane %v1488_v45, %v8286_v42  ;;  %v1518_v48 = vrot.slane %v1504_v36, %v8286_v42 }
 0x426   : > { %v1519_v60 = vcombine.low %v1495_v51, %v1511_v53  ;;  %v1520_v62 = vcombine.high %v1495_v51, %v1511_v53  ;;  %v1521_v1 = vcombine.low %v1502_v47, %v1518_v48  ;;  %v1522_v4 = vcombine.high %v1502_v47, %v1518_v48 }
 0x428   : > { %7549 = vmatpush3.msra.mxu0 %v1519_v60  ;;  %7554 = vmatpush3.msra.mxu1 %v1520_v62 }
 0x429   : > { %7551 = vmatmul.mubr.msk.f32.vlgmr.msra.gmra.mrb[14].mxu0 %vm1523_vm3, %v2229_v0  ;;  %7556 = vmatmul.mubr.msk.f32.vlgmr.msra.gmra.mrb[12].mxu1 %vm1523_vm3, %v2231_v23 }
 0x42a   : > { %7558 = vmatprep.subr.mxu0 %v8098_v22  ;;  %7563 = vmatprep.subr.mxu1 %v8098_v22 }
 0x42b   : > { %7559 = vmatpush3.msra.mxu0 %v1521_v1  ;;  %7564 = vmatpush3.msra.mxu1 %v1522_v4 }
 0x42c   : > { %7560 = vmatprep.mubr.msk.f32.mxu0 %vm8100_vm2, %v8098_v22  ;;  %7565 = vmatprep.mubr.msk.f32.mxu1 %vm8100_vm2, %v8098_v22 }
 0x42d   : > { %7561 = vmatmul.mubr.msk.f32.vlgmr.msra.gmra.mrb[16].mxu0 %vm1523_vm3, %v2233_v21  ;;  %7566 = vmatmul.mubr.msk.f32.vlgmr.msra.gmra.mrb[14].mxu1 %vm1523_vm3, %v2235_v55 }
 0x4de   : > { %v2305_v8 = vpop.f32.mrb[10].mxu0 }
 0x4df   : > { %v2378_v56 = vpop.f32.mrb[8].mxu1  ;;  %v7532_v20 = vpop.f32.mrb[11].mxu0 }
 0x4e0   : > { %v7537_v19 = vpop.f32.mrb[9].mxu1 }
 0x4e2   : > { %v2451_v49 = vpop.f32.mrb[12].mxu0 }
 0x4e3   : > { %v2820_v58 = vcombine.low %v2305_v8, %v2451_v49  ;;  %v2821_v7 = vcombine.high %v2305_v8, %v2451_v49  ;;  %v7542_v37 = vpop.f32.mrb[13].mxu0 }
 0x4e5   : > { %v2828_v10 = vrot.slane %v2820_v58, %v8270_v31  ;;  %v2835_v26 = vrot.slane %v2821_v7, %v8270_v31 }
 0x4e6   : > { %v2524_v33 = vpop.f32.mrb[10].mxu1 }
 0x4e7   : > { %v2836_v52 = vcombine.low %v2378_v56, %v2524_v33  ;;  %v2837_v61 = vcombine.high %v2378_v56, %v2524_v33  ;;  %v7547_v9 = vpop.f32.mrb[11].mxu1 }
 0x4e9   : > { %v2844_v11 = vrot.slane %v2836_v52, %v8270_v31  ;;  %v2851_v12 = vrot.slane %v2837_v61, %v8270_v31 }
 0x4eb   : > { %v2852_v13 = vcombine.low %v2828_v10, %v2844_v11  ;;  %v2853_v14 = vcombine.high %v2828_v10, %v2844_v11  ;;  %v2868_v24 = vcombine.low %v2835_v26, %v2851_v12  ;;  %v2869_v50 = vcombine.high %v2835_v26, %v2851_v12 }
 0x4ed   : > { %v2860_v57 = vrot.slane %v2852_v13, %v8286_v42  ;;  %v2867_v6 = vrot.slane %v2853_v14, %v8286_v42  ;;  %v2876_v59 = vrot.slane %v2868_v24, %v8286_v42  ;;  %v2883_v25 = vrot.slane %v2869_v50, %v8286_v42 }
 0x4ef   : > { %v2956_v27 = vcombine.low %v2860_v57, %v2867_v6  ;;  %v7278_v28 = vcombine.high %v2860_v57, %v2867_v6  ;;  %v2972_v29 = vcombine.low %v2876_v59, %v2883_v25  ;;  %v7279_v30 = vcombine.high %v2876_v59, %v2883_v25 }
 0x4f1   : > { %v2963_v32 = vrot.slane %v2956_v27, %v8270_v31  ;;  %v2971_v34 = vrot.slane %v7278_v28, %v8270_v31  ;;  %v2979_v35 = vrot.slane %v2972_v29, %v8270_v31  ;;  %v2987_v18 = vrot.slane %v7279_v30, %v8270_v31 }
 0x4f3   : > { %v2988_v38 = vcombine.low %v2963_v32, %v2971_v34  ;;  %v3004_v16 = vcombine.low %v2979_v35, %v2987_v18  ;;  %v2989_v39 = vcombine.high %v2963_v32, %v2971_v34  ;;  %v3005_v17 = vcombine.high %v2979_v35, %v2987_v18 }
 0x4f5   : > { %v8576_v40 = vrot.slane %v2988_v38, %v8286_v42  ;;  %v8579_v41 = vrot.slane %v3004_v16, %v8286_v42  ;;  %v3003_v15 = vrot.slane %v2989_v39, %v8286_v42  ;;  %v3019_v43 = vrot.slane %v3005_v17, %v8286_v42 }
 0x4f7   : > { %v3021_v44 = vcombine.high %v8576_v40, %v8579_v41  ;;  %v3022_v45 = vcombine.low %v3003_v15, %v3019_v43  ;;  %v3023_v36 = vcombine.high %v3003_v15, %v3019_v43  ;;  %v3020_v46 = vcombine.low %v8576_v40, %v8579_v41  ;;  %v8005_v40 = vld [vmem:[#allocation2] sm:$0xff] }
 0x4f9   : > { %3094 = vrot.lane.b32.xlu0 %v3021_v44, %s8104_s15 }
 0x4fc   : > { %v2597_v51 = vpop.f32.mrb[14].mxu0  ;;  %v2670_v53 = vpop.f32.mrb[12].mxu1 }
 0x4fd   : > { %3102 = vrot.lane.b32.xlu0 %v3022_v45, %s8105_s16  ;;  %v7552_v54 = vpop.f32.mrb[15].mxu0  ;;  %v7557_v47 = vpop.f32.mrb[13].mxu1 }
 0x500   : > { %v2743_v48 = vpop.f32.mrb[16].mxu0  ;;  %v2816_v60 = vpop.f32.mrb[14].mxu1 }
 0x501   : > { %v2888_v62 = vcombine.low %v2597_v51, %v2743_v48  ;;  %v2889_v63 = vcombine.high %v2597_v51, %v2743_v48  ;;  %v2904_v23 = vcombine.low %v2670_v53, %v2816_v60  ;;  %v2905_v0 = vcombine.high %v2670_v53, %v2816_v60  ;;  %3110 = vrot.lane.b32.xlu0 %v3023_v36, %s8106_s18  ;;  %v7562_v1 = vpop.f32.mrb[17].mxu0  ;;  %v7567_v4 = vpop.f32.mrb[15].mxu1  ;;  %v8006_v53 = vld [vmem:[#allocation2 + $0x8] sm:$0xff]  ;;  %v8621_v60 = vld [vmem:[%s8186_s11 + $0x18] sm:$0xff] }
 0x502   : > { %v8618_v48 = vld [vmem:[%s8186_s11 + $0x8] sm:$0xff]  ;;  %v3266_v1 = vld [vmem:[%s9420_s2] sm:$0xff] }
 0x503   : > { %v2896_v21 = vrot.slane %v2888_v62, %v8270_v31  ;;  %v2903_v55 = vrot.slane %v2889_v63, %v8270_v31  ;;  %v2912_v8 = vrot.slane %v2904_v23, %v8270_v31  ;;  %v2919_v56 = vrot.slane %v2905_v0, %v8270_v31  ;;  %v8624_v62 = vld [vmem:[%s8186_s11 + $0x28] sm:$0xff]  ;;  %v8635_v0 = vld [vmem:[%s8186_s11 + $0x38] sm:$0xff]  ;;  %7587 = vmatprep.mubr.msk.f32.mxu1 %vm557_vm1, %v3266_v1 }
 0x504   : > { %v7911_v63 = vpack.i.bf16 %v8621_v60, %v8618_v48  ;;  %v7751_v23 = vpack.c.bf16 %v8621_v60, %v8618_v48  ;;  %v7916_v4 = vpack.i.bf16 %v8635_v0, %v8624_v62 }
 0x505   : > { %v2920_v20 = vcombine.low %v2896_v21, %v2912_v8  ;;  %v2921_v19 = vcombine.high %v2896_v21, %v2912_v8  ;;  %v2936_v49 = vcombine.low %v2903_v55, %v2919_v56  ;;  %v2937_v58 = vcombine.high %v2903_v55, %v2919_v56 }
 0x506   : > { %v7755_v21 = vpack.c.bf16 %v8635_v0, %v8624_v62  ;;  %7752 = vmatprep.subr.bf16.mxu1 %v7751_v23 }
 0x507   : > { %v2928_v7 = vrot.slane %v2920_v20, %v8286_v42  ;;  %v2935_v37 = vrot.slane %v2921_v19, %v8286_v42  ;;  %v2944_v33 = vrot.slane %v2936_v49, %v8286_v42  ;;  %v2951_v52 = vrot.slane %v2937_v58, %v8286_v42  ;;  %7754 = vmatpush3.bf16.msra.mxu1 %v7751_v23  ;;  %v7282_v49 = vld [vmem:[%s8196_s17 + $0x1] ss:$0 sm:$0xff] }
 0x508   : > { %7756 = vmatprep.subr.bf16.mxu1 %v7755_v21 }
 0x509   : > { %v3024_v61 = vcombine.low %v2928_v7, %v2935_v37  ;;  %v7280_v9 = vcombine.high %v2928_v7, %v2935_v37  ;;  %v3040_v10 = vcombine.low %v2944_v33, %v2951_v52  ;;  %v7281_v26 = vcombine.high %v2944_v33, %v2951_v52 }
 0x50b   : > { %v3031_v11 = vrot.slane %v3024_v61, %v8270_v31  ;;  %v3039_v12 = vrot.slane %v7280_v9, %v8270_v31  ;;  %v3047_v13 = vrot.slane %v3040_v10, %v8270_v31  ;;  %v3055_v14 = vrot.slane %v7281_v26, %v8270_v31  ;;  %7758 = vmatpush3.bf16.msra.mxu1 %v7755_v21  ;;  %v8008_v26 = vld [vmem:[%s8186_s11 + $0x20] sm:$0xff] }
 0x50d   : > { %v3056_v24 = vcombine.low %v3031_v11, %v3039_v12  ;;  %v3072_v50 = vcombine.low %v3047_v13, %v3055_v14  ;;  %v3057_v57 = vcombine.high %v3031_v11, %v3039_v12  ;;  %v3073_v6 = vcombine.high %v3047_v13, %v3055_v14  ;;  %v8009_v11 = vld [vmem:[%s8186_s11 + $0x30] sm:$0xff]  ;;  %v3269_v14 = vld [vmem:[%s9420_s2 + $0x18] sm:$0xff]  ;;  %s8112_s11 = smov (!%p7351_p6), 32  }
 0x50e   : > { %7588 = vmatmul.mubr.msk.f32.vlgmr.msra.gmra.mrb[16].mxu1 %vm557_vm1, %v3267_v3  ;;  %v7906_v12 = vpack.i.bf16 %v8009_v11, %v8008_v26  ;;  %v3268_v13 = vld [vmem:[%s9420_s2 + $0x10] sm:$0xff] }
 0x50f   : > { %v3064_v59 = vrot.slane %v3056_v24, %v8286_v42  ;;  %v3080_v25 = vrot.slane %v3072_v50, %v8286_v42  ;;  %v3071_v27 = vrot.slane %v3057_v57, %v8286_v42  ;;  %v3087_v28 = vrot.slane %v3073_v6, %v8286_v42  ;;  %7590 = vmatprep.mubr.msk.f32.mxu1 %vm557_vm1, %v3268_v13 }
 0x511   : > { %v3089_v29 = vcombine.high %v3064_v59, %v3080_v25  ;;  %v3090_v30 = vcombine.low %v3071_v27, %v3087_v28  ;;  %v3091_v32 = vcombine.high %v3071_v27, %v3087_v28  ;;  %v3088_v34 = vcombine.low %v3064_v59, %v3080_v25 }
 0x512   : > { %7591 = vmatmul.mubr.msk.f32.gmra.mrb[18].mxu1 %vm557_vm1, %v3269_v14 }
 0x513   : > { %3096 = vrot.lane.b32.xlu1 %v3089_v29, %s8104_s15  ;;  %7604 = vmatprep.mubr.msk.f32.mxu1 %vm8100_vm2, %v8098_v22 }
 0x517   : > { %3104 = vrot.lane.b32.xlu1 %v3090_v30, %s8105_s16 }
 0x51b   : > { %3112 = vrot.lane.b32.xlu1 %v3091_v32, %s8106_s18 }
 0x56b   : > { %v3095_v35 = vpop.permute.xlu0 %3094 }
 0x56c   : > { %v3116_v38 = vsel %vm1523_vm3, %v3020_v46, %v3095_v35 }
 0x56f   : > { %v3103_v18 = vpop.permute.xlu0 %3102 }
 0x570   : > { %v3119_v16 = vsel %vm3118_vm5, %v3116_v38, %v3103_v18 }
 0x573   : > { %v3111_v39 = vpop.permute.xlu0 %3110 }
 0x574   : > { %v3122_v17 = vsel %vm3121_vm6, %v3119_v16, %v3111_v39 }
 0x575   : > { %v3124_v41 = vadd.f32 %v8005_v40, %v3122_v17 }
 0x577   : > { %v3126_v15 = vsel %vm557_vm1, %v3124_v41, 0.0 }
 0x578   : > { %3127 = vadd.xlane.f32.xlu0 %v3126_v15 }
 0x585   : > { %v3097_v43 = vpop.permute.xlu1 %3096 }
 0x586   : > { %v3117_v45 = vsel %vm1523_vm3, %v3088_v34, %v3097_v43 }
 0x589   : > { %v3105_v44 = vpop.permute.xlu1 %3104 }
 0x58a   : > { %v3120_v36 = vsel %vm3118_vm5, %v3117_v45, %v3105_v44 }
 0x58d   : > { %v3113_v46 = vpop.permute.xlu1 %3112 }
 0x58e   : > { %v3123_v51 = vsel %vm3121_vm6, %v3120_v36, %v3113_v46 }
 0x58f   : > { %v3125_v54 = vadd.f32 %v8006_v53, %v3123_v51 }
 0x591   : > { %v3129_v47 = vsel %vm557_vm1, %v3125_v54, 0.0 }
 0x592   : > { %3130 = vadd.xlane.f32.xlu1 %v3129_v47 }
 0x5a3   : > { %7902 = vrot.lane.b32.xlu1 %v7901_v5, %s8107_s19 }
 0x5a7   : > { %3153 = vrot.lane.b32.xlu1 %v8007_v2, %s8107_s19 }
 0x5ab   : > { %3270 = vrot.lane.b32.xlu1 %v7282_v49, %s8099_s8 }
 0x5e1   : > { %v7589_v24 = vpop.f32.mrb[16].mxu1 }
 0x5e2   : > { %v3351_v50 = vpop.f32.mrb[17].mxu1 }
 0x605   : > { %v3128_v5 = vpop.xlane.xlu0 %3127 }
 0x606   : > { %v3133_v55 = vmul.f32 0.03125, %v3128_v5  ;;  %v7592_v5 = vpop.f32.mrb[18].mxu1 }
 0x608   : > { %v3135_v8 = vsub.f32 %v3124_v41, %v3133_v55 }
 0x60a   : > { %v3137_v56 = vmul.f32 %v3135_v8, %v3135_v8 }
 0x60c   : > { %v3139_v20 = vsel %vm557_vm1, %v3137_v56, 0.0 }
 0x60d   : > { %3140 = vadd.xlane.f32.xlu0 %v3139_v20  ;;  %v3361_v20 = vpop.f32.mrb[19].mxu1 }
 0x61f   : > { %v3131_v19 = vpop.xlane.xlu1 %3130 }
 0x620   : > { %v3134_v58 = vmul.f32 0.03125, %v3131_v19 }
 0x622   : > { %v3136_v7 = vsub.f32 %v3125_v54, %v3134_v58 }
 0x623   : > { %v7903_v37 = vpop.permute.xlu1 %7902 }
 0x624   : > { %v3138_v33 = vmul.f32 %v3136_v7, %v3136_v7  ;;  %v7905_v52 = vunpack.i.h.bf16 %v7903_v37  ;;  %v7904_v61 = vunpack.i.l.bf16 %v7903_v37 }
 0x626   : > { %v3142_v9 = vsel %vm557_vm1, %v3138_v33, 0.0  ;;  %v7743_v10 = vpack.c.bf16 %v7905_v52, %v7904_v61 }
 0x627   : > { %3143 = vadd.xlane.f32.xlu0 %v3142_v9  ;;  %v3154_v57 = vpop.permute.xlu1 %3153 }
 0x628   : > { %7744 = vmatprep.subr.bf16.mxu0 %v7743_v10 }
 0x629   : > { %7746 = vmatpush3.bf16.msra.mxu0 %v7743_v10 }
 0x62b   : > { %v3271_v6 = vpop.permute.xlu1 %3270 }
 0x62c   : > { %v8669_v59 = vadd.f32 %v3351_v50, %v3271_v6  ;;  %v8671_v25 = vadd.f32 %v7589_v24, %v3271_v6  ;;  %v8718_v56 = vadd.f32 %v7592_v5, %v3271_v6  ;;  %v8727_v37 = vadd.f32 %v3361_v20, %v3271_v6 }
 0x62e   : > { %3666 = vrot.lane.b32.xlu1 %v8669_v59, %s8095_s23 }
 0x632   : > { %3678 = vrot.lane.b32.xlu1 %v8669_v59, %s8096_s29 }
 0x636   : > { %3690 = vrot.lane.b32.xlu1 %v8669_v59, %s8094_s22 }
 0x63a   : > { %3672 = vrot.lane.b32.xlu1 %v8718_v56, %s8095_s23 }
 0x63d   : > { %7907 = vrot.lane.b32.xlu0 %v7906_v12, %s8107_s19 }
 0x641   : > { %3182 = vrot.lane.b32.xlu0 %v7282_v49, %s8097_s30 }
 0x645   : > { %3668 = vrot.lane.b32.xlu0 %v8671_v25, %s8095_s23 }
 0x649   : > { %3680 = vrot.lane.b32.xlu0 %v8671_v25, %s8096_s29 }
 0x64d   : > { %3692 = vrot.lane.b32.xlu0 %v8671_v25, %s8094_s22 }
 0x651   : > { %3670 = vrot.lane.b32.xlu0 %v8727_v37, %s8095_s23 }
 0x69a   : > { %v3141_v27 = vpop.xlane.xlu0 %3140 }
 0x69b   : > { %v3145_v28 = vmul.f32 0.03125, %v3141_v27 }
 0x69d   : > { %v3147_v29 = vadd.f32 1e-06, %v3145_v28 }
 0x69f   : > { %7953 = vrsqrt.f32 %v3147_v29 }
 0x6a0   : > { %v8697_v46 = vpop.permute.xlu1 %3666 }
 0x6a4   : > { %v8701_v53 = vpop.permute.xlu1 %3678 }
 0x6a5   : > { %v3702_v47 = vcombine.low %v8669_v59, %v8701_v53  ;;  %v3703_v23 = vcombine.high %v8669_v59, %v8701_v53 }
 0x6a7   : > { %v3710_v2 = vrot.slane %v3702_v47, %v8270_v31  ;;  %v3717_v3 = vrot.slane %v3703_v23, %v8270_v31 }
 0x6a8   : > { %v8715_v55 = vpop.permute.xlu1 %3690 }
 0x6a9   : > { %v7954_v30 = vpop.eup %7953  ;;  %v3718_v19 = vcombine.low %v8697_v46, %v8715_v55 }
 0x6aa   : > { %v3151_v32 = vmul.f32 %v7954_v30, %v3135_v8 }
 0x6ab   : > { %v3726_v61 = vrot.slane %v3718_v19, %v8270_v31 }
 0x6ac   : > { %v3156_v34 = vmul.f32 %v3154_v57, %v3151_v32 }
 0x6ad   : > { %v3734_v11 = vcombine.low %v3710_v2, %v3726_v61  ;;  %v3735_v12 = vcombine.high %v3710_v2, %v3726_v61 }
 0x6ae   : > { %v8685_v35 = vadd.f32 %v7282_v49, %v3156_v34 }
 0x6af   : > { %v3742_v27 = vrot.slane %v3734_v11, %v8286_v42  ;;  %v3749_v28 = vrot.slane %v3735_v12, %v8286_v42 }
 0x6b0   : > { %7576 = vmatprep.mubr.msk.f32.mxu0 %vm557_vm1, %v8685_v35 }
 0x6b4   : > { %v3144_v18 = vpop.xlane.xlu0 %3143 }
 0x6b5   : > { %v3146_v38 = vmul.f32 0.03125, %v3144_v18 }
 0x6b7   : > { %v3148_v16 = vadd.f32 1e-06, %v3146_v38 }
 0x6b8   : > { %v7908_v39 = vpop.permute.xlu0 %7907 }
 0x6b9   : > { %7955 = vrsqrt.f32 %v3148_v16  ;;  %v7910_v17 = vunpack.i.h.bf16 %v7908_v39  ;;  %v7909_v40 = vunpack.i.l.bf16 %v7908_v39  ;;  %v3974_v16 = vcombine.low %v3742_v27, %v3749_v28 }
 0x6ba   : > { %v7293_v39 = vcombine.high %v3742_v27, %v3749_v28  ;;  %v8108_v27 = vmov 0.0|0.0  }
 0x6bb   : > { %v7747_v41 = vpack.c.bf16 %v7910_v17, %v7909_v40  ;;  %v3981_v47 = vrot.slane %v3974_v16, %v8270_v31  ;;  %7763 = vmatprep.subr.bf16.mxu1 %v8108_v27 }
 0x6bc   : > { %v8695_v36 = vpop.permute.xlu0 %3182  ;;  %v3989_v23 = vrot.slane %v7293_v39, %v8270_v31 }
 0x6bd   : > { %7748 = vmatprep.subr.bf16.mxu0 %v7747_v41 }
 0x6be   : > { %7750 = vmatpush3.bf16.msra.mxu0 %v7747_v41  ;;  %v4006_v20 = vcombine.low %v3981_v47, %v3989_v23  ;;  %v4007_v19 = vcombine.high %v3981_v47, %v3989_v23 }
 0x6bf   : > { %7759 = vmatprep.subr.bf16.mxu0 %v8108_v27 }
 0x6c0   : > { %v8699_v51 = vpop.permute.xlu0 %3668 }
 0x6c3   : > { %v7956_v15 = vpop.eup %7955 }
 0x6c4   : > { %v3152_v43 = vmul.f32 %v7956_v15, %v3136_v7  ;;  %v8703_v54 = vpop.permute.xlu0 %3680 }
 0x6c5   : > { %v3770_v1 = vcombine.low %v8671_v25, %v8703_v54  ;;  %v3771_v21 = vcombine.high %v8671_v25, %v8703_v54 }
 0x6c6   : > { %v3157_v44 = vmul.f32 %v3154_v57, %v3152_v43 }
 0x6c7   : > { %v3778_v8 = vrot.slane %v3770_v1, %v8270_v31  ;;  %v3785_v7 = vrot.slane %v3771_v21, %v8270_v31 }
 0x6c8   : > { %v8689_v45 = vadd.f32 %v7282_v49, %v3157_v44  ;;  %v3719_v49 = vcombine.high %v8697_v46, %v8715_v55  ;;  %v8724_v58 = vpop.permute.xlu0 %3692 }
 0x6c9   : > { %v3786_v33 = vcombine.low %v8699_v51, %v8724_v58  ;;  %v3787_v52 = vcombine.high %v8699_v51, %v8724_v58 }
 0x6ca   : > { %7577 = vmatmul.mubr.msk.f32.vlgmr.msra.gmra.mrb[18].mxu0 %vm557_vm1, %v8689_v45  ;;  %v3733_v9 = vrot.slane %v3719_v49, %v8270_v31 }
 0x6cb   : > { %7597 = vmatprep.mubr.msk.f32.mxu0 %vm8100_vm2, %v8098_v22  ;;  %v3794_v10 = vrot.slane %v3786_v33, %v8270_v31  ;;  %v3801_v26 = vrot.slane %v3787_v52, %v8270_v31 }
 0x6cc   : > { %v3750_v13 = vcombine.low %v3717_v3, %v3733_v9  ;;  %v3751_v14 = vcombine.high %v3717_v3, %v3733_v9  ;;  %v8810_v47 = vpop.permute.xlu0 %3670 }
 0x6cd   : > { %v3802_v24 = vcombine.low %v3778_v8, %v3794_v10  ;;  %v3803_v50 = vcombine.high %v3778_v8, %v3794_v10  ;;  %v3818_v57 = vcombine.low %v3785_v7, %v3801_v26  ;;  %v3819_v6 = vcombine.high %v3785_v7, %v3801_v26 }
 0x6ce   : > { %v3758_v29 = vrot.slane %v3750_v13, %v8286_v42  ;;  %v3765_v30 = vrot.slane %v3751_v14, %v8286_v42  ;;  %v4014_v10 = vrot.slane %v4006_v20, %v8286_v42 }
 0x6cf   : > { %v3810_v32 = vrot.slane %v3802_v24, %v8286_v42  ;;  %v3817_v34 = vrot.slane %v3803_v50, %v8286_v42  ;;  %v3826_v18 = vrot.slane %v3818_v57, %v8286_v42  ;;  %v3833_v38 = vrot.slane %v3819_v6, %v8286_v42 }
 0x6d0   : > { %v3990_v17 = vcombine.low %v3758_v29, %v3765_v30  ;;  %v7294_v40 = vcombine.high %v3758_v29, %v3765_v30  ;;  %v4021_v29 = vrot.slane %v4007_v19, %v8286_v42 }
 0x6d1   : > { %v4042_v41 = vcombine.low %v3810_v32, %v3817_v34  ;;  %v7295_v15 = vcombine.high %v3810_v32, %v3817_v34  ;;  %v4058_v43 = vcombine.low %v3826_v18, %v3833_v38  ;;  %v7296_v44 = vcombine.high %v3826_v18, %v3833_v38 }
 0x6d2   : > { %v3997_v1 = vrot.slane %v3990_v17, %v8270_v31  ;;  %v4005_v21 = vrot.slane %v7294_v40, %v8270_v31 }
 0x6d3   : > { %v4049_v2 = vrot.slane %v4042_v41, %v8270_v31  ;;  %v4057_v3 = vrot.slane %v7295_v15, %v8270_v31  ;;  %v4065_v5 = vrot.slane %v4058_v43, %v8270_v31  ;;  %v4073_v8 = vrot.slane %v7296_v44, %v8270_v31 }
 0x6d4   : > { %v4022_v49 = vcombine.low %v3997_v1, %v4005_v21  ;;  %v4023_v7 = vcombine.high %v3997_v1, %v4005_v21 }
 0x6d5   : > { %v4074_v33 = vcombine.low %v4049_v2, %v4057_v3  ;;  %v4075_v52 = vcombine.high %v4049_v2, %v4057_v3  ;;  %v4090_v61 = vcombine.low %v4065_v5, %v4073_v8  ;;  %v4091_v9 = vcombine.high %v4065_v5, %v4073_v8 }
 0x6d6   : > { %v4030_v26 = vrot.slane %v4022_v49, %v8286_v42  ;;  %v4037_v30 = vrot.slane %v4023_v7, %v8286_v42 }
 0x6d7   : > { %v4082_v11 = vrot.slane %v4074_v33, %v8286_v42  ;;  %v4098_v12 = vrot.slane %v4090_v61, %v8286_v42  ;;  %v4089_v32 = vrot.slane %v4075_v52, %v8286_v42  ;;  %v4105_v34 = vrot.slane %v4091_v9, %v8286_v42 }
 0x6d8   : > { %v4038_v13 = vcombine.low %v4014_v10, %v4030_v26  ;;  %v4039_v24 = vcombine.high %v4014_v10, %v4030_v26  ;;  %v4040_v18 = vcombine.low %v4021_v29, %v4037_v30  ;;  %v4041_v38 = vcombine.high %v4021_v29, %v4037_v30 }
 0x6d9   : > { %v4106_v14 = vcombine.low %v4082_v11, %v4098_v12  ;;  %v4107_v50 = vcombine.high %v4082_v11, %v4098_v12  ;;  %v4108_v16 = vcombine.low %v4089_v32, %v4105_v34  ;;  %v4109_v39 = vcombine.high %v4089_v32, %v4105_v34 }
 0x6db   : > { %v7760_v57 = vpack.c.bf16 %v4106_v14, %v4038_v13  ;;  %v7764_v6 = vpack.c.bf16 %v4107_v50, %v4039_v24  ;;  %v8779_v17 = vpack.c.bf16 %v4108_v16, %v4040_v18  ;;  %v8781_v40 = vpack.c.bf16 %v4109_v39, %v4041_v38 }
 0x6dd   : > { %7762 = vmatpush3.bf16.xpose.msk.msra.mxu0 %vm8765_vm7, %v7760_v57  ;;  %7766 = vmatpush3.bf16.xpose.msk.msra.mxu1 %vm8765_vm7, %v7764_v6 }
 0x6de   : > { %7767 = vmatprep.subr.bf16.mxu0 %v8108_v27  ;;  %7771 = vmatprep.subr.bf16.mxu1 %v8108_v27 }
 0x79d   : > { %v7578_v41 = vpop.f32.mrb[18].mxu0 }
 0x79e   : > { %v3257_v15 = vpop.f32.mrb[19].mxu0  ;;  %v8794_v44 = vadd.f32 %v7578_v41, %v8695_v36 }
 0x79f   : > { %v3258_v43 = vadd.f32 %v3257_v15, %v8695_v36  ;;  %v8808_v36 = vpop.permute.xlu1 %3672 }
 0x7a1   : > { %3378 = vrot.lane.b32.xlu0 %v3258_v43, %s8096_s29  ;;  %3372 = vrot.lane.b32.xlu1 %v3258_v43, %s8095_s23 }
 0x7a5   : > { %3682 = vrot.lane.b32.xlu0 %v8727_v37, %s8096_s29  ;;  %3384 = vrot.lane.b32.xlu1 %v3258_v43, %s8094_s22 }
 0x7a9   : > { %3694 = vrot.lane.b32.xlu0 %v8727_v37, %s8094_s22  ;;  %3684 = vrot.lane.b32.xlu1 %v8718_v56, %s8096_s29 }
 0x7ad   : > { %3374 = vrot.lane.b32.xlu0 %v8794_v44, %s8095_s23  ;;  %3696 = vrot.lane.b32.xlu1 %v8718_v56, %s8094_s22  ;;  %s8116_s23 = smov (!%p7351_p6), 80  }
 0x7b1   : > { %3386 = vrot.lane.b32.xlu0 %v8794_v44, %s8094_s22  ;;  %3380 = vrot.lane.b32.xlu1 %v8794_v44, %s8096_s29  ;;  %s8115_s22 = smov (!%p7351_p6), 96   ;;  %s8117_s29 = smov (!%p7351_p6), 112  }
 0x7b5   : > { %4246 = vrot.lane.b32.xlu0 %v8669_v59, %s8097_s30  ;;  %4248 = vrot.lane.b32.xlu1 %v8671_v25, %s8097_s30 }
 0x813   : > { %v3379_v23 = vpop.permute.xlu0 %3378  ;;  %v3373_v1 = vpop.permute.xlu1 %3372 }
 0x814   : > { %v3390_v21 = vcombine.low %v3258_v43, %v3379_v23  ;;  %v3391_v2 = vcombine.high %v3258_v43, %v3379_v23 }
 0x816   : > { %v3398_v25 = vrot.slane %v3390_v21, %v8270_v31  ;;  %v3405_v49 = vrot.slane %v3391_v2, %v8270_v31 }
 0x817   : > { %v8812_v3 = vpop.permute.xlu0 %3682  ;;  %v3385_v5 = vpop.permute.xlu1 %3384 }
 0x818   : > { %v3406_v8 = vcombine.low %v3373_v1, %v3385_v5  ;;  %v3407_v20 = vcombine.high %v3373_v1, %v3385_v5  ;;  %v3838_v19 = vcombine.low %v8727_v37, %v8812_v3  ;;  %v3839_v59 = vcombine.high %v8727_v37, %v8812_v3 }
 0x81a   : > { %v3414_v7 = vrot.slane %v3406_v8, %v8270_v31  ;;  %v3421_v33 = vrot.slane %v3407_v20, %v8270_v31  ;;  %v3846_v12 = vrot.slane %v3838_v19, %v8270_v31  ;;  %v3853_v13 = vrot.slane %v3839_v59, %v8270_v31 }
 0x81b   : > { %v8822_v52 = vpop.permute.xlu0 %3694  ;;  %v8824_v11 = vpop.permute.xlu1 %3684 }
 0x81c   : > { %v3422_v61 = vcombine.low %v3398_v25, %v3414_v7  ;;  %v3423_v9 = vcombine.high %v3398_v25, %v3414_v7  ;;  %v3438_v10 = vcombine.low %v3405_v49, %v3421_v33  ;;  %v3439_v26 = vcombine.high %v3405_v49, %v3421_v33 }
 0x81d   : > { %v3854_v14 = vcombine.low %v8810_v47, %v8822_v52  ;;  %v3855_v24 = vcombine.high %v8810_v47, %v8822_v52  ;;  %v3906_v34 = vcombine.low %v8718_v56, %v8824_v11  ;;  %v3907_v18 = vcombine.high %v8718_v56, %v8824_v11 }
 0x81e   : > { %v3430_v50 = vrot.slane %v3422_v61, %v8286_v42  ;;  %v3437_v57 = vrot.slane %v3423_v9, %v8286_v42  ;;  %v3446_v6 = vrot.slane %v3438_v10, %v8286_v42  ;;  %v3453_v29 = vrot.slane %v3439_v26, %v8286_v42 }
 0x81f   : > { %v3862_v30 = vrot.slane %v3854_v14, %v8270_v31  ;;  %v3869_v32 = vrot.slane %v3855_v24, %v8270_v31  ;;  %v3375_v38 = vpop.permute.xlu0 %3374  ;;  %v8854_v19 = vpop.permute.xlu1 %3696  ;;  %v3914_v9 = vrot.slane %v3906_v34, %v8270_v31  ;;  %v3921_v10 = vrot.slane %v3907_v18, %v8270_v31 }
 0x820   : > { %v3526_v16 = vcombine.low %v3430_v50, %v3437_v57  ;;  %v7289_v39 = vcombine.high %v3430_v50, %v3437_v57  ;;  %v3542_v41 = vcombine.low %v3446_v6, %v3453_v29  ;;  %v7290_v15 = vcombine.high %v3446_v6, %v3453_v29 }
 0x821   : > { %v3870_v43 = vcombine.low %v3846_v12, %v3862_v30  ;;  %v3871_v23 = vcombine.high %v3846_v12, %v3862_v30  ;;  %v3886_v1 = vcombine.low %v3853_v13, %v3869_v32  ;;  %v3887_v21 = vcombine.high %v3853_v13, %v3869_v32 }
 0x822   : > { %v8843_v2 = vrot.slane %v3526_v16, %v8270_v31  ;;  %v8846_v5 = vrot.slane %v7289_v39, %v8270_v31  ;;  %v8849_v8 = vrot.slane %v3542_v41, %v8270_v31  ;;  %v8852_v20 = vrot.slane %v7290_v15, %v8270_v31 }
 0x823   : > { %v3878_v59 = vrot.slane %v3870_v43, %v8286_v42  ;;  %v3885_v25 = vrot.slane %v3871_v23, %v8286_v42  ;;  %v3894_v49 = vrot.slane %v3886_v1, %v8286_v42  ;;  %v3901_v7 = vrot.slane %v3887_v21, %v8286_v42  ;;  %v3387_v33 = vpop.permute.xlu0 %3386  ;;  %v3381_v41 = vpop.permute.xlu1 %3380 }
 0x824   : > { %v3558_v61 = vcombine.low %v8843_v2, %v8846_v5  ;;  %v3922_v24 = vcombine.low %v8808_v36, %v8854_v19  ;;  %v3923_v50 = vcombine.high %v8808_v36, %v8854_v19  ;;  %v3474_v57 = vcombine.low %v3375_v38, %v3387_v33 }
 0x825   : > { %v4110_v26 = vcombine.low %v3878_v59, %v3885_v25  ;;  %v7297_v12 = vcombine.high %v3878_v59, %v3885_v25  ;;  %v4126_v13 = vcombine.low %v3894_v49, %v3901_v7  ;;  %v7298_v14 = vcombine.high %v3894_v49, %v3901_v7 }
 0x826   : > { %v3475_v6 = vcombine.high %v3375_v38, %v3387_v33  ;;  %v3559_v29 = vcombine.high %v8843_v2, %v8846_v5  ;;  %v3574_v30 = vcombine.low %v8849_v8, %v8852_v20  ;;  %v3575_v18 = vcombine.high %v8849_v8, %v8852_v20 }
 0x827   : > { %v8873_v32 = vrot.slane %v4110_v26, %v8270_v31  ;;  %v8876_v34 = vrot.slane %v7297_v12, %v8270_v31  ;;  %v8881_v16 = vrot.slane %v4126_v13, %v8270_v31  ;;  %v3930_v38 = vrot.slane %v3922_v24, %v8270_v31 }
 0x828   : > { %v3937_v39 = vrot.slane %v3923_v50, %v8270_v31  ;;  %v8886_v15 = vrot.slane %v7298_v14, %v8270_v31  ;;  %v3482_v23 = vrot.slane %v3474_v57, %v8270_v31  ;;  %v3489_v1 = vrot.slane %v3475_v6, %v8270_v31 }
 0x829   : > { %v4142_v43 = vcombine.low %v8873_v32, %v8876_v34  ;;  %v3938_v21 = vcombine.low %v3914_v9, %v3930_v38  ;;  %v3939_v2 = vcombine.high %v3914_v9, %v3930_v38  ;;  %v3458_v20 = vcombine.low %v8794_v44, %v3381_v41 }
 0x82a   : > { %v3954_v5 = vcombine.low %v3921_v10, %v3937_v39  ;;  %v3955_v8 = vcombine.high %v3921_v10, %v3937_v39  ;;  %v3459_v59 = vcombine.high %v8794_v44, %v3381_v41  ;;  %v3566_v25 = vrot.slane %v3558_v61, %v8286_v42 }
 0x82b   : > { %v3582_v49 = vrot.slane %v3574_v30, %v8286_v42  ;;  %v3946_v7 = vrot.slane %v3938_v21, %v8286_v42  ;;  %v3953_v33 = vrot.slane %v3939_v2, %v8286_v42  ;;  %v3466_v9 = vrot.slane %v3458_v20, %v8270_v31 }
 0x82c   : > { %v3962_v26 = vrot.slane %v3954_v5, %v8286_v42  ;;  %v3969_v12 = vrot.slane %v3955_v8, %v8286_v42  ;;  %v3473_v10 = vrot.slane %v3459_v59, %v8270_v31  ;;  %v4158_v20 = vcombine.low %v8881_v16, %v8886_v15 }
 0x82d   : > { %v3590_v13 = vcombine.low %v3566_v25, %v3582_v49  ;;  %v3591_v14 = vcombine.high %v3566_v25, %v3582_v49  ;;  %v4178_v24 = vcombine.low %v3946_v7, %v3953_v33  ;;  %v7299_v44 = vcombine.high %v3946_v7, %v3953_v33 }
 0x82e   : > { %v4194_v50 = vcombine.low %v3962_v26, %v3969_v12  ;;  %v7300_v61 = vcombine.high %v3962_v26, %v3969_v12  ;;  %v3490_v57 = vcombine.low %v3466_v9, %v3482_v23  ;;  %v3491_v6 = vcombine.high %v3466_v9, %v3482_v23 }
 0x82f   : > { %v3506_v30 = vcombine.low %v3473_v10, %v3489_v1  ;;  %v3507_v38 = vcombine.high %v3473_v10, %v3489_v1  ;;  %7598 = vmatmul.mubr.msk.f32.vlgmr.msra.gmra.mrb[20].mxu0 %vm1523_vm3, %v3590_v13  ;;  %v4185_v39 = vrot.slane %v4178_v24, %v8270_v31  ;;  %v4193_v41 = vrot.slane %v7299_v44, %v8270_v31 }
 0x830   : > { %v4201_v21 = vrot.slane %v4194_v50, %v8270_v31  ;;  %v4209_v2 = vrot.slane %v7300_v61, %v8270_v31  ;;  %7605 = vmatmul.mubr.msk.f32.vlgmr.msra.gmra.mrb[20].mxu1 %vm1523_vm3, %v3591_v14  ;;  %v3498_v5 = vrot.slane %v3490_v57, %v8286_v42  ;;  %v3505_v8 = vrot.slane %v3491_v6, %v8286_v42 }
 0x831   : > { %v3514_v23 = vrot.slane %v3506_v30, %v8286_v42  ;;  %v3521_v1 = vrot.slane %v3507_v38, %v8286_v42  ;;  %7770 = vmatpush3.bf16.xpose.msk.msra.mxu0 %vm8765_vm7, %v8779_v17  ;;  %v4210_v59 = vcombine.low %v4185_v39, %v4193_v41  ;;  %7774 = vmatpush3.bf16.xpose.msk.msra.mxu1 %vm8765_vm7, %v8781_v40 }
 0x832   : > { %v3594_v25 = vcombine.low %v3498_v5, %v3505_v8  ;;  %v7291_v49 = vcombine.high %v3498_v5, %v3505_v8  ;;  %7611 = vmatprep.mubr.msk.f32.mxu0 %vm8100_vm2, %v8098_v22  ;;  %v4226_v26 = vcombine.low %v4201_v21, %v4209_v2  ;;  %7618 = vmatprep.mubr.msk.f32.mxu1 %vm8100_vm2, %v8098_v22 }
 0x833   : > { %v3610_v7 = vcombine.low %v3514_v23, %v3521_v1  ;;  %v7292_v33 = vcombine.high %v3514_v23, %v3521_v1  ;;  %v3573_v17 = vrot.slane %v3559_v29, %v8286_v42  ;;  %v3589_v12 = vrot.slane %v3575_v18, %v8286_v42  ;;  %7775 = vmatprep.subr.bf16.mxu0 %v8108_v27 }
 0x834   : > { %7779 = vmatprep.subr.bf16.mxu1 %v8108_v27  ;;  %v4150_v40 = vrot.slane %v4142_v43, %v8286_v42  ;;  %v3601_v9 = vrot.slane %v3594_v25, %v8270_v31  ;;  %v4166_v13 = vrot.slane %v4158_v20, %v8286_v42  ;;  %v4218_v14 = vrot.slane %v4210_v59, %v8286_v42 }
 0x835   : > { %v3592_v10 = vcombine.low %v3573_v17, %v3589_v12  ;;  %v3609_v24 = vrot.slane %v7291_v49, %v8270_v31  ;;  %v3617_v44 = vrot.slane %v3610_v7, %v8270_v31  ;;  %v3625_v29 = vrot.slane %v7292_v33, %v8270_v31 }
 0x836   : > { %v3593_v18 = vcombine.high %v3573_v17, %v3589_v12  ;;  %v4211_v50 = vcombine.high %v4185_v39, %v4193_v41  ;;  %v4227_v61 = vcombine.high %v4201_v21, %v4209_v2  ;;  %v4234_v43 = vrot.slane %v4226_v26, %v8286_v42 }
 0x837   : > { %v4143_v57 = vcombine.high %v8873_v32, %v8876_v34  ;;  %v4159_v6 = vcombine.high %v8881_v16, %v8886_v15  ;;  %v4174_v30 = vcombine.low %v4150_v40, %v4166_v13  ;;  %v4175_v5 = vcombine.high %v4150_v40, %v4166_v13 }
 0x838   : > { %7612 = vmatmul.mubr.msk.f32.vlgmr.msra.gmra.mrb[22].mxu0 %vm1523_vm3, %v3592_v10  ;;  %7619 = vmatmul.mubr.msk.f32.vlgmr.msra.gmra.mrb[22].mxu1 %vm1523_vm3, %v3593_v18  ;;  %v4242_v38 = vcombine.low %v4218_v14, %v4234_v43  ;;  %v4243_v39 = vcombine.high %v4218_v14, %v4234_v43  ;;  %v3626_v41 = vcombine.low %v3601_v9, %v3609_v24 }
 0x839   : > { %7625 = vmatprep.mubr.msk.f32.mxu0 %vm8100_vm2, %v8098_v22  ;;  %7632 = vmatprep.mubr.msk.f32.mxu1 %vm8100_vm2, %v8098_v22  ;;  %v3642_v21 = vcombine.low %v3617_v44, %v3625_v29  ;;  %v4225_v32 = vrot.slane %v4211_v50, %v8286_v42  ;;  %v4241_v34 = vrot.slane %v4227_v61, %v8286_v42 }
 0x83a   : > { %v7776_v2 = vpack.c.bf16 %v4242_v38, %v4174_v30  ;;  %v7780_v8 = vpack.c.bf16 %v4243_v39, %v4175_v5  ;;  %v4157_v16 = vrot.slane %v4143_v57, %v8286_v42  ;;  %v4173_v15 = vrot.slane %v4159_v6, %v8286_v42 }
 0x83b   : > { %v3634_v23 = vrot.slane %v3626_v41, %v8286_v42  ;;  %v3650_v1 = vrot.slane %v3642_v21, %v8286_v42  ;;  %v4244_v20 = vcombine.low %v4225_v32, %v4241_v34  ;;  %v4245_v59 = vcombine.high %v4225_v32, %v4241_v34 }
 0x83c   : > { %7778 = vmatpush3.bf16.xpose.msk.msra.mxu0 %vm8765_vm7, %v7776_v2  ;;  %7782 = vmatpush3.bf16.xpose.msk.msra.mxu1 %vm8765_vm7, %v7780_v8  ;;  %v4176_v25 = vcombine.low %v4157_v16, %v4173_v15  ;;  %v4177_v49 = vcombine.high %v4157_v16, %v4173_v15  ;;  %v3627_v7 = vcombine.high %v3601_v9, %v3609_v24 }
 0x83d   : > { %7783 = vmatprep.subr.bf16.mxu0 %v8108_v27  ;;  %7787 = vmatprep.subr.bf16.mxu1 %v8108_v27  ;;  %v3643_v33 = vcombine.high %v3617_v44, %v3625_v29  ;;  %v3658_v26 = vcombine.low %v3634_v23, %v3650_v1  ;;  %v3659_v17 = vcombine.high %v3634_v23, %v3650_v1 }
 0x83e   : > { %v7784_v12 = vpack.c.bf16 %v4244_v20, %v4176_v25  ;;  %v7788_v40 = vpack.c.bf16 %v4245_v59, %v4177_v49  ;;  %v3641_v9 = vrot.slane %v3627_v7, %v8286_v42 }
 0x83f   : > { %v3657_v10 = vrot.slane %v3643_v33, %v8286_v42 }
 0x841   : > { %v3660_v13 = vcombine.low %v3641_v9, %v3657_v10  ;;  %v3661_v14 = vcombine.high %v3641_v9, %v3657_v10 }
 0x843   : > { %7626 = vmatmul.mubr.msk.f32.vlgmr.msra.gmra.mrb[24].mxu0 %vm1523_vm3, %v3658_v26  ;;  %7633 = vmatmul.mubr.msk.f32.vlgmr.msra.gmra.mrb[24].mxu1 %vm1523_vm3, %v3659_v17 }
 0x844   : > { %7786 = vmatpush3.bf16.xpose.msk.msra.mxu0 %vm8765_vm7, %v7784_v12  ;;  %7790 = vmatpush3.bf16.xpose.msk.msra.mxu1 %vm8765_vm7, %v7788_v40 }
 0x845   : > { %7639 = vmatprep.mubr.msk.f32.mxu0 %vm8100_vm2, %v8098_v22  ;;  %7646 = vmatprep.mubr.msk.f32.mxu1 %vm8100_vm2, %v8098_v22 }
 0x846   : > { %7791 = vmatprep.subr.bf16.mxu0 %v8108_v27  ;;  %7794 = vmatprep.subr.bf16.mxu1 %v8108_v27 }
 0x84b   : > { %7640 = vmatmul.mubr.msk.f32.vlgmr.msra.gmra.mrb[26].mxu0 %vm1523_vm3, %v3660_v13  ;;  %7647 = vmatmul.mubr.msk.f32.vlgmr.msra.gmra.mrb[26].mxu1 %vm1523_vm3, %v3661_v14 }
 0x84c   : > { %7653 = vmatprep.mubr.msk.f32.mxu0 %vm8100_vm2, %v8098_v22  ;;  %7660 = vmatprep.mubr.msk.f32.mxu1 %vm8100_vm2, %v8098_v22 }
 0x902   : > { %v4913_v28 = vpop.f32.mrb[20].mxu0 }
 0x903   : > { %v8978_v24 = vmul.f32 0.35355338, %v4913_v28  ;;  %v4992_v44 = vpop.f32.mrb[20].mxu1  ;;  %v7599_v29 = vpop.f32.mrb[21].mxu0 }
 0x904   : > { %v8980_v18 = vmul.f32 0.35355338, %v4992_v44  ;;  %v7606_v50 = vpop.f32.mrb[21].mxu1 }
 0x905   : > { %v5478_v61 = vsel %vm3118_vm5, %v8978_v24, -inf }
 0x906   : > { %v5481_v43 = vsel %vm3118_vm5, %v8980_v18, -inf  ;;  %5479 = vmax.xlane.f32.xlu1 %v5478_v61 }
 0x907   : > { %5482 = vmax.xlane.f32.xlu0 %v5481_v43 }
 0x90b   : > { %v5071_v57 = vpop.f32.mrb[22].mxu0  ;;  %v5150_v30 = vpop.f32.mrb[22].mxu1 }
 0x90c   : > { %v8986_v6 = vmul.f32 0.35355338, %v5071_v57  ;;  %v7613_v38 = vpop.f32.mrb[23].mxu0  ;;  %v8988_v5 = vmul.f32 0.35355338, %v5150_v30  ;;  %v7620_v39 = vpop.f32.mrb[23].mxu1 }
 0x90e   : > { %v5484_v41 = vsel %vm3118_vm5, %v8986_v6, -inf  ;;  %v5487_v21 = vsel %vm3118_vm5, %v8988_v5, -inf }
 0x90f   : > { %5485 = vmax.xlane.f32.xlu0 %v5484_v41  ;;  %5488 = vmax.xlane.f32.xlu1 %v5487_v21 }
 0x916   : > { %v5229_v2 = vpop.f32.mrb[24].mxu0  ;;  %v5308_v8 = vpop.f32.mrb[24].mxu1 }
 0x917   : > { %v8994_v32 = vmul.f32 0.35355338, %v5229_v2  ;;  %v8996_v34 = vmul.f32 0.35355338, %v5308_v8  ;;  %v7627_v16 = vpop.f32.mrb[25].mxu0  ;;  %v7634_v15 = vpop.f32.mrb[25].mxu1 }
 0x919   : > { %v5493_v23 = vsel %vm3118_vm5, %v8996_v34, -inf  ;;  %v5490_v1 = vsel %vm3118_vm5, %v8994_v32, -inf }
 0x91a   : > { %5494 = vmax.xlane.f32.xlu1 %v5493_v23  ;;  %5491 = vmax.xlane.f32.xlu0 %v5490_v1 }
 0x91e   : > { %v5387_v20 = vpop.f32.mrb[26].mxu0  ;;  %v5466_v59 = vpop.f32.mrb[26].mxu1 }
 0x91f   : > { %v9002_v25 = vmul.f32 0.35355338, %v5387_v20  ;;  %v9004_v49 = vmul.f32 0.35355338, %v5466_v59  ;;  %v7641_v7 = vpop.f32.mrb[27].mxu0  ;;  %v7648_v33 = vpop.f32.mrb[27].mxu1 }
 0x921   : > { %v5499_v26 = vsel %vm3118_vm5, %v9004_v49, -inf  ;;  %v5496_v17 = vsel %vm3118_vm5, %v9002_v25, -inf }
 0x922   : > { %5500 = vmax.xlane.f32.xlu1 %v5499_v26  ;;  %5497 = vmax.xlane.f32.xlu0 %v5496_v17 }
 0x933   : > { %4254 = vrot.lane.b32.xlu1 %v8697_v46, %s8097_s30  ;;  %v9038_v46 = vpop.permute.xlu1 %4248 }
 0x937   : > { %4262 = vrot.lane.b32.xlu1 %v8701_v53, %s8097_s30 }
 0x938   : > { %4256 = vrot.lane.b32.xlu0 %v8699_v51, %s8097_s30  ;;  %v9040_v51 = vpop.permute.xlu0 %4246 }
 0x93b   : > { %4270 = vrot.lane.b32.xlu1 %v8715_v55, %s8097_s30 }
 0x93c   : > { %4264 = vrot.lane.b32.xlu0 %v8703_v54, %s8097_s30 }
 0x93f   : > { %4252 = vrot.lane.b32.xlu1 %v8718_v56, %s8097_s30 }
 0x940   : > { %4272 = vrot.lane.b32.xlu0 %v8724_v58, %s8097_s30 }
 0x943   : > { %4258 = vrot.lane.b32.xlu1 %v8810_v47, %s8097_s30 }
 0x944   : > { %4250 = vrot.lane.b32.xlu0 %v8727_v37, %s8097_s30 }
 0x947   : > { %4266 = vrot.lane.b32.xlu1 %v8812_v3, %s8097_s30 }
 0x948   : > { %4260 = vrot.lane.b32.xlu0 %v8808_v36, %s8097_s30 }
 0x94b   : > { %4274 = vrot.lane.b32.xlu1 %v8822_v52, %s8097_s30 }
 0x94c   : > { %4268 = vrot.lane.b32.xlu0 %v8824_v11, %s8097_s30 }
 0x950   : > { %4276 = vrot.lane.b32.xlu0 %v8854_v19, %s8097_s30 }
 0x993   : > { %v5480_v53 = vpop.xlane.xlu1 %5479 }
 0x994   : > { %v5483_v54 = vpop.xlane.xlu0 %5482  ;;  %v5502_v55 = vsub.f32 %v8978_v24, %v5480_v53 }
 0x995   : > { %v5503_v56 = vsub.f32 %v8980_v18, %v5483_v54 }
 0x996   : > { %v5510_v58 = vmul.f32 1.442695, %v5502_v55 }
 0x997   : > { %v5512_v37 = vmul.f32 1.442695, %v5503_v56 }
 0x998   : > { %7957 = vpow2.f32 %v5510_v58 }
 0x999   : > { %7959 = vpow2.f32 %v5512_v37 }
 0x99c   : > { %v5486_v36 = vpop.xlane.xlu0 %5485  ;;  %v5489_v3 = vpop.xlane.xlu1 %5488 }
 0x99d   : > { %v5504_v47 = vsub.f32 %v8986_v6, %v5486_v36  ;;  %v5505_v52 = vsub.f32 %v8988_v5, %v5489_v3 }
 0x99f   : > { %v5514_v11 = vmul.f32 1.442695, %v5504_v47  ;;  %v5516_v19 = vmul.f32 1.442695, %v5505_v52 }
 0x9a1   : > { %7961 = vpow2.f32 %v5514_v11 }
 0x9a2   : > { %v9046_v12 = vpop.eup %7957  ;;  %7963 = vpow2.f32 %v5516_v19 }
 0x9a3   : > { %v9048_v40 = vpop.eup %7959  ;;  %v5526_v9 = vsel %vm3118_vm5, %v9046_v12, 0.0 }
 0x9a4   : > { %v5529_v10 = vsel %vm3118_vm5, %v9048_v40, 0.0  ;;  %5527 = vadd.xlane.f32.xlu0 %v5526_v9 }
 0x9a5   : > { %5530 = vadd.xlane.f32.xlu1 %v5529_v10 }
 0x9a7   : > { %v5492_v13 = vpop.xlane.xlu0 %5491  ;;  %v5495_v14 = vpop.xlane.xlu1 %5494 }
 0x9a8   : > { %v5506_v28 = vsub.f32 %v8994_v32, %v5492_v13  ;;  %v5507_v44 = vsub.f32 %v8996_v34, %v5495_v14 }
 0x9aa   : > { %v5518_v61 = vmul.f32 1.442695, %v5506_v28  ;;  %v5520_v43 = vmul.f32 1.442695, %v5507_v44 }
 0x9ab   : > { %v9056_v29 = vpop.eup %7961 }
 0x9ac   : > { %v9058_v50 = vpop.eup %7963  ;;  %v5532_v57 = vsel %vm3118_vm5, %v9056_v29, 0.0  ;;  %7965 = vpow2.f32 %v5518_v61 }
 0x9ad   : > { %5533 = vadd.xlane.f32.xlu1 %v5532_v57  ;;  %v5535_v30 = vsel %vm3118_vm5, %v9058_v50, 0.0  ;;  %7967 = vpow2.f32 %v5520_v43 }
 0x9ae   : > { %5536 = vadd.xlane.f32.xlu0 %v5535_v30 }
 0x9af   : > { %v5498_v38 = vpop.xlane.xlu0 %5497  ;;  %v5501_v39 = vpop.xlane.xlu1 %5500 }
 0x9b0   : > { %v5508_v41 = vsub.f32 %v9002_v25, %v5498_v38  ;;  %v5509_v2 = vsub.f32 %v9004_v49, %v5501_v39 }
 0x9b2   : > { %v5522_v21 = vmul.f32 1.442695, %v5508_v41  ;;  %v5524_v1 = vmul.f32 1.442695, %v5509_v2 }
 0x9b3   : > { %v4257_v8 = vpop.permute.xlu0 %4256  ;;  %v4255_v16 = vpop.permute.xlu1 %4254 }
 0x9b4   : > { %7969 = vpow2.f32 %v5522_v21 }
 0x9b5   : > { %7971 = vpow2.f32 %v5524_v1 }
 0x9b6   : > { %v9066_v15 = vpop.eup %7965 }
 0x9b7   : > { %v9068_v23 = vpop.eup %7967  ;;  %v4265_v20 = vpop.permute.xlu0 %4264  ;;  %v5538_v7 = vsel %vm3118_vm5, %v9066_v15, 0.0 }
 0x9b8   : > { %v4263_v59 = vpop.permute.xlu1 %4262  ;;  %5539 = vadd.xlane.f32.xlu0 %v5538_v7  ;;  %v4362_v33 = vcombine.low %v9038_v46, %v4265_v20  ;;  %v4363_v26 = vcombine.high %v9038_v46, %v4265_v20  ;;  %v5541_v17 = vsel %vm3118_vm5, %v9068_v23, 0.0 }
 0x9b9   : > { %5542 = vadd.xlane.f32.xlu1 %v5541_v17  ;;  %v4294_v53 = vcombine.low %v9040_v51, %v4263_v59  ;;  %v4295_v54 = vcombine.high %v9040_v51, %v4263_v59 }
 0x9ba   : > { %v4370_v3 = vrot.slane %v4362_v33, %v8270_v31  ;;  %v4377_v52 = vrot.slane %v4363_v26, %v8270_v31 }
 0x9bb   : > { %v4273_v55 = vpop.permute.xlu0 %4272  ;;  %v4302_v10 = vrot.slane %v4294_v53, %v8270_v31  ;;  %v4309_v13 = vrot.slane %v4295_v54, %v8270_v31 }
 0x9bc   : > { %v4271_v56 = vpop.permute.xlu1 %4270  ;;  %v4378_v58 = vcombine.low %v4257_v8, %v4273_v55  ;;  %v4379_v37 = vcombine.high %v4257_v8, %v4273_v55 }
 0x9bd   : > { %v4310_v36 = vcombine.low %v4255_v16, %v4271_v56  ;;  %v4311_v47 = vcombine.high %v4255_v16, %v4271_v56 }
 0x9be   : > { %v9080_v46 = vpop.eup %7969  ;;  %v4386_v11 = vrot.slane %v4378_v58, %v8270_v31  ;;  %v4393_v19 = vrot.slane %v4379_v37, %v8270_v31 }
 0x9bf   : > { %v4318_v9 = vrot.slane %v4310_v36, %v8270_v31  ;;  %v4325_v51 = vrot.slane %v4311_v47, %v8270_v31  ;;  %v5544_v14 = vsel %vm3118_vm5, %v9080_v46, 0.0  ;;  %v9098_v53 = vpop.eup %7971 }
 0x9c0   : > { %v4394_v28 = vcombine.low %v4370_v3, %v4386_v11  ;;  %v4395_v44 = vcombine.high %v4370_v3, %v4386_v11  ;;  %v4410_v61 = vcombine.low %v4377_v52, %v4393_v19  ;;  %v4411_v43 = vcombine.high %v4377_v52, %v4393_v19  ;;  %5545 = vadd.xlane.f32.xlu1 %v5544_v14 }
 0x9c1   : > { %v4326_v57 = vcombine.low %v4302_v10, %v4318_v9  ;;  %v4327_v30 = vcombine.high %v4302_v10, %v4318_v9  ;;  %v4342_v38 = vcombine.low %v4309_v13, %v4325_v51  ;;  %v4343_v39 = vcombine.high %v4309_v13, %v4325_v51 }
 0x9c2   : > { %v4402_v41 = vrot.slane %v4394_v28, %v8286_v42  ;;  %v4409_v21 = vrot.slane %v4395_v44, %v8286_v42  ;;  %v4418_v2 = vrot.slane %v4410_v61, %v8286_v42  ;;  %v4425_v8 = vrot.slane %v4411_v43, %v8286_v42 }
 0x9c3   : > { %v4334_v16 = vrot.slane %v4326_v57, %v8286_v42  ;;  %v4341_v1 = vrot.slane %v4327_v30, %v8286_v42  ;;  %v4350_v20 = vrot.slane %v4342_v38, %v8286_v42  ;;  %v4357_v59 = vrot.slane %v4343_v39, %v8286_v42 }
 0x9c4   : > { %v4634_v7 = vcombine.low %v4402_v41, %v4409_v21  ;;  %v7303_v33 = vcombine.high %v4402_v41, %v4409_v21  ;;  %v4650_v26 = vcombine.low %v4418_v2, %v4425_v8  ;;  %v7304_v17 = vcombine.high %v4418_v2, %v4425_v8 }
 0x9c5   : > { %v4566_v54 = vcombine.low %v4334_v16, %v4341_v1  ;;  %v7301_v55 = vcombine.high %v4334_v16, %v4341_v1  ;;  %v4582_v56 = vcombine.low %v4350_v20, %v4357_v59  ;;  %v7302_v58 = vcombine.high %v4350_v20, %v4357_v59 }
 0x9c6   : > { %v4641_v37 = vrot.slane %v4634_v7, %v8270_v31  ;;  %v4649_v36 = vrot.slane %v7303_v33, %v8270_v31  ;;  %v4657_v47 = vrot.slane %v4650_v26, %v8270_v31  ;;  %v4665_v3 = vrot.slane %v7304_v17, %v8270_v31 }
 0x9c7   : > { %v4573_v52 = vrot.slane %v4566_v54, %v8270_v31  ;;  %v4581_v11 = vrot.slane %v7301_v55, %v8270_v31  ;;  %v4589_v19 = vrot.slane %v4582_v56, %v8270_v31  ;;  %v4597_v9 = vrot.slane %v7302_v58, %v8270_v31 }
 0x9c8   : > { %v5547_v51 = vsel %vm3118_vm5, %v9098_v53, 0.0  ;;  %v4666_v14 = vcombine.low %v4641_v37, %v4649_v36  ;;  %v4682_v28 = vcombine.low %v4657_v47, %v4665_v3  ;;  %v4667_v59 = vcombine.high %v4641_v37, %v4649_v36  ;;  %v4251_v37 = vpop.permute.xlu0 %4250  ;;  %v4253_v36 = vpop.permute.xlu1 %4252 }
 0x9c9   : > { %5548 = vadd.xlane.f32.xlu0 %v5547_v51  ;;  %v4598_v10 = vcombine.low %v4573_v52, %v4581_v11  ;;  %v4614_v13 = vcombine.low %v4589_v19, %v4597_v9  ;;  %v4599_v44 = vcombine.high %v4573_v52, %v4581_v11  ;;  %v4615_v61 = vcombine.high %v4589_v19, %v4597_v9 }
 0x9ca   : > { %v4674_v30 = vrot.slane %v4666_v14, %v8286_v42  ;;  %v4690_v38 = vrot.slane %v4682_v28, %v8286_v42  ;;  %v4683_v7 = vcombine.high %v4657_v47, %v4665_v3  ;;  %v4681_v26 = vrot.slane %v4667_v59, %v8286_v42 }
 0x9cb   : > { %v4606_v43 = vrot.slane %v4598_v10, %v8286_v42  ;;  %v4622_v57 = vrot.slane %v4614_v13, %v8286_v42  ;;  %v4613_v8 = vrot.slane %v4599_v44, %v8286_v42  ;;  %v4629_v20 = vrot.slane %v4615_v61, %v8286_v42 }
 0x9cc   : > { %v4698_v41 = vcombine.low %v4674_v30, %v4690_v38  ;;  %v4699_v2 = vcombine.high %v4674_v30, %v4690_v38  ;;  %v4697_v54 = vrot.slane %v4683_v7, %v8286_v42  ;;  %v4261_v47 = vpop.permute.xlu0 %4260  ;;  %v4259_v3 = vpop.permute.xlu1 %4258 }
 0x9cd   : > { %v4630_v39 = vcombine.low %v4606_v43, %v4622_v57  ;;  %v4631_v21 = vcombine.high %v4606_v43, %v4622_v57  ;;  %v4632_v33 = vcombine.low %v4613_v8, %v4629_v20  ;;  %v4633_v17 = vcombine.high %v4613_v8, %v4629_v20 }
 0x9ce   : > { %v4700_v55 = vcombine.low %v4681_v26, %v4697_v54  ;;  %v4701_v56 = vcombine.high %v4681_v26, %v4697_v54 }
 0x9cf   : > { %v7792_v16 = vpack.c.bf16 %v4698_v41, %v4630_v39  ;;  %v7795_v1 = vpack.c.bf16 %v4699_v2, %v4631_v21 }
 0x9d0   : > { %v9120_v58 = vpack.c.bf16 %v4700_v55, %v4632_v33  ;;  %v9122_v52 = vpack.c.bf16 %v4701_v56, %v4633_v17  ;;  %v4269_v11 = vpop.permute.xlu0 %4268  ;;  %v4267_v19 = vpop.permute.xlu1 %4266 }
 0x9d1   : > { %7793 = vmatpush3.bf16.msra.mxu0 %v7792_v16  ;;  %7796 = vmatpush3.bf16.msra.mxu1 %v7795_v1  ;;  %v4498_v28 = vcombine.low %v4253_v36, %v4269_v11  ;;  %v4499_v61 = vcombine.high %v4253_v36, %v4269_v11  ;;  %v4430_v43 = vcombine.low %v4251_v37, %v4267_v19 }
 0x9d2   : > { %7797 = vmatprep.subr.bf16.mxu0 %v8108_v27  ;;  %7800 = vmatprep.subr.bf16.mxu1 %v8108_v27  ;;  %v4431_v57 = vcombine.high %v4251_v37, %v4267_v19 }
 0x9d3   : > { %v4506_v41 = vrot.slane %v4498_v28, %v8270_v31  ;;  %v4513_v2 = vrot.slane %v4499_v61, %v8270_v31  ;;  %v4438_v8 = vrot.slane %v4430_v43, %v8270_v31 }
 0x9d4   : > { %v4277_v9 = vpop.permute.xlu0 %4276  ;;  %v4275_v51 = vpop.permute.xlu1 %4274  ;;  %v4445_v16 = vrot.slane %v4431_v57, %v8270_v31 }
 0x9d5   : > { %v4514_v10 = vcombine.low %v4261_v47, %v4277_v9  ;;  %v4515_v13 = vcombine.high %v4261_v47, %v4277_v9  ;;  %v4446_v14 = vcombine.low %v4259_v3, %v4275_v51  ;;  %v4447_v44 = vcombine.high %v4259_v3, %v4275_v51 }
 0x9d7   : > { %v4522_v30 = vrot.slane %v4514_v10, %v8270_v31  ;;  %v4529_v38 = vrot.slane %v4515_v13, %v8270_v31  ;;  %v4454_v39 = vrot.slane %v4446_v14, %v8270_v31  ;;  %v4461_v21 = vrot.slane %v4447_v44, %v8270_v31 }
 0x9d9   : > { %v4530_v1 = vcombine.low %v4506_v41, %v4522_v30  ;;  %v4531_v20 = vcombine.high %v4506_v41, %v4522_v30  ;;  %v4546_v59 = vcombine.low %v4513_v2, %v4529_v38  ;;  %v4547_v7 = vcombine.high %v4513_v2, %v4529_v38 }
 0x9da   : > { %v4462_v33 = vcombine.low %v4438_v8, %v4454_v39  ;;  %v4463_v26 = vcombine.high %v4438_v8, %v4454_v39  ;;  %v4478_v17 = vcombine.low %v4445_v16, %v4461_v21  ;;  %v4479_v54 = vcombine.high %v4445_v16, %v4461_v21 }
 0x9db   : > { %v4538_v55 = vrot.slane %v4530_v1, %v8286_v42  ;;  %v4545_v56 = vrot.slane %v4531_v20, %v8286_v42  ;;  %v4554_v37 = vrot.slane %v4546_v59, %v8286_v42  ;;  %v4561_v36 = vrot.slane %v4547_v7, %v8286_v42 }
 0x9dc   : > { %v4470_v47 = vrot.slane %v4462_v33, %v8286_v42  ;;  %v4477_v3 = vrot.slane %v4463_v26, %v8286_v42  ;;  %v4486_v11 = vrot.slane %v4478_v17, %v8286_v42  ;;  %v4493_v19 = vrot.slane %v4479_v54, %v8286_v42 }
 0x9dd   : > { %v4770_v9 = vcombine.low %v4538_v55, %v4545_v56  ;;  %v7307_v51 = vcombine.high %v4538_v55, %v4545_v56  ;;  %v4786_v13 = vcombine.low %v4554_v37, %v4561_v36  ;;  %v7308_v61 = vcombine.high %v4554_v37, %v4561_v36 }
 0x9de   : > { %v4702_v14 = vcombine.low %v4470_v47, %v4477_v3  ;;  %v7305_v28 = vcombine.high %v4470_v47, %v4477_v3  ;;  %v4718_v43 = vcombine.low %v4486_v11, %v4493_v19  ;;  %v7306_v57 = vcombine.high %v4486_v11, %v4493_v19 }
 0x9df   : > { %v4777_v30 = vrot.slane %v4770_v9, %v8270_v31  ;;  %v4785_v38 = vrot.slane %v7307_v51, %v8270_v31  ;;  %v4793_v21 = vrot.slane %v4786_v13, %v8270_v31  ;;  %v4801_v2 = vrot.slane %v7308_v61, %v8270_v31 }
 0x9e0   : > { %v4709_v39 = vrot.slane %v4702_v14, %v8270_v31  ;;  %v4717_v41 = vrot.slane %v7305_v28, %v8270_v31  ;;  %v4725_v8 = vrot.slane %v4718_v43, %v8270_v31  ;;  %v4733_v16 = vrot.slane %v7306_v57, %v8270_v31 }
 0x9e1   : > { %v4802_v33 = vcombine.low %v4777_v30, %v4785_v38  ;;  %v4818_v26 = vcombine.low %v4793_v21, %v4801_v2  ;;  %v4803_v61 = vcombine.high %v4777_v30, %v4785_v38  ;;  %v4819_v43 = vcombine.high %v4793_v21, %v4801_v2 }
 0x9e2   : > { %v4734_v20 = vcombine.low %v4709_v39, %v4717_v41  ;;  %v4750_v7 = vcombine.low %v4725_v8, %v4733_v16  ;;  %v4735_v14 = vcombine.high %v4709_v39, %v4717_v41  ;;  %v4751_v28 = vcombine.high %v4725_v8, %v4733_v16 }
 0x9e3   : > { %v4810_v47 = vrot.slane %v4802_v33, %v8286_v42  ;;  %v4826_v3 = vrot.slane %v4818_v26, %v8286_v42  ;;  %v4817_v30 = vrot.slane %v4803_v61, %v8286_v42  ;;  %v4833_v38 = vrot.slane %v4819_v43, %v8286_v42 }
 0x9e4   : > { %v4742_v37 = vrot.slane %v4734_v20, %v8286_v42  ;;  %v4758_v36 = vrot.slane %v4750_v7, %v8286_v42 }
 0x9e5   : > { %v4835_v19 = vcombine.high %v4810_v47, %v4826_v3  ;;  %v4836_v21 = vcombine.low %v4817_v30, %v4833_v38  ;;  %v4837_v16 = vcombine.high %v4817_v30, %v4833_v38 }
 0x9e6   : > { %v4767_v11 = vcombine.high %v4742_v37, %v4758_v36 }
 0xa31   : > { %v5528_v10 = vpop.xlane.xlu0 %5527 }
 0xa32   : > { %7973 = vrcp.f32 %v5528_v10  ;;  %v5531_v44 = vpop.xlane.xlu1 %5530 }
 0xa33   : > { %7975 = vrcp.f32 %v5531_v44  ;;  %v7807_v44 = vpack.c.bf16 %v4835_v19, %v4767_v11 }
 0xa3a   : > { %v5534_v1 = vpop.xlane.xlu1 %5533 }
 0xa3b   : > { %v5537_v59 = vpop.xlane.xlu0 %5536  ;;  %7977 = vrcp.f32 %v5534_v1 }
 0xa3c   : > { %v7974_v17 = vpop.eup %7973  ;;  %7979 = vrcp.f32 %v5537_v59 }
 0xa3d   : > { %v7976_v54 = vpop.eup %7975  ;;  %v5551_v55 = vmul.f32 %v7974_v17, %v9046_v12  ;;  %v4766_v12 = vcombine.low %v4742_v37, %v4758_v36 }
 0xa3e   : > { %v5553_v56 = vmul.f32 %v7976_v54, %v9048_v40  ;;  %v4834_v40 = vcombine.low %v4810_v47, %v4826_v3 }
 0xa3f   : > { %7654 = vmatmul.mubr.msk.f32.vlgmr.msra.gmra.mrb[28].mxu0 %vm3118_vm5, %v5551_v55 }
 0xa40   : > { %7661 = vmatmul.mubr.msk.f32.vlgmr.msra.gmra.mrb[28].mxu1 %vm3118_vm5, %v5553_v56  ;;  %7799 = vmatpush3.bf16.msra.mxu0 %v9120_v58  ;;  %v7804_v13 = vpack.c.bf16 %v4834_v40, %v4766_v12 }
 0xa41   : > { %7802 = vmatpush3.bf16.msra.mxu1 %v9122_v52  ;;  %7667 = vmatprep.mubr.msk.f32.mxu0 %vm8100_vm2, %v8098_v22 }
 0xa42   : > { %7674 = vmatprep.mubr.msk.f32.mxu1 %vm8100_vm2, %v8098_v22  ;;  %7803 = vmatprep.subr.bf16.mxu0 %v8108_v27 }
 0xa43   : > { %7806 = vmatprep.subr.bf16.mxu1 %v8108_v27 }
 0xa45   : > { %v7978_v9 = vpop.eup %7977  ;;  %v5540_v10 = vpop.xlane.xlu0 %5539 }
 0xa46   : > { %v7980_v51 = vpop.eup %7979  ;;  %v5555_v58 = vmul.f32 %v7978_v9, %v9056_v29  ;;  %7981 = vrcp.f32 %v5540_v10  ;;  %v5543_v57 = vpop.xlane.xlu1 %5542  ;;  %v4749_v29 = vrot.slane %v4735_v14, %v8286_v42 }
 0xa47   : > { %v5557_v52 = vmul.f32 %v7980_v51, %v9058_v50  ;;  %7983 = vrcp.f32 %v5543_v57  ;;  %v4765_v50 = vrot.slane %v4751_v28, %v8286_v42 }
 0xa48   : > { %7668 = vmatmul.mubr.msk.f32.vlgmr.msra.gmra.mrb[30].mxu0 %vm3118_vm5, %v5555_v58 }
 0xa49   : > { %7675 = vmatmul.mubr.msk.f32.vlgmr.msra.gmra.mrb[30].mxu1 %vm3118_vm5, %v5557_v52  ;;  %7805 = vmatpush3.bf16.msra.mxu0 %v7804_v13  ;;  %v4768_v41 = vcombine.low %v4749_v29, %v4765_v50  ;;  %v4769_v8 = vcombine.high %v4749_v29, %v4765_v50 }
 0xa4a   : > { %7808 = vmatpush3.bf16.msra.mxu1 %v7807_v44  ;;  %7681 = vmatprep.mubr.msk.f32.mxu0 %vm8100_vm2, %v8098_v22 }
 0xa4b   : > { %7688 = vmatprep.mubr.msk.f32.mxu1 %vm8100_vm2, %v8098_v22  ;;  %7809 = vmatprep.subr.bf16.mxu0 %v8108_v27  ;;  %v7810_v59 = vpack.c.bf16 %v4836_v21, %v4768_v41  ;;  %v7813_v7 = vpack.c.bf16 %v4837_v16, %v4769_v8 }
 0xa4c   : > { %7812 = vmatprep.subr.bf16.mxu1 %v8108_v27 }
 0xa4d   : > { %v5546_v39 = vpop.xlane.xlu1 %5545 }
 0xa4e   : > { %7985 = vrcp.f32 %v5546_v39 }
 0xa50   : > { %v7982_v2 = vpop.eup %7981 }
 0xa51   : > { %v5559_v1 = vmul.f32 %v7982_v2, %v9066_v15  ;;  %v7984_v20 = vpop.eup %7983 }
 0xa52   : > { %v5561_v27 = vmul.f32 %v7984_v20, %v9068_v23 }
 0xa53   : > { %7682 = vmatmul.mubr.msk.f32.vlgmr.msra.gmra.mrb[32].mxu0 %vm3118_vm5, %v5559_v1 }
 0xa54   : > { %7811 = vmatpush3.bf16.msra.mxu0 %v7810_v59  ;;  %7695 = vmatprep.mubr.msk.f32.mxu0 %vm8100_vm2, %v8098_v22 }
 0xa55   : > { %7689 = vmatmul.mubr.msk.f32.vlgmr.msra.gmra.mrb[32].mxu1 %vm3118_vm5, %v5561_v27 }
 0xa56   : > { %v5549_v33 = vpop.xlane.xlu0 %5548  ;;  %7814 = vmatpush3.bf16.msra.mxu1 %v7813_v7  ;;  %7702 = vmatprep.mubr.msk.f32.mxu1 %vm8100_vm2, %v8098_v22 }
 0xa57   : > { %7987 = vrcp.f32 %v5549_v33 }
 0xa58   : > { %v7986_v15 = vpop.eup %7985 }
 0xa59   : > { %v5563_v26 = vmul.f32 %v7986_v15, %v9080_v46 }
 0xa5b   : > { %7696 = vmatmul.mubr.msk.f32.vlgmr.msra.gmra.mrb[34].mxu0 %vm3118_vm5, %v5563_v26 }
 0xa61   : > { %v7988_v23 = vpop.eup %7987 }
 0xa62   : > { %v5565_v17 = vmul.f32 %v7988_v23, %v9098_v53 }
 0xa64   : > { %7703 = vmatmul.mubr.msk.f32.vlgmr.msra.gmra.mrb[34].mxu1 %vm3118_vm5, %v5565_v17 }
 0xb12   : > { %v5635_v54 = vpop.f32.mrb[28].mxu0 }
 0xb13   : > { %v5708_v55 = vpop.f32.mrb[28].mxu1  ;;  %v7655_v56 = vpop.f32.mrb[29].mxu0 }
 0xb14   : > { %v7662_v37 = vpop.f32.mrb[29].mxu1 }
 0xb1b   : > { %v5781_v36 = vpop.f32.mrb[30].mxu0 }
 0xb1c   : > { %v6150_v47 = vcombine.low %v5635_v54, %v5781_v36  ;;  %v6151_v3 = vcombine.high %v5635_v54, %v5781_v36  ;;  %v5854_v12 = vpop.f32.mrb[30].mxu1  ;;  %v7669_v22 = vpop.f32.mrb[31].mxu0 }
 0xb1d   : > { %v6166_v40 = vcombine.low %v5708_v55, %v5854_v12  ;;  %v6167_v11 = vcombine.high %v5708_v55, %v5854_v12  ;;  %v7676_v19 = vpop.f32.mrb[31].mxu1 }
 0xb1e   : > { %v6158_v46 = vrot.slane %v6150_v47, %v8270_v31  ;;  %v6165_v9 = vrot.slane %v6151_v3, %v8270_v31 }
 0xb1f   : > { %v6174_v53 = vrot.slane %v6166_v40, %v8270_v31  ;;  %v6181_v51 = vrot.slane %v6167_v11, %v8270_v31 }
 0xb21   : > { %v6182_v58 = vcombine.low %v6158_v46, %v6174_v53  ;;  %v6183_v52 = vcombine.high %v6158_v46, %v6174_v53  ;;  %v6198_v10 = vcombine.low %v6165_v9, %v6181_v51  ;;  %v6199_v13 = vcombine.high %v6165_v9, %v6181_v51 }
 0xb23   : > { %v6190_v14 = vrot.slane %v6182_v58, %v8286_v42  ;;  %v6197_v28 = vrot.slane %v6183_v52, %v8286_v42  ;;  %v6206_v44 = vrot.slane %v6198_v10, %v8286_v42  ;;  %v6213_v61 = vrot.slane %v6199_v13, %v8286_v42 }
 0xb25   : > { %v6286_v43 = vcombine.low %v6190_v14, %v6197_v28  ;;  %v7341_v57 = vcombine.high %v6190_v14, %v6197_v28  ;;  %v6302_v29 = vcombine.low %v6206_v44, %v6213_v61  ;;  %v7342_v50 = vcombine.high %v6206_v44, %v6213_v61 }
 0xb26   : > { %v5927_v21 = vpop.f32.mrb[32].mxu0 }
 0xb27   : > { %v6293_v30 = vrot.slane %v6286_v43, %v8270_v31  ;;  %v6301_v38 = vrot.slane %v7341_v57, %v8270_v31  ;;  %v6309_v39 = vrot.slane %v6302_v29, %v8270_v31  ;;  %v6317_v41 = vrot.slane %v7342_v50, %v8270_v31  ;;  %v7683_v2 = vpop.f32.mrb[33].mxu0 }
 0xb28   : > { %v6000_v59 = vpop.f32.mrb[32].mxu1 }
 0xb29   : > { %v6319_v8 = vcombine.high %v6293_v30, %v6301_v38  ;;  %v6335_v16 = vcombine.high %v6309_v39, %v6317_v41  ;;  %v6318_v1 = vcombine.low %v6293_v30, %v6301_v38  ;;  %v6334_v20 = vcombine.low %v6309_v39, %v6317_v41  ;;  %v7690_v27 = vpop.f32.mrb[33].mxu1 }
 0xb2b   : > { %v6333_v7 = vrot.slane %v6319_v8, %v8286_v42  ;;  %v6349_v33 = vrot.slane %v6335_v16, %v8286_v42  ;;  %v6326_v15 = vrot.slane %v6318_v1, %v8286_v42  ;;  %v6342_v26 = vrot.slane %v6334_v20, %v8286_v42 }
 0xb2d   : > { %v6352_v23 = vcombine.low %v6333_v7, %v6349_v33  ;;  %v6351_v17 = vcombine.high %v6326_v15, %v6342_v26  ;;  %v6353_v54 = vcombine.high %v6333_v7, %v6349_v33  ;;  %v6350_v55 = vcombine.low %v6326_v15, %v6342_v26 }
 0xb2e   : > { %v6073_v56 = vpop.f32.mrb[34].mxu0 }
 0xb2f   : > { %6432 = vrot.lane.b32.xlu1 %v6352_v23, %s8105_s16  ;;  %6424 = vrot.lane.b32.xlu0 %v6351_v17, %s8104_s15  ;;  %v6218_v37 = vcombine.low %v5927_v21, %v6073_v56  ;;  %v6219_v36 = vcombine.high %v5927_v21, %v6073_v56  ;;  %v7697_v47 = vpop.f32.mrb[35].mxu0 }
 0xb31   : > { %v6226_v12 = vrot.slane %v6218_v37, %v8270_v31  ;;  %v6233_v22 = vrot.slane %v6219_v36, %v8270_v31 }
 0xb37   : > { %v6146_v3 = vpop.f32.mrb[34].mxu1 }
 0xb38   : > { %v6234_v40 = vcombine.low %v6000_v59, %v6146_v3  ;;  %v6235_v11 = vcombine.high %v6000_v59, %v6146_v3  ;;  %v7704_v19 = vpop.f32.mrb[35].mxu1 }
 0xb3a   : > { %v6242_v46 = vrot.slane %v6234_v40, %v8270_v31  ;;  %v6249_v9 = vrot.slane %v6235_v11, %v8270_v31 }
 0xb3c   : > { %v6250_v53 = vcombine.low %v6226_v12, %v6242_v46  ;;  %v6251_v51 = vcombine.high %v6226_v12, %v6242_v46  ;;  %v6266_v58 = vcombine.low %v6233_v22, %v6249_v9  ;;  %v6267_v52 = vcombine.high %v6233_v22, %v6249_v9 }
 0xb3e   : > { %v6258_v10 = vrot.slane %v6250_v53, %v8286_v42  ;;  %v6265_v13 = vrot.slane %v6251_v51, %v8286_v42  ;;  %v6274_v14 = vrot.slane %v6266_v58, %v8286_v42  ;;  %v6281_v28 = vrot.slane %v6267_v52, %v8286_v42 }
 0xb40   : > { %v6354_v44 = vcombine.low %v6258_v10, %v6265_v13  ;;  %v7343_v61 = vcombine.high %v6258_v10, %v6265_v13  ;;  %v6370_v43 = vcombine.low %v6274_v14, %v6281_v28  ;;  %v7344_v57 = vcombine.high %v6274_v14, %v6281_v28  ;;  %v7345_v14 = vld [vmem:[%s8196_s17 + $0x2] ss:$0 sm:$0xff] }
 0xb42   : > { %v6361_v29 = vrot.slane %v6354_v44, %v8270_v31  ;;  %v6369_v50 = vrot.slane %v7343_v61, %v8270_v31  ;;  %v6377_v30 = vrot.slane %v6370_v43, %v8270_v31  ;;  %v6385_v38 = vrot.slane %v7344_v57, %v8270_v31 }
 0xb44   : > { %v6387_v39 = vcombine.high %v6361_v29, %v6369_v50  ;;  %v6403_v41 = vcombine.high %v6377_v30, %v6385_v38  ;;  %v6386_v21 = vcombine.low %v6361_v29, %v6369_v50  ;;  %v6402_v2 = vcombine.low %v6377_v30, %v6385_v38 }
 0xb46   : > { %v6401_v8 = vrot.slane %v6387_v39, %v8286_v42  ;;  %v6417_v16 = vrot.slane %v6403_v41, %v8286_v42  ;;  %v6394_v1 = vrot.slane %v6386_v21, %v8286_v42  ;;  %v6410_v20 = vrot.slane %v6402_v2, %v8286_v42 }
 0xb48   : > { %v6420_v59 = vcombine.low %v6401_v8, %v6417_v16  ;;  %v6419_v27 = vcombine.high %v6394_v1, %v6410_v20  ;;  %v6421_v7 = vcombine.high %v6401_v8, %v6417_v16  ;;  %v6418_v33 = vcombine.low %v6394_v1, %v6410_v20 }
 0xb4a   : > { %6434 = vrot.lane.b32.xlu0 %v6420_v59, %s8105_s16  ;;  %6426 = vrot.lane.b32.xlu1 %v6419_v27, %s8104_s15  ;;  %v406_v59 = vld [vmem:[%s8191_s14] sm:$0xff]  ;;  %v407_v27 = vld [vmem:[%s8191_s14 + $0x8] sm:$0xff] }
 0xb4e   : > { %6442 = vrot.lane.b32.xlu0 %v6421_v7, %s8106_s18  ;;  %6440 = vrot.lane.b32.xlu1 %v6353_v54, %s8106_s18  ;;  %v7823_v7 = vpack.c.bf16 %v407_v27, %v406_v59 }
 0xb50   : > { %7824 = vmatprep.subr.bf16.mxu1 %v7823_v7 }
 0xb51   : > { %7826 = vmatpush3.bf16.msra.mxu1 %v7823_v7 }
 0xba1   : > { %v6425_v15 = vpop.permute.xlu0 %6424  ;;  %v6433_v26 = vpop.permute.xlu1 %6432 }
 0xba2   : > { %v6446_v56 = vsel %vm1523_vm3, %v6350_v55, %v6425_v15  ;;  %v409_v15 = vld [vmem:[%s8191_s14 + $0x18] sm:$0xff] }
 0xba3   : > { %v6448_v36 = vsel %vm3118_vm5, %v6446_v56, %v6433_v26  ;;  %v412_v56 = vld [vmem:[%s8191_s14 + $0x30] sm:$0xff] }
 0xbbc   : > { %v6435_v23 = vpop.permute.xlu0 %6434  ;;  %v6427_v17 = vpop.permute.xlu1 %6426 }
 0xbbd   : > { %v6447_v37 = vsel %vm1523_vm3, %v6418_v33, %v6427_v17  ;;  %v408_v33 = vld [vmem:[%s8191_s14 + $0x10] sm:$0xff]  ;;  %v411_v17 = vld [vmem:[%s8191_s14 + $0x28] sm:$0xff] }
 0xbbe   : > { %v6449_v3 = vsel %vm3118_vm5, %v6447_v37, %v6435_v23  ;;  %v7827_v26 = vpack.c.bf16 %v409_v15, %v408_v33  ;;  %v410_v23 = vld [vmem:[%s8191_s14 + $0x20] sm:$0xff]  ;;  %v8109_v15 = vmov -1.0  }
 0xbbf   : > { %v7831_v37 = vpack.c.bf16 %v411_v17, %v410_v23 }
 0xbc0   : > { %v6443_v47 = vpop.permute.xlu0 %6442  ;;  %v6441_v12 = vpop.permute.xlu1 %6440  ;;  %7828 = vmatprep.subr.bf16.mxu1 %v7827_v26 }
 0xbc1   : > { %v6451_v22 = vsel %vm3121_vm6, %v6449_v3, %v6443_v47  ;;  %v6450_v40 = vsel %vm3121_vm6, %v6448_v36, %v6441_v12  ;;  %7830 = vmatpush3.bf16.msra.mxu1 %v7827_v26  ;;  %v413_v36 = vld [vmem:[%s8191_s14 + $0x38] sm:$0xff]  ;;  %s8113_s14 = smov (!%p7351_p6), 16  }
 0xbc2   : > { %v6453_v54 = vadd.f32 %v6451_v22, %v8689_v45  ;;  %v6452_v11 = vadd.f32 %v6450_v40, %v8685_v35  ;;  %v7835_v47 = vpack.c.bf16 %v413_v36, %v412_v56  ;;  %7832 = vmatprep.subr.bf16.mxu1 %v7831_v37 }
 0xbc4   : > { %v6457_v19 = vsel %vm557_vm1, %v6453_v54, 0.0  ;;  %v6454_v55 = vsel %vm557_vm1, %v6452_v11, 0.0 }
 0xbc5   : > { %6458 = vadd.xlane.f32.xlu0 %v6457_v19  ;;  %6455 = vadd.xlane.f32.xlu1 %v6454_v55 }
 0xbc6   : > { %7834 = vmatpush3.bf16.msra.mxu1 %v7831_v37 }
 0xbc7   : > { %7836 = vmatprep.subr.bf16.mxu1 %v7835_v47 }
 0xbca   : > { %7838 = vmatpush3.bf16.msra.mxu1 %v7835_v47 }
 0xbd6   : > { %7917 = vrot.lane.b32.xlu1 %v7916_v4, %s8099_s8 }
 0xc52   : > { %v6459_v46 = vpop.xlane.xlu0 %6458  ;;  %v6456_v9 = vpop.xlane.xlu1 %6455 }
 0xc53   : > { %v6461_v53 = vmul.f32 0.03125, %v6459_v46  ;;  %v6460_v51 = vmul.f32 0.03125, %v6456_v9 }
 0xc55   : > { %v6463_v58 = vsub.f32 %v6453_v54, %v6461_v53  ;;  %v6462_v45 = vsub.f32 %v6452_v11, %v6460_v51 }
 0xc56   : > { %v7918_v62 = vpop.permute.xlu1 %7917 }
 0xc57   : > { %v6465_v52 = vmul.f32 %v6463_v58, %v6463_v58  ;;  %v6464_v35 = vmul.f32 %v6462_v45, %v6462_v45  ;;  %v7920_v57 = vunpack.i.h.bf16 %v7918_v62  ;;  %v7919_v50 = vunpack.i.l.bf16 %v7918_v62 }
 0xc59   : > { %v6469_v10 = vsel %vm557_vm1, %v6465_v52, 0.0  ;;  %v6466_v13 = vsel %vm557_vm1, %v6464_v35, 0.0  ;;  %v7819_v41 = vpack.c.bf16 %v7920_v57, %v7919_v50 }
 0xc5a   : > { %6470 = vadd.xlane.f32.xlu1 %v6469_v10  ;;  %6467 = vadd.xlane.f32.xlu0 %v6466_v13 }
 0xc6b   : > { %6488 = vrot.lane.b32.xlu1 %v7345_v14, %s8097_s30 }
 0xc70   : > { %7912 = vrot.lane.b32.xlu0 %v7911_v63, %s8099_s8 }
 0xc74   : > { %6509 = vrot.lane.b32.xlu0 %v7345_v14, %s8099_s8 }
 0xce7   : > { %v6468_v0 = vpop.xlane.xlu0 %6467  ;;  %v6471_v4 = vpop.xlane.xlu1 %6470 }
 0xce8   : > { %v6472_v28 = vmul.f32 0.03125, %v6468_v0  ;;  %v6473_v44 = vmul.f32 0.03125, %v6471_v4 }
 0xcea   : > { %v6474_v61 = vadd.f32 1e-06, %v6472_v28  ;;  %v6475_v43 = vadd.f32 1e-06, %v6473_v44 }
 0xceb   : > { %v7913_v29 = vpop.permute.xlu0 %7912  ;;  %v6489_v2 = vpop.permute.xlu1 %6488 }
 0xcec   : > { %7989 = vrsqrt.f32 %v6474_v61  ;;  %v7915_v30 = vunpack.i.h.bf16 %v7913_v29  ;;  %v7914_v38 = vunpack.i.l.bf16 %v7913_v29 }
 0xced   : > { %7991 = vrsqrt.f32 %v6475_v43 }
 0xcee   : > { %v7815_v39 = vpack.c.bf16 %v7915_v30, %v7914_v38 }
 0xcef   : > { %v6510_v3 = vpop.permute.xlu0 %6509 }
 0xcf0   : > { %7816 = vmatprep.subr.bf16.mxu0 %v7815_v39 }
 0xcf1   : > { %7818 = vmatpush3.bf16.msra.mxu0 %v7815_v39 }
 0xcf2   : > { %7820 = vmatprep.subr.bf16.mxu0 %v7819_v41 }
 0xcf5   : > { %7822 = vmatpush3.bf16.msra.mxu0 %v7819_v41 }
 0xcf6   : > { %v7990_v48 = vpop.eup %7989 }
 0xcf7   : > { %v7992_v60 = vpop.eup %7991  ;;  %v6478_v63 = vmul.f32 %v7990_v48, %v6462_v45 }
 0xcf8   : > { %v6479_v21 = vmul.f32 %v7992_v60, %v6463_v58 }
 0xcf9   : > { %v6486_v8 = vmul.f32 %v7345_v14, %v6478_v63 }
 0xcfa   : > { %v6487_v16 = vmul.f32 %v7345_v14, %v6479_v21 }
 0xcfb   : > { %v9251_v1 = vadd.f32 %v6489_v2, %v6486_v8 }
 0xcfc   : > { %v9253_v20 = vadd.f32 %v6489_v2, %v6487_v16 }
 0xcfd   : > { %7713 = vmatprep.mubr.msk.f32.mxu0 %vm557_vm1, %v9251_v1 }
 0xcfe   : > { %7714 = vmatmul.mubr.msk.f32.vlgmr.msra.gmra.mrb[36].mxu0 %vm557_vm1, %v9253_v20 }
 0xdd1   : > { %v7715_v12 = vpop.f32.mrb[36].mxu0 }
 0xdd2   : > { %v6590_v22 = vadd.f32 %v7715_v12, %v6510_v3  ;;  %v6584_v40 = vpop.f32.mrb[37].mxu0 }
 0xdd3   : > { %v6585_v54 = vadd.f32 %v6584_v40, %v6510_v3 }
 0xdd4   : > { %v6596_v11 = vmul.f32 0.70710677, %v6590_v22  ;;  %v6594_v12 = vmul.f32 0.5, %v6590_v22 }
 0xdd5   : > { %v6595_v19 = vmul.f32 0.70710677, %v6585_v54  ;;  %v6593_v47 = vmul.f32 0.5, %v6585_v54 }
 0xdd6   : > { %v6602_v55 = vand.u32 2147483647, %v6596_v11  ;;  %vm6598_vm8 = vcmp.ge.f32.partialorder %v6596_v11, 0.0  ;;  %v7348_v11 = vld [vmem:[%s8196_s17 + $0x3] ss:$0 sm:$0xff]  ;;  %s8114_s17 = smov (!%p7351_p6), 48  }
 0xdd7   : > { %v6601_v46 = vand.u32 2147483647, %v6595_v19  ;;  %vm6597_vm9 = vcmp.ge.f32.partialorder %v6595_v19, 0.0  ;;  %v6600_v26 = vsel %vm6598_vm8, 1.0, %v8109_v15 }
 0xdd8   : > { %v6604_v9 = vmul.f32 0.3275911, %v6602_v55  ;;  %v6630_v45 = vsub.f32 0.0, %v6602_v55  ;;  %v6599_v56 = vsel %vm6597_vm9, 1.0, %v8109_v15 }
 0xdd9   : > { %v6603_v53 = vmul.f32 0.3275911, %v6601_v46  ;;  %v6629_v52 = vsub.f32 0.0, %v6601_v46 }
 0xdda   : > { %v6606_v51 = vadd.f32 1.0, %v6604_v9  ;;  %v6632_v10 = vmul.f32 %v6630_v45, %v6602_v55 }
 0xddb   : > { %v6605_v58 = vadd.f32 1.0, %v6603_v53  ;;  %v6631_v62 = vmul.f32 %v6629_v52, %v6601_v46 }
 0xddc   : > { %7993 = vrcp.f32 %v6606_v51  ;;  %v6635_v28 = vmul.f32 1.442695, %v6632_v10 }
 0xddd   : > { %7995 = vrcp.f32 %v6605_v58  ;;  %v6633_v43 = vmul.f32 1.442695, %v6631_v62 }
 0xdde   : > { %7997 = vpow2.f32 %v6635_v28 }
 0xddf   : > { %7999 = vpow2.f32 %v6633_v43 }
 0xde6   : > { %v7994_v35 = vpop.eup %7993 }
 0xde7   : > { %v7996_v13 = vpop.eup %7995  ;;  %v6612_v14 = vmul.f32 1.0614054, %v7994_v35 }
 0xde8   : > { %v6611_v0 = vmul.f32 1.0614054, %v7996_v13  ;;  %v7998_v8 = vpop.eup %7997 }
 0xde9   : > { %v6614_v4 = vadd.f32 -1.4531521, %v6612_v14  ;;  %v8000_v59 = vpop.eup %7999 }
 0xdea   : > { %v6613_v44 = vadd.f32 -1.4531521, %v6611_v0 }
 0xdeb   : > { %v6616_v61 = vmul.f32 %v7994_v35, %v6614_v4 }
 0xdec   : > { %v6615_v57 = vmul.f32 %v7996_v13, %v6613_v44 }
 0xded   : > { %v6618_v29 = vadd.f32 1.4214138, %v6616_v61 }
 0xdee   : > { %v6617_v50 = vadd.f32 1.4214138, %v6615_v57 }
 0xdef   : > { %v6620_v30 = vmul.f32 %v7994_v35, %v6618_v29 }
 0xdf0   : > { %v6619_v38 = vmul.f32 %v7996_v13, %v6617_v50 }
 0xdf1   : > { %v6622_v39 = vadd.f32 -0.28449672, %v6620_v30 }
 0xdf2   : > { %v6621_v41 = vadd.f32 -0.28449672, %v6619_v38 }
 0xdf3   : > { %v6624_v48 = vmul.f32 %v7994_v35, %v6622_v39 }
 0xdf4   : > { %v6623_v60 = vmul.f32 %v7996_v13, %v6621_v41 }
 0xdf5   : > { %v6626_v63 = vadd.f32 0.2548296, %v6624_v48 }
 0xdf6   : > { %v6625_v21 = vadd.f32 0.2548296, %v6623_v60 }
 0xdf7   : > { %v6628_v2 = vmul.f32 %v7994_v35, %v6626_v63 }
 0xdf8   : > { %v6627_v16 = vmul.f32 %v7996_v13, %v6625_v21 }
 0xdf9   : > { %v6638_v27 = vmul.f32 %v7998_v8, %v6628_v2 }
 0xdfa   : > { %v6637_v7 = vmul.f32 %v8000_v59, %v6627_v16  ;;  %v6888_v16 = vcombine.low (!%p7351_p6), %v8978_v24, %v8986_v6  ;;  %v6904_v59 = vcombine.low (!%p7351_p6), %v8980_v18, %v8988_v5 }
 0xdfb   : > { %v6640_v33 = vsub.f32 1.0, %v6638_v27  ;;  %v6920_v27 = vcombine.low (!%p7351_p6), %v8994_v32, %v9002_v25 }
 0xdfc   : > { %v6639_v23 = vsub.f32 1.0, %v6637_v7  ;;  %v6936_v7 = vcombine.low (!%p7351_p6), %v8996_v34, %v9004_v49 }
 0xdfd   : > { %v6642_v17 = vmul.f32 %v6640_v33, %v6600_v26  ;;  %v8110_v33 = vmov (!%p7351_p6), 0.0  }
 0xdfe   : > { %v6641_v37 = vmul.f32 %v6639_v23, %v6599_v56 }
 0xdff   : > { %v6644_v36 = vadd.f32 1.0, %v6642_v17  ;;  %v6896_v17 = vrot.slane (!%p7351_p6), %v6888_v16, %v8270_v31 }
 0xe00   : > { %v6643_v3 = vadd.f32 1.0, %v6641_v37  ;;  %v6912_v37 = vrot.slane (!%p7351_p6), %v6904_v59, %v8270_v31 }
 0xe01   : > { %v6646_v55 = vmul.f32 %v6644_v36, %v6594_v12  ;;  %v6928_v36 = vrot.slane (!%p7351_p6), %v6920_v27, %v8270_v31 }
 0xe02   : > { %v6645_v40 = vmul.f32 %v6643_v3, %v6593_v47  ;;  %v6944_v47 = vrot.slane (!%p7351_p6), %v6936_v7, %v8270_v31 }
 0xe04   : > { %7732 = vmatprep.mubr.msk.f32.mxu1 %vm6653_vm10, %v6645_v40 }
 0xe05   : > { %7733 = vmatmul.mubr.msk.f32.vlgmr.msra.gmra.mrb[36].mxu1 %vm6653_vm10, %v6646_v55 }
 0xed8   : > { %v7734_v19 = vpop.f32.mrb[36].mxu1 }
 0xed9   : > { %v6732_v46 = vadd.f32 %v7734_v19, %v7348_v11  ;;  %v6726_v9 = vpop.f32.mrb[37].mxu1  ;;  %v6952_v19 = vcombine.low (!%p7351_p6), %v6896_v17, %v6912_v37 }
 0xeda   : > { %v6727_v53 = vadd.f32 %v7348_v11, %v6726_v9  ;;  %v6953_v9 = vcombine.high (!%p7351_p6), %v6896_v17, %v6912_v37 }
 0xedb   : > { %v6736_v51 = vadd.f32 %v6732_v46, %v9253_v20  ;;  %v6984_v46 = vcombine.low (!%p7351_p6), %v6928_v36, %v6944_v47 }
 0xedc   : > { %v6735_v58 = vadd.f32 %v6727_v53, %v9251_v1  ;;  %v6985_v53 = vcombine.high (!%p7351_p6), %v6928_v36, %v6944_v47 }
 0xedd   : > { %v6740_v54 = vsel %vm557_vm1, %v6736_v51, 0.0 }
 0xede   : > { %6741 = vadd.xlane.f32.xlu0 %v6740_v54  ;;  %v6737_v22 = vsel %vm557_vm1, %v6735_v58, 0.0 }
 0xedf   : > { %6738 = vadd.xlane.f32.xlu1 %v6737_v22  ;;  %v9310_v22 = vrot.slane (!%p7351_p6), %v6952_v19, %v8286_v42 }
 0xf6b   : > { %v6742_v45 = vpop.xlane.xlu0 %6741 }
 0xf6c   : > { %v6744_v52 = vmul.f32 0.03125, %v6742_v45  ;;  %v6739_v35 = vpop.xlane.xlu1 %6738  ;;  %v9313_v45 = vrot.slane (!%p7351_p6), %v6984_v46, %v8286_v42 }
 0xf6d   : > { %v6743_v10 = vmul.f32 0.03125, %v6739_v35  ;;  %v6905_v35 = vcombine.high (!%p7351_p6), %v8980_v18, %v8988_v5 }
 0xf6e   : > { %v6746_v13 = vsub.f32 %v6736_v51, %v6744_v52 }
 0xf6f   : > { %v6745_v14 = vsub.f32 %v6735_v58, %v6743_v10  ;;  %v6921_v10 = vcombine.high (!%p7351_p6), %v8994_v32, %v9002_v25  ;;  %v7016_v32 = vcombine.low (!%p7351_p6), %v9310_v22, %v9313_v45 }
 0xf70   : > { %v6748_v62 = vmul.f32 %v6746_v13, %v6746_v13 }
 0xf71   : > { %v6747_v0 = vmul.f32 %v6745_v14, %v6745_v14 }
 0xf72   : > { %v6752_v4 = vsel %vm557_vm1, %v6748_v62, 0.0 }
 0xf73   : > { %6753 = vadd.xlane.f32.xlu1 %v6752_v4  ;;  %v6749_v20 = vsel %vm557_vm1, %v6747_v0, 0.0  ;;  %v6919_v4 = vrot.slane (!%p7351_p6), %v6905_v35, %v8270_v31 }
 0xf74   : > { %6750 = vadd.xlane.f32.xlu0 %v6749_v20  ;;  %v6935_v20 = vrot.slane (!%p7351_p6), %v6921_v10, %v8270_v31 }
 0xf84   : > { %6768 = vrot.lane.b32.xlu1 %v7348_v11, %s8099_s8 }
 0xf8a   : > { %6763 = vrot.lane.b32.xlu0 %v7348_v11, %s8097_s30  ;;  %v6889_v11 = vcombine.high (!%p7351_p6), %v8978_v24, %v8986_v6  ;;  %v6967_v24 = vrot.slane (!%p7351_p6), %v6953_v9, %v8286_v42  ;;  %v6999_v6 = vrot.slane (!%p7351_p6), %v6985_v53, %v8286_v42 }
 0xf8c   : > { %v6903_v54 = vrot.slane (!%p7351_p6), %v6889_v11, %v8270_v31  ;;  %v7018_v5 = vcombine.low (!%p7351_p6), %v6967_v24, %v6999_v6 }
0x1000   : > { %v6754_v1 = vpop.xlane.xlu1 %6753 }
0x1001   : > { %v6756_v28 = vmul.f32 0.03125, %v6754_v1  ;;  %v6751_v44 = vpop.xlane.xlu0 %6750 }
0x1002   : > { %v6755_v61 = vmul.f32 0.03125, %v6751_v44  ;;  %v6969_v44 = vcombine.high (!%p7351_p6), %v6903_v54, %v6919_v4 }
0x1003   : > { %v6758_v43 = vadd.f32 1e-06, %v6756_v28 }
0x1004   : > { %v6757_v57 = vadd.f32 1e-06, %v6755_v61  ;;  %v6769_v41 = vpop.permute.xlu1 %6768 }
0x1005   : > { %8001 = vrsqrt.f32 %v6758_v43  ;;  %v6764_v50 = vpop.permute.xlu0 %6763  ;;  %v7019_v43 = vcombine.high (!%p7351_p6), %v6967_v24, %v6999_v6 }
0x1006   : > { %8003 = vrsqrt.f32 %v6757_v57 }
0x100f   : > { %v8002_v29 = vpop.eup %8001 }
0x1010   : > { %v8004_v30 = vpop.eup %8003  ;;  %v6762_v38 = vmul.f32 %v8002_v29, %v6746_v13  ;;  %v6937_v13 = vcombine.high (!%p7351_p6), %v8996_v34, %v9004_v49  ;;  %v6968_v34 = vcombine.low (!%p7351_p6), %v6903_v54, %v6919_v4  ;;  %v6983_v29 = vrot.slane (!%p7351_p6), %v6969_v44, %v8286_v42 }
0x1011   : > { %v6761_v39 = vmul.f32 %v8004_v30, %v6745_v14  ;;  %6778 = sbr.rel (%p7351_p6) target bundleno = 4263 (0x10a7), region = 52  ;;  %v7017_v14 = vcombine.high (!%p7351_p6), %v9310_v22, %v9313_v45 }
0x1012   : > { %v6767_v48 = vmul.f32 %v6764_v50, %v6762_v38  ;;  %v6951_v18 = vrot.slane (!%p7351_p6), %v6937_v13, %v8270_v31  ;;  %v6976_v1 = vrot.slane (!%p7351_p6), %v6968_v34, %v8286_v42 }
0x1013   : > { %v6766_v60 = vmul.f32 %v6764_v50, %v6761_v39  ;;  %7025 = vrot.lane.b32.xlu0 (!%p7351_p6), %v7017_v14, %s8113_s14 }
0x1014   : > { %v6772_v63 = vadd.f32 %v6769_v41, %v6767_v48  ;;  %v7000_v25 = vcombine.low (!%p7351_p6), %v6935_v20, %v6951_v18  ;;  %v7001_v61 = vcombine.high (!%p7351_p6), %v6935_v20, %v6951_v18 }
0x1015   : > { %v6771_v21 = vadd.f32 %v6769_v41, %v6766_v60 }
0x1016   : > { %6774 = vst.msk [vmem:[#allocation2 + $0x8] sm:$0xff] %vm557_vm1, %v6772_v63  ;;  %v6801_v8 = vrot.slane (!%p7351_p6), %v6772_v63, %v8270_v31  ;;  %v6794_v56 = vcombine.high (!%p7351_p6), %v6772_v63, %v8110_v33  ;;  %v7008_v28 = vrot.slane (!%p7351_p6), %v7000_v25, %v8286_v42  ;;  %v7015_v50 = vrot.slane (!%p7351_p6), %v7001_v61, %v8286_v42 }
0x1017   : > { %6773 = vst.msk [vmem:[#allocation2] sm:$0xff] %vm557_vm1, %v6771_v21  ;;  %v6786_v2 = vrot.slane (!%p7351_p6), %v6771_v21, %v8270_v31  ;;  %v6779_v15 = vcombine.high (!%p7351_p6), %v6771_v21, %v8110_v33  ;;  %7029 = vrot.lane.b32.xlu0 (!%p7351_p6), %v7018_v5, %s8112_s11 }
0x1018   : > { %v6808_v55 = vrot.slane %v6794_v56, %v8270_v31  ;;  %v7022_v30 = vcombine.low %v6983_v29, %v7015_v50  ;;  %v7021_v39 = vcombine.high %v6976_v1, %v7008_v28  ;;  %v7023_v41 = vcombine.high %v6983_v29, %v7015_v50 }
0x1019   : > { %v6810_v26 = vcombine.high %v6786_v2, %v6801_v8  ;;  %v6809_v23 = vcombine.low %v6786_v2, %v6801_v8  ;;  %v6793_v3 = vrot.slane %v6779_v15, %v8270_v31  ;;  %v7020_v31 = vcombine.low %v6976_v1, %v7008_v28 }
0x101b   : > { %v6824_v12 = vrot.slane %v6810_v26, %v8286_v42  ;;  %v9300_v40 = vrot.slane %v6809_v23, %v8286_v42  ;;  %v6825_v58 = vcombine.low %v6793_v3, %v6808_v55  ;;  %v6826_v62 = vcombine.high %v6793_v3, %v6808_v55  ;;  %7033 = vrot.lane.b32.xlu0 %v7019_v43, %s8114_s17 }
0x101d   : > { %6850 = vrot.lane.b32.xlu1 %v6824_v12, %s8111_s24  ;;  %v6841_v51 = vcombine.high %v9300_v40, %v8110_v33  ;;  %v6833_v52 = vrot.slane %v6825_v58, %v8286_v42  ;;  %v6840_v49 = vrot.slane %v6826_v62, %v8286_v42  ;;  %v6842_v38 = vcombine.high %v6824_v12, %v8110_v33 }
0x101f   : > { %v6843_v0 = vcombine.high %v6833_v52, %v8110_v33  ;;  %v6844_v57 = vcombine.high %v6840_v49, %v8110_v33  ;;  %6862 = vrot.lane.b32.xlu0 %v6840_v49, %s8111_s24 }
0x1021   : > { %6846 = vrot.lane.b32.xlu1 %v6841_v51, %s8112_s11 }
0x1023   : > { %6854 = vrot.lane.b32.xlu0 %v6842_v38, %s8115_s22 }
0x1025   : > { %6858 = vrot.lane.b32.xlu1 %v6843_v0, %s8112_s11 }
0x1027   : > { %7041 = vrot.lane.b32.xlu0 %v7021_v39, %s8116_s23 }
0x1029   : > { %7037 = vrot.lane.b32.xlu1 %v7020_v31, %s8111_s24 }
0x102b   : > { %7049 = vrot.lane.b32.xlu0 %v7023_v41, %s8117_s29 }
0x102d   : > { %6866 = vrot.lane.b32.xlu1 %v6844_v57, %s8115_s22 }
0x1031   : > { %7045 = vrot.lane.b32.xlu1 %v7022_v30, %s8115_s22 }
0x1085   : > { %v7026_v42 = vpop.permute.xlu0 %7025 }
0x1086   : > { %v7052_v15 = vsel %vm3118_vm5, %v7016_v32, %v7026_v42 }
0x1089   : > { %v7030_v21 = vpop.permute.xlu0 %7029 }
0x108a   : > { %v7053_v23 = vsel %vm557_vm1, %v7052_v15, %v7030_v21 }
0x108d   : > { %v7034_v2 = vpop.permute.xlu0 %7033 }
0x108e   : > { %v7055_v56 = vsel %vm7054_vm11, %v7053_v23, %v7034_v2 }
0x108f   : > { %v6851_v48 = vpop.permute.xlu1 %6850 }
0x1091   : > { %v6863_v59 = vpop.permute.xlu0 %6862 }
0x1093   : > { %v6847_v60 = vpop.permute.xlu1 %6846 }
0x1094   : > { %v6869_v27 = vsel %vm557_vm1, %v9300_v40, %v6847_v60 }
0x1095   : > { %v6870_v26 = vsel %vm6653_vm10, %v6869_v27, %v6851_v48  ;;  %v6855_v17 = vpop.permute.xlu0 %6854 }
0x1096   : > { %v6872_v36 = vsel %vm6871_vm12, %v6870_v26, %v6855_v17 }
0x1097   : > { %v6859_v63 = vpop.permute.xlu1 %6858 }
0x1098   : > { %v6873_v16 = vsel %vm557_vm1, %v6833_v52, %v6859_v63 }
0x1099   : > { %v6874_v7 = vsel %vm6653_vm10, %v6873_v16, %v6863_v59  ;;  %v7042_v12 = vpop.permute.xlu0 %7041 }
0x109b   : > { %v7038_v8 = vpop.permute.xlu1 %7037 }
0x109c   : > { %v7056_v3 = vsel %vm6653_vm10, %v7055_v56, %v7038_v8 }
0x109d   : > { %v7058_v40 = vsel %vm7057_vm13, %v7056_v3, %v7042_v12  ;;  %v7050_v19 = vpop.permute.xlu0 %7049 }
0x109f   : > { %v6867_v33 = vpop.permute.xlu1 %6866 }
0x10a0   : > { %v6875_v37 = vsel %vm6871_vm12, %v6874_v7, %v6867_v33 }
0x10a1   : > { %v6878_v47 = vcombine.low %v6872_v36, %v6875_v37 }
0x10a3   : > { %7352 = vst.sshfl [vmem:[#allocation3] sm:$0x33 pattern:$0x76325410] %v6878_v47  ;;  %v7046_v55 = vpop.permute.xlu1 %7045 }
0x10a4   : > { %v7059_v11 = vsel %vm6871_vm12, %v7058_v40, %v7046_v55 }
0x10a5   : > { %v7061_v46 = vsel %vm7060_vm14, %v7059_v11, %v7050_v19 }
0x10a6   : > { %7062 = vst [vmem:[#allocation5] sm:$0xff] %v7061_v46 }
0x10a7 PF: > { %p9354_p7 = scmp.eq.s32.totalorder %s7215_s27, 1  ;;  %s8118_s8 = smov [#allocation3]  }
0x10a8   : > { %s7073_s15 = sshll.u32 %s8118_s8, 4  ;;  %s8119_s16 = smov [#allocation5]   ;;  %s7074_s15 = int_to_ptr.vmem [resolvable:$true] %s7073_s15 }
0x10a9   : > { %s7086_s18 = sshll.u32 %s8119_s16, 4  ;;  %s8010_s19 = scalar_lea.vmem %s7074_s15, 64  ;;  %s9358_s18 = int_to_ptr.vmem [resolvable:$true] %s7086_s18 }
0x10aa   : > { %p8011_p8 = scmp.ne.s32.totalorder %s7074_s15, %s8010_s19  ;;  %p8017_p11 = scmp.lt.s32.totalorder %s7074_s15, %s7074_s15 }
0x10ab   : > { %p8018_p12 = scmp.lt.s32.totalorder %s8010_s19, %s8010_s19 }
0x10ac   : > { %p8012_p9 = pnand %p8011_p8, %p9354_p7 }
0x10ad   : > { %p8019_p13 = por %p8018_p12, %p8017_p11 }
0x10ae   : > { %p8013_p10 = pneg %p8012_p9 }
0x10b0   : > { %p8020_p0 = pnand %p8019_p13, %p8013_p10 }
0x10b2   : > { %8023 = shalt.err (!%p8020_p0)
}
0x10b3   : > { %s8024_s10 = scalar_lea.hbm %s9424_s6, 64 }
0x10b4   : > { %p8025_p1 = scmp.ne.s32.totalorder %s9424_s6, %s8024_s10  ;;  %p8030_p4 = scmp.lt.u32.totalorder %s8024_s10, %s9424_s6 }
0x10b6   : > { %p8026_p2 = pnand %p8025_p1, %p9354_p7 }
0x10b8   : > { %p8027_p3 = pneg %p8026_p2 }
0x10ba   : > { %p8032_p5 = pnand %p8030_p4, %p8027_p3 }
0x10bc   : > { %8035 = shalt.err (!%p8032_p5)
}
0x10bd   : > { %7840 = dma.vmem_to_hbm [thread:$0]  (%p9354_p7), %s7074_s15, 64, %s9424_s6, [#allocation4]  }
0x10be   : > { %s8036_s14 = scalar_lea.vmem %s9358_s18, 128  ;;  %p8043_p10 = scmp.lt.s32.totalorder %s9358_s18, %s9358_s18 }
0x10bf   : > { %p8037_p6 = scmp.ne.s32.totalorder %s9358_s18, %s8036_s14  ;;  %p8044_p11 = scmp.lt.s32.totalorder %s8036_s14, %s8036_s14 }
0x10c1   : > { %p8038_p8 = pnand %p8037_p6, %p9354_p7  ;;  %p8045_p12 = por %p8044_p11, %p8043_p10 }
0x10c3   : > { %p8039_p9 = pneg %p8038_p8 }
0x10c5   : > { %p8046_p13 = pnand %p8045_p12, %p8039_p9 }
0x10c7   : > { %8049 = shalt.err (!%p8046_p13)
}
0x10c8   : > { %s8050_s23 = scalar_lea.hbm %s9425_s7, 128 }
0x10c9   : > { %p8051_p0 = scmp.ne.s32.totalorder %s9425_s7, %s8050_s23  ;;  %p8056_p3 = scmp.lt.u32.totalorder %s8050_s23, %s9425_s7 }
0x10cb   : > { %p8052_p1 = pnand %p8051_p0, %p9354_p7 }
0x10cd   : > { %p8053_p2 = pneg %p8052_p1 }
0x10cf   : > { %p8058_p4 = pnand %p8056_p3, %p8053_p2 }
0x10d1   : > { %8061 = shalt.err (!%p8058_p4)
}
0x10d2   : > { %7842 = dma.vmem_to_hbm [thread:$0]  (%p9354_p7), %s9358_s18, 128, %s9425_s7, [#allocation6]  }
0x10d3   : > { %8075 = dma.done.wait (%p9354_p7), [#allocation4], 64  }
0x10d4   : > { %8077 = vsyncadd (%p9354_p7), [#allocation4], 4294967232 }
0x10d5   : > { %8079 = dma.done.wait (%p9354_p7), [#allocation6], 128  }
0x10d6   : > { %8081 = vsyncadd (%p9354_p7), [#allocation6], 4294967168 }
0x10d7 PF: > { %s20_s26 = sadd.s32 1, %s8092_s26   ;;  %s9429_s24 = smov %s8088_s25 }
0x10d8   : > { %p17_p5 = scmp.ge.s32.totalorder %s20_s26, 4   ;;  %s9430_s25 = smov %s9432_s28 }
0x10da   :  { %19 = sbr.rel (!%p17_p5) target bundleno = 3 (0x3), region = 104 }
0x10e1   :  { %7103 = vsyncpa [#allocation4], 1 }
0x10e2   :  { %7105 = vsyncpa [#allocation4 + $0x1], 1 }
0x10e3   :  { %7106 = vsyncpa [#allocation6], 1 }

</bundles_post_ra>
